<compile_context>
chip_gen: v7x
topology: tpu7x:2x2x1
jax: 0.10.0
libtpu: 0.0.40
codegen_flags: <defaults>
</compile_context>

<pallas_src>
import jax
import jax.numpy as jnp
from jax.experimental import pallas as pl
from jax.experimental.pallas import tpu as pltpu

# ---- model hyper-parameters (consistent with the PyTorch module) ----------------------
SEQ_LEN = 8
TARGET_DIM = 24            # hardcoded `[:, :, :24]` slice in Seq2SeqLSTM.forward
FEAT_EXTRA = 102           # hardcoded `reshape(1, 1, 102)` in Seq2SeqLSTM.forward
N_FEATURES = TARGET_DIM + FEAT_EXTRA     # 126 (forced by the concat in the decoder loop)
NF_PAD = 128               # lane-aligned feature width
HIDDEN = 32                # embedding_dim
GATES = 4 * HIDDEN         # 128
NUM_LAYERS = 3
OUTPUT_LENGTH = 4
WDTYPE = jnp.bfloat16      # weight storage dtype (upcast to f32 inside the kernel)


# --------------------------------- Pallas kernel ---------------------------------------
def seq2seq_kernel(x_ref, prev_y_ref, feat_ref,
                   enc_w0_ih_ref, enc_w0_hh_ref, enc_wcat12_ref, enc_b0_ref, enc_b12_ref,
                   dec_w0_ih_ref, dec_w0_cat_ref, dec_wfeat_ref, dec_b0_ref,
                   dec_wcat12_ref, dec_b12_ref,
                   w_out_ref, b_out_ref,
                   targets_ref):
    H = HIDDEN
    f32 = jnp.float32

    def mm(a, b):
        return jnp.dot(a, b, preferred_element_type=f32)

    def cell(gates, c_prev):
        # nonlinearities applied over the whole 128-lane gate vector (2 EUP ops, not 4)
        sig = jax.nn.sigmoid(gates)
        th = jnp.tanh(gates)
        i = sig[:, 0 * H:1 * H]
        f = sig[:, 1 * H:2 * H]
        g = th[:, 2 * H:3 * H]
        o = sig[:, 3 * H:4 * H]
        c = f * c_prev + i * g
        h = o * jnp.tanh(c)
        return h, c

    # ---- off-recurrence precomputes (batched, one MXU op each) ----
    # encoder layer-0 input projection for all 8 time steps (+ layer-0 bias folded in)
    x_proj = mm(x_ref[...], enc_w0_ih_ref[...].astype(f32)) + enc_b0_ref[...]        # (8,128)
    # decoder step-0 input (prev_y) projection (+ bias)
    pre0 = mm(prev_y_ref[...], dec_w0_ih_ref[...].astype(f32)) + dec_b0_ref[...]     # (1,128)
    # exogenous-feature projection for decoder steps 1..3 (+ bias); row 0 is unused
    feat_proj = mm(feat_ref[...], dec_wfeat_ref[...].astype(f32)) + dec_b0_ref[...]  # (4,128)

    # ---- recurrent weights (bf16 storage -> f32 values) ----
    enc_w0_hh = enc_w0_hh_ref[...].astype(f32)        # (32,128)
    enc_wcat1 = enc_wcat12_ref[0].astype(f32)         # (64,128)  [W_ih1; W_hh1]
    enc_wcat2 = enc_wcat12_ref[1].astype(f32)         # (64,128)  [W_ih2; W_hh2]
    eb12 = enc_b12_ref[...]
    enc_b1 = eb12[0:1, :]
    enc_b2 = eb12[1:2, :]

    dec_w0_cat = dec_w0_cat_ref[...].astype(f32)      # (56,128)  [W_hh0; W_ih0[:24]]
    dec_w0_hh = dec_w0_cat[0:32, :]                   # (32,128)
    dec_wcat1 = dec_wcat12_ref[0].astype(f32)
    dec_wcat2 = dec_wcat12_ref[1].astype(f32)
    db12 = dec_b12_ref[...]
    dec_b1 = db12[0:1, :]
    dec_b2 = db12[1:2, :]

    w_out = w_out_ref[...]                            # (32,24)
    b_out = b_out_ref[...]                            # (1,24)

    zeros = jnp.zeros((1, H), f32)
    h0 = h1 = h2 = zeros
    c0 = c1 = c2 = zeros

    # ---- encoder: 8 fully-unrolled steps through the 3-layer stack (zero init states) ----
    for t in range(SEQ_LEN):
        g0 = x_proj[t:t + 1, :] + mm(h0, enc_w0_hh)
        h0, c0 = cell(g0, c0)
        g1 = mm(jnp.concatenate([h0, h1], axis=1), enc_wcat1) + enc_b1
        h1, c1 = cell(g1, c1)
        g2 = mm(jnp.concatenate([h1, h2], axis=1), enc_wcat2) + enc_b2
        h2, c2 = cell(g2, c2)

    # ---- decoder: 4 fully-unrolled autoregressive steps ----
    y24 = None
    for step in range(OUTPUT_LENGTH):
        if step == 0:
            g0 = pre0 + mm(h0, dec_w0_hh)
        else:
            # dec_input = [y24 | features[step]]; feature part is precomputed in feat_proj
            g0 = mm(jnp.concatenate([h0, y24], axis=1), dec_w0_cat) + feat_proj[step:step + 1, :]
        h0, c0 = cell(g0, c0)
        g1 = mm(jnp.concatenate([h0, h1], axis=1), dec_wcat1) + dec_b1
        h1, c1 = cell(g1, c1)
        g2 = mm(jnp.concatenate([h1, h2], axis=1), dec_wcat2) + dec_b2
        h2, c2 = cell(g2, c2)
        y24 = mm(h2, w_out) + b_out                   # (1,24) == output_layer(h)[:, :24]
        targets_ref[step:step + 1, :] = y24


# --------------------------------- wrapper ----------------------------------------------
def _pad_lanes(a, width):
    return jnp.pad(a, ((0, 0), (0, width - a.shape[-1])))


def _pad_rows(w, rows):
    return jnp.pad(w, ((0, rows - w.shape[0]), (0, 0)))


def pack_inputs(x, prev_y, features, params):
    """Build the padded / fused kernel operands from the logical parameters."""
    enc, dec, w_out, b_out = params
    f32 = jnp.float32

    x_pad = _pad_lanes(x.reshape(SEQ_LEN, N_FEATURES).astype(f32), NF_PAD)
    prev_y_pad = _pad_lanes(prev_y.reshape(1, N_FEATURES).astype(f32), NF_PAD)
    feat_pad = _pad_lanes(features.reshape(OUTPUT_LENGTH, FEAT_EXTRA).astype(f32), NF_PAD)

    (e0_wih, e0_whh, e0_b), (e1_wih, e1_whh, e1_b), (e2_wih, e2_whh, e2_b) = enc
    enc_w0_ih = _pad_rows(e0_wih, NF_PAD).astype(WDTYPE)                       # (128,128)
    enc_w0_hh = e0_whh.astype(WDTYPE)                                          # (32,128)
    enc_wcat12 = jnp.stack([jnp.concatenate([e1_wih, e1_whh], axis=0),
                            jnp.concatenate([e2_wih, e2_whh], axis=0)]).astype(WDTYPE)  # (2,64,128)
    enc_b0 = e0_b.reshape(1, GATES).astype(f32)
    enc_b12 = jnp.stack([e1_b, e2_b]).astype(f32)                              # (2,128)

    (d0_wih, d0_whh, d0_b), (d1_wih, d1_whh, d1_b), (d2_wih, d2_whh, d2_b) = dec
    dec_w0_ih = _pad_rows(d0_wih, NF_PAD).astype(WDTYPE)                       # (128,128)
    dec_w0_cat = jnp.concatenate([d0_whh, d0_wih[:TARGET_DIM, :]], axis=0).astype(WDTYPE)  # (56,128)
    dec_wfeat = _pad_rows(d0_wih[TARGET_DIM:, :], NF_PAD).astype(WDTYPE)       # (128,128)
    dec_b0 = d0_b.reshape(1, GATES).astype(f32)
    dec_wcat12 = jnp.stack([jnp.concatenate([d1_wih, d1_whh], axis=0),
                            jnp.concatenate([d2_wih, d2_whh], axis=0)]).astype(WDTYPE)
    dec_b12 = jnp.stack([d1_b, d2_b]).astype(f32)

    w_out24 = w_out[:, :TARGET_DIM].astype(f32)                                # (32,24)
    b_out24 = b_out[:TARGET_DIM].reshape(1, TARGET_DIM).astype(f32)            # (1,24)

    return (x_pad, prev_y_pad, feat_pad,
            enc_w0_ih, enc_w0_hh, enc_wcat12, enc_b0, enc_b12,
            dec_w0_ih, dec_w0_cat, dec_wfeat, dec_b0, dec_wcat12, dec_b12,
            w_out24, b_out24)


@jax.jit
def seq2seq_forward(x, prev_y, features, params):
    args = pack_inputs(x, prev_y, features, params)
    vmem = pl.BlockSpec(memory_space=pltpu.MemorySpace.VMEM)
    return pl.pallas_call(
        seq2seq_kernel,
        out_shape=jax.ShapeDtypeStruct((OUTPUT_LENGTH, TARGET_DIM), jnp.float32),
        in_specs=[vmem] * len(args),
        out_specs=vmem,
    )(*args)


# ---- deterministic parameter init (PyTorch-style uniform(-1/sqrt(H), 1/sqrt(H))) -------
def _uniform(key, shape, scale):
    return jax.random.uniform(key, shape, jnp.float32, -scale, scale)


def init_lstm_stack(key):
    scale = 1.0 / (HIDDEN ** 0.5)
    layers = []
    keys = jax.random.split(key, NUM_LAYERS * 4)
    for l in range(NUM_LAYERS):
        in_dim = N_FEATURES if l == 0 else HIDDEN
        k0, k1, k2, k3 = keys[4 * l:4 * l + 4]
        w_ih = _uniform(k0, (in_dim, GATES), scale)          # stored transposed: gates = x @ W
        w_hh = _uniform(k1, (HIDDEN, GATES), scale)
        b = _uniform(k2, (GATES,), scale) + _uniform(k3, (GATES,), scale)   # b_ih + b_hh
        layers.append((w_ih, w_hh, b))
    return layers


def init_params(key):
    k_enc, k_dec, k_w, k_b = jax.random.split(key, 4)
    enc = init_lstm_stack(k_enc)
    dec = init_lstm_stack(k_dec)
    scale = 1.0 / (HIDDEN ** 0.5)
    w_out = _uniform(k_w, (HIDDEN, N_FEATURES), scale)
    b_out = _uniform(k_b, (N_FEATURES,), scale)
    return enc, dec, w_out, b_out


# ---- pure-JAX reference (same math; weights quantized to bf16 like the kernel storage) --
def reference_forward(x, prev_y, features, params):
    enc, dec, w_out, b_out = params
    H = HIDDEN

    def q(w):  # mimic bf16 weight storage used by the kernel
        return w.astype(WDTYPE).astype(jnp.float32)

    def stack_step(inp, hs, cs, layers):
        new_hs, new_cs = [], []
        for l, (w_ih, w_hh, b) in enumerate(layers):
            gates = inp @ q(w_ih) + hs[l] @ q(w_hh) + b
            i = jax.nn.sigmoid(gates[:, 0 * H:1 * H])
            f = jax.nn.sigmoid(gates[:, 1 * H:2 * H])
            g = jnp.tanh(gates[:, 2 * H:3 * H])
            o = jax.nn.sigmoid(gates[:, 3 * H:4 * H])
            c = f * cs[l] + i * g
            h = o * jnp.tanh(c)
            new_hs.append(h)
            new_cs.append(c)
            inp = h
        return inp, new_hs, new_cs

    x2d = x.reshape(SEQ_LEN, N_FEATURES)
    hs = [jnp.zeros((1, H), jnp.float32) for _ in range(NUM_LAYERS)]
    cs = [jnp.zeros((1, H), jnp.float32) for _ in range(NUM_LAYERS)]
    for t in range(SEQ_LEN):
        _, hs, cs = stack_step(x2d[t:t + 1, :], hs, cs, enc)

    dec_input = prev_y.reshape(1, N_FEATURES)
    outs = []
    for step in range(OUTPUT_LENGTH):
        top_h, hs, cs = stack_step(dec_input, hs, cs, dec)
        y = top_h @ w_out + b_out.reshape(1, N_FEATURES)
        y24 = y[:, :TARGET_DIM]
        outs.append(y24.reshape(TARGET_DIM))
        if step + 1 < OUTPUT_LENGTH:
            dec_input = jnp.concatenate(
                [y24, features[step + 1].reshape(1, FEAT_EXTRA)], axis=1)
    return jnp.stack(outs)


if __name__ == "__main__":
    key = jax.random.PRNGKey(0)
    k_in, k_par = jax.random.split(key)
    kx, ky, kf = jax.random.split(k_in, 3)

    x = jax.random.normal(kx, (SEQ_LEN, N_FEATURES), jnp.float32)
    prev_y = jax.random.normal(ky, (1, 1, N_FEATURES), jnp.float32)
    features = jax.random.normal(kf, (OUTPUT_LENGTH, FEAT_EXTRA), jnp.float32)
    params = init_params(k_par)

    out = seq2seq_forward(x, prev_y, features, params)
    out = jax.block_until_ready(out)

    ref = reference_forward(x, prev_y, features, params)
    assert out.shape == (OUTPUT_LENGTH, TARGET_DIM), out.shape
    max_err = float(jnp.max(jnp.abs(out - ref)))
    assert max_err < 2e-3, f"max abs error {max_err}"
    print("KERNEL_OK")
</pallas_src>

<mosaic_0001>
module attributes {stable_mosaic.version = 11 : i64} {
  func.func @seq2seq_kernel(%arg0: memref<8x128xf32, #tpu.memory_space<vmem>>, %arg1: memref<1x128xf32, #tpu.memory_space<vmem>>, %arg2: memref<4x128xf32, #tpu.memory_space<vmem>>, %arg3: memref<128x128xbf16, #tpu.memory_space<vmem>>, %arg4: memref<32x128xbf16, #tpu.memory_space<vmem>>, %arg5: memref<2x64x128xbf16, #tpu.memory_space<vmem>>, %arg6: memref<1x128xf32, #tpu.memory_space<vmem>>, %arg7: memref<2x128xf32, #tpu.memory_space<vmem>>, %arg8: memref<128x128xbf16, #tpu.memory_space<vmem>>, %arg9: memref<56x128xbf16, #tpu.memory_space<vmem>>, %arg10: memref<128x128xbf16, #tpu.memory_space<vmem>>, %arg11: memref<1x128xf32, #tpu.memory_space<vmem>>, %arg12: memref<2x64x128xbf16, #tpu.memory_space<vmem>>, %arg13: memref<2x128xf32, #tpu.memory_space<vmem>>, %arg14: memref<32x24xf32, #tpu.memory_space<vmem>>, %arg15: memref<1x24xf32, #tpu.memory_space<vmem>>, %arg16: memref<4x24xf32, #tpu.memory_space<vmem>>) attributes {dimension_semantics = [], scalar_prefetch = 0 : i64, scratch_operands = 0 : i64, tpu.core_type = #tpu.core_type<tc>} {
    %c0 = arith.constant 0 : index
    %c0_0 = arith.constant 0 : index
    %0 = vector.load %arg0[%c0, %c0_0] : memref<8x128xf32, #tpu.memory_space<vmem>>, vector<8x128xf32>
    %c0_1 = arith.constant 0 : index
    %c0_2 = arith.constant 0 : index
    %1 = vector.load %arg3[%c0_1, %c0_2] : memref<128x128xbf16, #tpu.memory_space<vmem>>, vector<128x128xbf16>
    %2 = arith.extf %1 : vector<128x128xbf16> to vector<128x128xf32>
    %cst = arith.constant dense<0.000000e+00> : vector<8x128xf32>
    %3 = tpu.matmul %0, %2, %cst {dimension_numbers = #tpu.dot_dimension_numbers<[1], [0], [0], [1], [0, 0, 1, 1], [], []>} : vector<8x128xf32>, vector<128x128xf32>, vector<8x128xf32> -> vector<8x128xf32>
    %c0_3 = arith.constant 0 : index
    %c0_4 = arith.constant 0 : index
    %4 = vector.load %arg6[%c0_3, %c0_4] : memref<1x128xf32, #tpu.memory_space<vmem>>, vector<1x128xf32>
    %5 = vector.broadcast %4 : vector<1x128xf32> to vector<8x128xf32>
    %6 = arith.addf %3, %5 : vector<8x128xf32>
    %c0_5 = arith.constant 0 : index
    %c0_6 = arith.constant 0 : index
    %7 = vector.load %arg1[%c0_5, %c0_6] : memref<1x128xf32, #tpu.memory_space<vmem>>, vector<1x128xf32>
    %c0_7 = arith.constant 0 : index
    %c0_8 = arith.constant 0 : index
    %8 = vector.load %arg8[%c0_7, %c0_8] : memref<128x128xbf16, #tpu.memory_space<vmem>>, vector<128x128xbf16>
    %9 = arith.extf %8 : vector<128x128xbf16> to vector<128x128xf32>
    %cst_9 = arith.constant dense<0.000000e+00> : vector<1x128xf32>
    %10 = tpu.matmul %7, %9, %cst_9 {dimension_numbers = #tpu.dot_dimension_numbers<[1], [0], [0], [1], [0, 0, 1, 1], [], []>} : vector<1x128xf32>, vector<128x128xf32>, vector<1x128xf32> -> vector<1x128xf32>
    %c0_10 = arith.constant 0 : index
    %c0_11 = arith.constant 0 : index
    %11 = vector.load %arg11[%c0_10, %c0_11] : memref<1x128xf32, #tpu.memory_space<vmem>>, vector<1x128xf32>
    %12 = arith.addf %10, %11 : vector<1x128xf32>
    %c0_12 = arith.constant 0 : index
    %c0_13 = arith.constant 0 : index
    %13 = vector.load %arg2[%c0_12, %c0_13] : memref<4x128xf32, #tpu.memory_space<vmem>>, vector<4x128xf32>
    %c0_14 = arith.constant 0 : index
    %c0_15 = arith.constant 0 : index
    %14 = vector.load %arg10[%c0_14, %c0_15] : memref<128x128xbf16, #tpu.memory_space<vmem>>, vector<128x128xbf16>
    %15 = arith.extf %14 : vector<128x128xbf16> to vector<128x128xf32>
    %cst_16 = arith.constant dense<0.000000e+00> : vector<4x128xf32>
    %16 = tpu.matmul %13, %15, %cst_16 {dimension_numbers = #tpu.dot_dimension_numbers<[1], [0], [0], [1], [0, 0, 1, 1], [], []>} : vector<4x128xf32>, vector<128x128xf32>, vector<4x128xf32> -> vector<4x128xf32>
    %c0_17 = arith.constant 0 : index
    %c0_18 = arith.constant 0 : index
    %17 = vector.load %arg11[%c0_17, %c0_18] : memref<1x128xf32, #tpu.memory_space<vmem>>, vector<1x128xf32>
    %18 = vector.broadcast %17 : vector<1x128xf32> to vector<4x128xf32>
    %19 = arith.addf %16, %18 : vector<4x128xf32>
    %c0_19 = arith.constant 0 : index
    %c0_20 = arith.constant 0 : index
    %20 = vector.load %arg4[%c0_19, %c0_20] : memref<32x128xbf16, #tpu.memory_space<vmem>>, vector<32x128xbf16>
    %21 = arith.extf %20 : vector<32x128xbf16> to vector<32x128xf32>
    %c0_21 = arith.constant 0 : index
    %c0_22 = arith.constant 0 : index
    %c0_23 = arith.constant 0 : index
    %22 = vector.load %arg5[%c0_21, %c0_22, %c0_23] : memref<2x64x128xbf16, #tpu.memory_space<vmem>>, vector<1x64x128xbf16>
    %23 = vector.shape_cast %22 : vector<1x64x128xbf16> to vector<64x128xbf16>
    %24 = arith.extf %23 : vector<64x128xbf16> to vector<64x128xf32>
    %c1 = arith.constant 1 : index
    %c0_24 = arith.constant 0 : index
    %c0_25 = arith.constant 0 : index
    %25 = vector.load %arg5[%c1, %c0_24, %c0_25] : memref<2x64x128xbf16, #tpu.memory_space<vmem>>, vector<1x64x128xbf16>
    %26 = vector.shape_cast %25 : vector<1x64x128xbf16> to vector<64x128xbf16>
    %27 = arith.extf %26 : vector<64x128xbf16> to vector<64x128xf32>
    %c0_26 = arith.constant 0 : index
    %c0_27 = arith.constant 0 : index
    %28 = vector.load %arg7[%c0_26, %c0_27] : memref<2x128xf32, #tpu.memory_space<vmem>>, vector<2x128xf32>
    %29 = vector.extract_strided_slice %28 {offsets = [0, 0], sizes = [1, 128], strides = [1, 1]} : vector<2x128xf32> to vector<1x128xf32>
    %30 = vector.extract_strided_slice %28 {offsets = [1, 0], sizes = [1, 128], strides = [1, 1]} : vector<2x128xf32> to vector<1x128xf32>
    %c0_28 = arith.constant 0 : index
    %c0_29 = arith.constant 0 : index
    %31 = vector.load %arg9[%c0_28, %c0_29] : memref<56x128xbf16, #tpu.memory_space<vmem>>, vector<56x128xbf16>
    %32 = arith.extf %31 : vector<56x128xbf16> to vector<56x128xf32>
    %33 = vector.extract_strided_slice %32 {offsets = [0, 0], sizes = [32, 128], strides = [1, 1]} : vector<56x128xf32> to vector<32x128xf32>
    %c0_30 = arith.constant 0 : index
    %c0_31 = arith.constant 0 : index
    %c0_32 = arith.constant 0 : index
    %34 = vector.load %arg12[%c0_30, %c0_31, %c0_32] : memref<2x64x128xbf16, #tpu.memory_space<vmem>>, vector<1x64x128xbf16>
    %35 = vector.shape_cast %34 : vector<1x64x128xbf16> to vector<64x128xbf16>
    %36 = arith.extf %35 : vector<64x128xbf16> to vector<64x128xf32>
    %c1_33 = arith.constant 1 : index
    %c0_34 = arith.constant 0 : index
    %c0_35 = arith.constant 0 : index
    %37 = vector.load %arg12[%c1_33, %c0_34, %c0_35] : memref<2x64x128xbf16, #tpu.memory_space<vmem>>, vector<1x64x128xbf16>
    %38 = vector.shape_cast %37 : vector<1x64x128xbf16> to vector<64x128xbf16>
    %39 = arith.extf %38 : vector<64x128xbf16> to vector<64x128xf32>
    %c0_36 = arith.constant 0 : index
    %c0_37 = arith.constant 0 : index
    %40 = vector.load %arg13[%c0_36, %c0_37] : memref<2x128xf32, #tpu.memory_space<vmem>>, vector<2x128xf32>
    %41 = vector.extract_strided_slice %40 {offsets = [0, 0], sizes = [1, 128], strides = [1, 1]} : vector<2x128xf32> to vector<1x128xf32>
    %42 = vector.extract_strided_slice %40 {offsets = [1, 0], sizes = [1, 128], strides = [1, 1]} : vector<2x128xf32> to vector<1x128xf32>
    %c0_38 = arith.constant 0 : index
    %c0_39 = arith.constant 0 : index
    %43 = vector.load %arg14[%c0_38, %c0_39] : memref<32x24xf32, #tpu.memory_space<vmem>>, vector<32x24xf32>
    %c0_40 = arith.constant 0 : index
    %c0_41 = arith.constant 0 : index
    %44 = vector.load %arg15[%c0_40, %c0_41] : memref<1x24xf32, #tpu.memory_space<vmem>>, vector<1x24xf32>
    %cst_42 = arith.constant 0.000000e+00 : f32
    %45 = vector.broadcast %cst_42 : f32 to vector<1x32xf32>
    %46 = vector.extract_strided_slice %6 {offsets = [0, 0], sizes = [1, 128], strides = [1, 1]} : vector<8x128xf32> to vector<1x128xf32>
    %cst_43 = arith.constant dense<0.000000e+00> : vector<1x128xf32>
    %47 = tpu.matmul %45, %21, %cst_43 {dimension_numbers = #tpu.dot_dimension_numbers<[1], [0], [0], [1], [0, 0, 1, 1], [], []>} : vector<1x32xf32>, vector<32x128xf32>, vector<1x128xf32> -> vector<1x128xf32>
    %48 = arith.addf %46, %47 : vector<1x128xf32>
    %49 = arith.negf %48 : vector<1x128xf32>
    %50 = math.exp %49 : vector<1x128xf32>
    %cst_44 = arith.constant 1.000000e+00 : f32
    %51 = vector.broadcast %cst_44 : f32 to vector<1x128xf32>
    %52 = arith.addf %51, %50 : vector<1x128xf32>
    %53 = arith.divf %51, %52 : vector<1x128xf32>
    %54 = math.tanh %48 : vector<1x128xf32>
    %55 = vector.extract_strided_slice %53 {offsets = [0, 0], sizes = [1, 32], strides = [1, 1]} : vector<1x128xf32> to vector<1x32xf32>
    %56 = vector.extract_strided_slice %53 {offsets = [0, 32], sizes = [1, 32], strides = [1, 1]} : vector<1x128xf32> to vector<1x32xf32>
    %57 = vector.extract_strided_slice %54 {offsets = [0, 64], sizes = [1, 32], strides = [1, 1]} : vector<1x128xf32> to vector<1x32xf32>
    %58 = vector.extract_strided_slice %53 {offsets = [0, 96], sizes = [1, 32], strides = [1, 1]} : vector<1x128xf32> to vector<1x32xf32>
    %59 = arith.mulf %56, %45 : vector<1x32xf32>
    %60 = arith.mulf %55, %57 : vector<1x32xf32>
    %61 = arith.addf %59, %60 : vector<1x32xf32>
    %62 = math.tanh %61 : vector<1x32xf32>
    %63 = arith.mulf %58, %62 : vector<1x32xf32>
    %64 = tpu.concatenate %63, %45 in 1 : vector<1x32xf32>, vector<1x32xf32> -> vector<1x64xf32>
    %cst_45 = arith.constant dense<0.000000e+00> : vector<1x128xf32>
    %65 = tpu.matmul %64, %24, %cst_45 {dimension_numbers = #tpu.dot_dimension_numbers<[1], [0], [0], [1], [0, 0, 1, 1], [], []>} : vector<1x64xf32>, vector<64x128xf32>, vector<1x128xf32> -> vector<1x128xf32>
    %66 = arith.addf %65, %29 : vector<1x128xf32>
    %67 = arith.negf %66 : vector<1x128xf32>
    %68 = math.exp %67 : vector<1x128xf32>
    %cst_46 = arith.constant 1.000000e+00 : f32
    %69 = vector.broadcast %cst_46 : f32 to vector<1x128xf32>
    %70 = arith.addf %69, %68 : vector<1x128xf32>
    %71 = arith.divf %69, %70 : vector<1x128xf32>
    %72 = math.tanh %66 : vector<1x128xf32>
    %73 = vector.extract_strided_slice %71 {offsets = [0, 0], sizes = [1, 32], strides = [1, 1]} : vector<1x128xf32> to vector<1x32xf32>
    %74 = vector.extract_strided_slice %71 {offsets = [0, 32], sizes = [1, 32], strides = [1, 1]} : vector<1x128xf32> to vector<1x32xf32>
    %75 = vector.extract_strided_slice %72 {offsets = [0, 64], sizes = [1, 32], strides = [1, 1]} : vector<1x128xf32> to vector<1x32xf32>
    %76 = vector.extract_strided_slice %71 {offsets = [0, 96], sizes = [1, 32], strides = [1, 1]} : vector<1x128xf32> to vector<1x32xf32>
    %77 = arith.mulf %74, %45 : vector<1x32xf32>
    %78 = arith.mulf %73, %75 : vector<1x32xf32>
    %79 = arith.addf %77, %78 : vector<1x32xf32>
    %80 = math.tanh %79 : vector<1x32xf32>
    %81 = arith.mulf %76, %80 : vector<1x32xf32>
    %82 = tpu.concatenate %81, %45 in 1 : vector<1x32xf32>, vector<1x32xf32> -> vector<1x64xf32>
    %cst_47 = arith.constant dense<0.000000e+00> : vector<1x128xf32>
    %83 = tpu.matmul %82, %27, %cst_47 {dimension_numbers = #tpu.dot_dimension_numbers<[1], [0], [0], [1], [0, 0, 1, 1], [], []>} : vector<1x64xf32>, vector<64x128xf32>, vector<1x128xf32> -> vector<1x128xf32>
    %84 = arith.addf %83, %30 : vector<1x128xf32>
    %85 = arith.negf %84 : vector<1x128xf32>
    %86 = math.exp %85 : vector<1x128xf32>
    %cst_48 = arith.constant 1.000000e+00 : f32
    %87 = vector.broadcast %cst_48 : f32 to vector<1x128xf32>
    %88 = arith.addf %87, %86 : vector<1x128xf32>
    %89 = arith.divf %87, %88 : vector<1x128xf32>
    %90 = math.tanh %84 : vector<1x128xf32>
    %91 = vector.extract_strided_slice %89 {offsets = [0, 0], sizes = [1, 32], strides = [1, 1]} : vector<1x128xf32> to vector<1x32xf32>
    %92 = vector.extract_strided_slice %89 {offsets = [0, 32], sizes = [1, 32], strides = [1, 1]} : vector<1x128xf32> to vector<1x32xf32>
    %93 = vector.extract_strided_slice %90 {offsets = [0, 64], sizes = [1, 32], strides = [1, 1]} : vector<1x128xf32> to vector<1x32xf32>
    %94 = vector.extract_strided_slice %89 {offsets = [0, 96], sizes = [1, 32], strides = [1, 1]} : vector<1x128xf32> to vector<1x32xf32>
    %95 = arith.mulf %92, %45 : vector<1x32xf32>
    %96 = arith.mulf %91, %93 : vector<1x32xf32>
    %97 = arith.addf %95, %96 : vector<1x32xf32>
    %98 = math.tanh %97 : vector<1x32xf32>
    %99 = arith.mulf %94, %98 : vector<1x32xf32>
    %100 = vector.extract_strided_slice %6 {offsets = [1, 0], sizes = [1, 128], strides = [1, 1]} : vector<8x128xf32> to vector<1x128xf32>
    %cst_49 = arith.constant dense<0.000000e+00> : vector<1x128xf32>
    %101 = tpu.matmul %63, %21, %cst_49 {dimension_numbers = #tpu.dot_dimension_numbers<[1], [0], [0], [1], [0, 0, 1, 1], [], []>} : vector<1x32xf32>, vector<32x128xf32>, vector<1x128xf32> -> vector<1x128xf32>
    %102 = arith.addf %100, %101 : vector<1x128xf32>
    %103 = arith.negf %102 : vector<1x128xf32>
    %104 = math.exp %103 : vector<1x128xf32>
    %cst_50 = arith.constant 1.000000e+00 : f32
    %105 = vector.broadcast %cst_50 : f32 to vector<1x128xf32>
    %106 = arith.addf %105, %104 : vector<1x128xf32>
    %107 = arith.divf %105, %106 : vector<1x128xf32>
    %108 = math.tanh %102 : vector<1x128xf32>
    %109 = vector.extract_strided_slice %107 {offsets = [0, 0], sizes = [1, 32], strides = [1, 1]} : vector<1x128xf32> to vector<1x32xf32>
    %110 = vector.extract_strided_slice %107 {offsets = [0, 32], sizes = [1, 32], strides = [1, 1]} : vector<1x128xf32> to vector<1x32xf32>
    %111 = vector.extract_strided_slice %108 {offsets = [0, 64], sizes = [1, 32], strides = [1, 1]} : vector<1x128xf32> to vector<1x32xf32>
    %112 = vector.extract_strided_slice %107 {offsets = [0, 96], sizes = [1, 32], strides = [1, 1]} : vector<1x128xf32> to vector<1x32xf32>
    %113 = arith.mulf %110, %61 : vector<1x32xf32>
    %114 = arith.mulf %109, %111 : vector<1x32xf32>
    %115 = arith.addf %113, %114 : vector<1x32xf32>
    %116 = math.tanh %115 : vector<1x32xf32>
    %117 = arith.mulf %112, %116 : vector<1x32xf32>
    %118 = tpu.concatenate %117, %81 in 1 : vector<1x32xf32>, vector<1x32xf32> -> vector<1x64xf32>
    %cst_51 = arith.constant dense<0.000000e+00> : vector<1x128xf32>
    %119 = tpu.matmul %118, %24, %cst_51 {dimension_numbers = #tpu.dot_dimension_numbers<[1], [0], [0], [1], [0, 0, 1, 1], [], []>} : vector<1x64xf32>, vector<64x128xf32>, vector<1x128xf32> -> vector<1x128xf32>
    %120 = arith.addf %119, %29 : vector<1x128xf32>
    %121 = arith.negf %120 : vector<1x128xf32>
    %122 = math.exp %121 : vector<1x128xf32>
    %cst_52 = arith.constant 1.000000e+00 : f32
    %123 = vector.broadcast %cst_52 : f32 to vector<1x128xf32>
    %124 = arith.addf %123, %122 : vector<1x128xf32>
    %125 = arith.divf %123, %124 : vector<1x128xf32>
    %126 = math.tanh %120 : vector<1x128xf32>
    %127 = vector.extract_strided_slice %125 {offsets = [0, 0], sizes = [1, 32], strides = [1, 1]} : vector<1x128xf32> to vector<1x32xf32>
    %128 = vector.extract_strided_slice %125 {offsets = [0, 32], sizes = [1, 32], strides = [1, 1]} : vector<1x128xf32> to vector<1x32xf32>
    %129 = vector.extract_strided_slice %126 {offsets = [0, 64], sizes = [1, 32], strides = [1, 1]} : vector<1x128xf32> to vector<1x32xf32>
    %130 = vector.extract_strided_slice %125 {offsets = [0, 96], sizes = [1, 32], strides = [1, 1]} : vector<1x128xf32> to vector<1x32xf32>
    %131 = arith.mulf %128, %79 : vector<1x32xf32>
    %132 = arith.mulf %127, %129 : vector<1x32xf32>
    %133 = arith.addf %131, %132 : vector<1x32xf32>
    %134 = math.tanh %133 : vector<1x32xf32>
    %135 = arith.mulf %130, %134 : vector<1x32xf32>
    %136 = tpu.concatenate %135, %99 in 1 : vector<1x32xf32>, vector<1x32xf32> -> vector<1x64xf32>
    %cst_53 = arith.constant dense<0.000000e+00> : vector<1x128xf32>
    %137 = tpu.matmul %136, %27, %cst_53 {dimension_numbers = #tpu.dot_dimension_numbers<[1], [0], [0], [1], [0, 0, 1, 1], [], []>} : vector<1x64xf32>, vector<64x128xf32>, vector<1x128xf32> -> vector<1x128xf32>
    %138 = arith.addf %137, %30 : vector<1x128xf32>
    %139 = arith.negf %138 : vector<1x128xf32>
    %140 = math.exp %139 : vector<1x128xf32>
    %cst_54 = arith.constant 1.000000e+00 : f32
    %141 = vector.broadcast %cst_54 : f32 to vector<1x128xf32>
    %142 = arith.addf %141, %140 : vector<1x128xf32>
    %143 = arith.divf %141, %142 : vector<1x128xf32>
    %144 = math.tanh %138 : vector<1x128xf32>
    %145 = vector.extract_strided_slice %143 {offsets = [0, 0], sizes = [1, 32], strides = [1, 1]} : vector<1x128xf32> to vector<1x32xf32>
    %146 = vector.extract_strided_slice %143 {offsets = [0, 32], sizes = [1, 32], strides = [1, 1]} : vector<1x128xf32> to vector<1x32xf32>
    %147 = vector.extract_strided_slice %144 {offsets = [0, 64], sizes = [1, 32], strides = [1, 1]} : vector<1x128xf32> to vector<1x32xf32>
    %148 = vector.extract_strided_slice %143 {offsets = [0, 96], sizes = [1, 32], strides = [1, 1]} : vector<1x128xf32> to vector<1x32xf32>
    %149 = arith.mulf %146, %97 : vector<1x32xf32>
    %150 = arith.mulf %145, %147 : vector<1x32xf32>
    %151 = arith.addf %149, %150 : vector<1x32xf32>
    %152 = math.tanh %151 : vector<1x32xf32>
    %153 = arith.mulf %148, %152 : vector<1x32xf32>
    %154 = vector.extract_strided_slice %6 {offsets = [2, 0], sizes = [1, 128], strides = [1, 1]} : vector<8x128xf32> to vector<1x128xf32>
    %cst_55 = arith.constant dense<0.000000e+00> : vector<1x128xf32>
    %155 = tpu.matmul %117, %21, %cst_55 {dimension_numbers = #tpu.dot_dimension_numbers<[1], [0], [0], [1], [0, 0, 1, 1], [], []>} : vector<1x32xf32>, vector<32x128xf32>, vector<1x128xf32> -> vector<1x128xf32>
    %156 = arith.addf %154, %155 : vector<1x128xf32>
    %157 = arith.negf %156 : vector<1x128xf32>
    %158 = math.exp %157 : vector<1x128xf32>
    %cst_56 = arith.constant 1.000000e+00 : f32
    %159 = vector.broadcast %cst_56 : f32 to vector<1x128xf32>
    %160 = arith.addf %159, %158 : vector<1x128xf32>
    %161 = arith.divf %159, %160 : vector<1x128xf32>
    %162 = math.tanh %156 : vector<1x128xf32>
    %163 = vector.extract_strided_slice %161 {offsets = [0, 0], sizes = [1, 32], strides = [1, 1]} : vector<1x128xf32> to vector<1x32xf32>
    %164 = vector.extract_strided_slice %161 {offsets = [0, 32], sizes = [1, 32], strides = [1, 1]} : vector<1x128xf32> to vector<1x32xf32>
    %165 = vector.extract_strided_slice %162 {offsets = [0, 64], sizes = [1, 32], strides = [1, 1]} : vector<1x128xf32> to vector<1x32xf32>
    %166 = vector.extract_strided_slice %161 {offsets = [0, 96], sizes = [1, 32], strides = [1, 1]} : vector<1x128xf32> to vector<1x32xf32>
    %167 = arith.mulf %164, %115 : vector<1x32xf32>
    %168 = arith.mulf %163, %165 : vector<1x32xf32>
    %169 = arith.addf %167, %168 : vector<1x32xf32>
    %170 = math.tanh %169 : vector<1x32xf32>
    %171 = arith.mulf %166, %170 : vector<1x32xf32>
    %172 = tpu.concatenate %171, %135 in 1 : vector<1x32xf32>, vector<1x32xf32> -> vector<1x64xf32>
    %cst_57 = arith.constant dense<0.000000e+00> : vector<1x128xf32>
    %173 = tpu.matmul %172, %24, %cst_57 {dimension_numbers = #tpu.dot_dimension_numbers<[1], [0], [0], [1], [0, 0, 1, 1], [], []>} : vector<1x64xf32>, vector<64x128xf32>, vector<1x128xf32> -> vector<1x128xf32>
    %174 = arith.addf %173, %29 : vector<1x128xf32>
    %175 = arith.negf %174 : vector<1x128xf32>
    %176 = math.exp %175 : vector<1x128xf32>
    %cst_58 = arith.constant 1.000000e+00 : f32
    %177 = vector.broadcast %cst_58 : f32 to vector<1x128xf32>
    %178 = arith.addf %177, %176 : vector<1x128xf32>
    %179 = arith.divf %177, %178 : vector<1x128xf32>
    %180 = math.tanh %174 : vector<1x128xf32>
    %181 = vector.extract_strided_slice %179 {offsets = [0, 0], sizes = [1, 32], strides = [1, 1]} : vector<1x128xf32> to vector<1x32xf32>
    %182 = vector.extract_strided_slice %179 {offsets = [0, 32], sizes = [1, 32], strides = [1, 1]} : vector<1x128xf32> to vector<1x32xf32>
    %183 = vector.extract_strided_slice %180 {offsets = [0, 64], sizes = [1, 32], strides = [1, 1]} : vector<1x128xf32> to vector<1x32xf32>
    %184 = vector.extract_strided_slice %179 {offsets = [0, 96], sizes = [1, 32], strides = [1, 1]} : vector<1x128xf32> to vector<1x32xf32>
    %185 = arith.mulf %182, %133 : vector<1x32xf32>
    %186 = arith.mulf %181, %183 : vector<1x32xf32>
    %187 = arith.addf %185, %186 : vector<1x32xf32>
    %188 = math.tanh %187 : vector<1x32xf32>
    %189 = arith.mulf %184, %188 : vector<1x32xf32>
    %190 = tpu.concatenate %189, %153 in 1 : vector<1x32xf32>, vector<1x32xf32> -> vector<1x64xf32>
    %cst_59 = arith.constant dense<0.000000e+00> : vector<1x128xf32>
    %191 = tpu.matmul %190, %27, %cst_59 {dimension_numbers = #tpu.dot_dimension_numbers<[1], [0], [0], [1], [0, 0, 1, 1], [], []>} : vector<1x64xf32>, vector<64x128xf32>, vector<1x128xf32> -> vector<1x128xf32>
    %192 = arith.addf %191, %30 : vector<1x128xf32>
    %193 = arith.negf %192 : vector<1x128xf32>
    %194 = math.exp %193 : vector<1x128xf32>
    %cst_60 = arith.constant 1.000000e+00 : f32
    %195 = vector.broadcast %cst_60 : f32 to vector<1x128xf32>
    %196 = arith.addf %195, %194 : vector<1x128xf32>
    %197 = arith.divf %195, %196 : vector<1x128xf32>
    %198 = math.tanh %192 : vector<1x128xf32>
    %199 = vector.extract_strided_slice %197 {offsets = [0, 0], sizes = [1, 32], strides = [1, 1]} : vector<1x128xf32> to vector<1x32xf32>
    %200 = vector.extract_strided_slice %197 {offsets = [0, 32], sizes = [1, 32], strides = [1, 1]} : vector<1x128xf32> to vector<1x32xf32>
    %201 = vector.extract_strided_slice %198 {offsets = [0, 64], sizes = [1, 32], strides = [1, 1]} : vector<1x128xf32> to vector<1x32xf32>
    %202 = vector.extract_strided_slice %197 {offsets = [0, 96], sizes = [1, 32], strides = [1, 1]} : vector<1x128xf32> to vector<1x32xf32>
    %203 = arith.mulf %200, %151 : vector<1x32xf32>
    %204 = arith.mulf %199, %201 : vector<1x32xf32>
    %205 = arith.addf %203, %204 : vector<1x32xf32>
    %206 = math.tanh %205 : vector<1x32xf32>
    %207 = arith.mulf %202, %206 : vector<1x32xf32>
    %208 = vector.extract_strided_slice %6 {offsets = [3, 0], sizes = [1, 128], strides = [1, 1]} : vector<8x128xf32> to vector<1x128xf32>
    %cst_61 = arith.constant dense<0.000000e+00> : vector<1x128xf32>
    %209 = tpu.matmul %171, %21, %cst_61 {dimension_numbers = #tpu.dot_dimension_numbers<[1], [0], [0], [1], [0, 0, 1, 1], [], []>} : vector<1x32xf32>, vector<32x128xf32>, vector<1x128xf32> -> vector<1x128xf32>
    %210 = arith.addf %208, %209 : vector<1x128xf32>
    %211 = arith.negf %210 : vector<1x128xf32>
    %212 = math.exp %211 : vector<1x128xf32>
    %cst_62 = arith.constant 1.000000e+00 : f32
    %213 = vector.broadcast %cst_62 : f32 to vector<1x128xf32>
    %214 = arith.addf %213, %212 : vector<1x128xf32>
    %215 = arith.divf %213, %214 : vector<1x128xf32>
    %216 = math.tanh %210 : vector<1x128xf32>
    %217 = vector.extract_strided_slice %215 {offsets = [0, 0], sizes = [1, 32], strides = [1, 1]} : vector<1x128xf32> to vector<1x32xf32>
    %218 = vector.extract_strided_slice %215 {offsets = [0, 32], sizes = [1, 32], strides = [1, 1]} : vector<1x128xf32> to vector<1x32xf32>
    %219 = vector.extract_strided_slice %216 {offsets = [0, 64], sizes = [1, 32], strides = [1, 1]} : vector<1x128xf32> to vector<1x32xf32>
    %220 = vector.extract_strided_slice %215 {offsets = [0, 96], sizes = [1, 32], strides = [1, 1]} : vector<1x128xf32> to vector<1x32xf32>
    %221 = arith.mulf %218, %169 : vector<1x32xf32>
    %222 = arith.mulf %217, %219 : vector<1x32xf32>
    %223 = arith.addf %221, %222 : vector<1x32xf32>
    %224 = math.tanh %223 : vector<1x32xf32>
    %225 = arith.mulf %220, %224 : vector<1x32xf32>
    %226 = tpu.concatenate %225, %189 in 1 : vector<1x32xf32>, vector<1x32xf32> -> vector<1x64xf32>
    %cst_63 = arith.constant dense<0.000000e+00> : vector<1x128xf32>
    %227 = tpu.matmul %226, %24, %cst_63 {dimension_numbers = #tpu.dot_dimension_numbers<[1], [0], [0], [1], [0, 0, 1, 1], [], []>} : vector<1x64xf32>, vector<64x128xf32>, vector<1x128xf32> -> vector<1x128xf32>
    %228 = arith.addf %227, %29 : vector<1x128xf32>
    %229 = arith.negf %228 : vector<1x128xf32>
    %230 = math.exp %229 : vector<1x128xf32>
    %cst_64 = arith.constant 1.000000e+00 : f32
    %231 = vector.broadcast %cst_64 : f32 to vector<1x128xf32>
    %232 = arith.addf %231, %230 : vector<1x128xf32>
    %233 = arith.divf %231, %232 : vector<1x128xf32>
    %234 = math.tanh %228 : vector<1x128xf32>
    %235 = vector.extract_strided_slice %233 {offsets = [0, 0], sizes = [1, 32], strides = [1, 1]} : vector<1x128xf32> to vector<1x32xf32>
    %236 = vector.extract_strided_slice %233 {offsets = [0, 32], sizes = [1, 32], strides = [1, 1]} : vector<1x128xf32> to vector<1x32xf32>
    %237 = vector.extract_strided_slice %234 {offsets = [0, 64], sizes = [1, 32], strides = [1, 1]} : vector<1x128xf32> to vector<1x32xf32>
    %238 = vector.extract_strided_slice %233 {offsets = [0, 96], sizes = [1, 32], strides = [1, 1]} : vector<1x128xf32> to vector<1x32xf32>
    %239 = arith.mulf %236, %187 : vector<1x32xf32>
    %240 = arith.mulf %235, %237 : vector<1x32xf32>
    %241 = arith.addf %239, %240 : vector<1x32xf32>
    %242 = math.tanh %241 : vector<1x32xf32>
    %243 = arith.mulf %238, %242 : vector<1x32xf32>
    %244 = tpu.concatenate %243, %207 in 1 : vector<1x32xf32>, vector<1x32xf32> -> vector<1x64xf32>
    %cst_65 = arith.constant dense<0.000000e+00> : vector<1x128xf32>
    %245 = tpu.matmul %244, %27, %cst_65 {dimension_numbers = #tpu.dot_dimension_numbers<[1], [0], [0], [1], [0, 0, 1, 1], [], []>} : vector<1x64xf32>, vector<64x128xf32>, vector<1x128xf32> -> vector<1x128xf32>
    %246 = arith.addf %245, %30 : vector<1x128xf32>
    %247 = arith.negf %246 : vector<1x128xf32>
    %248 = math.exp %247 : vector<1x128xf32>
    %cst_66 = arith.constant 1.000000e+00 : f32
    %249 = vector.broadcast %cst_66 : f32 to vector<1x128xf32>
    %250 = arith.addf %249, %248 : vector<1x128xf32>
    %251 = arith.divf %249, %250 : vector<1x128xf32>
    %252 = math.tanh %246 : vector<1x128xf32>
    %253 = vector.extract_strided_slice %251 {offsets = [0, 0], sizes = [1, 32], strides = [1, 1]} : vector<1x128xf32> to vector<1x32xf32>
    %254 = vector.extract_strided_slice %251 {offsets = [0, 32], sizes = [1, 32], strides = [1, 1]} : vector<1x128xf32> to vector<1x32xf32>
    %255 = vector.extract_strided_slice %252 {offsets = [0, 64], sizes = [1, 32], strides = [1, 1]} : vector<1x128xf32> to vector<1x32xf32>
    %256 = vector.extract_strided_slice %251 {offsets = [0, 96], sizes = [1, 32], strides = [1, 1]} : vector<1x128xf32> to vector<1x32xf32>
    %257 = arith.mulf %254, %205 : vector<1x32xf32>
    %258 = arith.mulf %253, %255 : vector<1x32xf32>
    %259 = arith.addf %257, %258 : vector<1x32xf32>
    %260 = math.tanh %259 : vector<1x32xf32>
    %261 = arith.mulf %256, %260 : vector<1x32xf32>
    %262 = vector.extract_strided_slice %6 {offsets = [4, 0], sizes = [1, 128], strides = [1, 1]} : vector<8x128xf32> to vector<1x128xf32>
    %cst_67 = arith.constant dense<0.000000e+00> : vector<1x128xf32>
    %263 = tpu.matmul %225, %21, %cst_67 {dimension_numbers = #tpu.dot_dimension_numbers<[1], [0], [0], [1], [0, 0, 1, 1], [], []>} : vector<1x32xf32>, vector<32x128xf32>, vector<1x128xf32> -> vector<1x128xf32>
    %264 = arith.addf %262, %263 : vector<1x128xf32>
    %265 = arith.negf %264 : vector<1x128xf32>
    %266 = math.exp %265 : vector<1x128xf32>
    %cst_68 = arith.constant 1.000000e+00 : f32
    %267 = vector.broadcast %cst_68 : f32 to vector<1x128xf32>
    %268 = arith.addf %267, %266 : vector<1x128xf32>
    %269 = arith.divf %267, %268 : vector<1x128xf32>
    %270 = math.tanh %264 : vector<1x128xf32>
    %271 = vector.extract_strided_slice %269 {offsets = [0, 0], sizes = [1, 32], strides = [1, 1]} : vector<1x128xf32> to vector<1x32xf32>
    %272 = vector.extract_strided_slice %269 {offsets = [0, 32], sizes = [1, 32], strides = [1, 1]} : vector<1x128xf32> to vector<1x32xf32>
    %273 = vector.extract_strided_slice %270 {offsets = [0, 64], sizes = [1, 32], strides = [1, 1]} : vector<1x128xf32> to vector<1x32xf32>
    %274 = vector.extract_strided_slice %269 {offsets = [0, 96], sizes = [1, 32], strides = [1, 1]} : vector<1x128xf32> to vector<1x32xf32>
    %275 = arith.mulf %272, %223 : vector<1x32xf32>
    %276 = arith.mulf %271, %273 : vector<1x32xf32>
    %277 = arith.addf %275, %276 : vector<1x32xf32>
    %278 = math.tanh %277 : vector<1x32xf32>
    %279 = arith.mulf %274, %278 : vector<1x32xf32>
    %280 = tpu.concatenate %279, %243 in 1 : vector<1x32xf32>, vector<1x32xf32> -> vector<1x64xf32>
    %cst_69 = arith.constant dense<0.000000e+00> : vector<1x128xf32>
    %281 = tpu.matmul %280, %24, %cst_69 {dimension_numbers = #tpu.dot_dimension_numbers<[1], [0], [0], [1], [0, 0, 1, 1], [], []>} : vector<1x64xf32>, vector<64x128xf32>, vector<1x128xf32> -> vector<1x128xf32>
    %282 = arith.addf %281, %29 : vector<1x128xf32>
    %283 = arith.negf %282 : vector<1x128xf32>
    %284 = math.exp %283 : vector<1x128xf32>
    %cst_70 = arith.constant 1.000000e+00 : f32
    %285 = vector.broadcast %cst_70 : f32 to vector<1x128xf32>
    %286 = arith.addf %285, %284 : vector<1x128xf32>
    %287 = arith.divf %285, %286 : vector<1x128xf32>
    %288 = math.tanh %282 : vector<1x128xf32>
    %289 = vector.extract_strided_slice %287 {offsets = [0, 0], sizes = [1, 32], strides = [1, 1]} : vector<1x128xf32> to vector<1x32xf32>
    %290 = vector.extract_strided_slice %287 {offsets = [0, 32], sizes = [1, 32], strides = [1, 1]} : vector<1x128xf32> to vector<1x32xf32>
    %291 = vector.extract_strided_slice %288 {offsets = [0, 64], sizes = [1, 32], strides = [1, 1]} : vector<1x128xf32> to vector<1x32xf32>
    %292 = vector.extract_strided_slice %287 {offsets = [0, 96], sizes = [1, 32], strides = [1, 1]} : vector<1x128xf32> to vector<1x32xf32>
    %293 = arith.mulf %290, %241 : vector<1x32xf32>
    %294 = arith.mulf %289, %291 : vector<1x32xf32>
    %295 = arith.addf %293, %294 : vector<1x32xf32>
    %296 = math.tanh %295 : vector<1x32xf32>
    %297 = arith.mulf %292, %296 : vector<1x32xf32>
    %298 = tpu.concatenate %297, %261 in 1 : vector<1x32xf32>, vector<1x32xf32> -> vector<1x64xf32>
    %cst_71 = arith.constant dense<0.000000e+00> : vector<1x128xf32>
    %299 = tpu.matmul %298, %27, %cst_71 {dimension_numbers = #tpu.dot_dimension_numbers<[1], [0], [0], [1], [0, 0, 1, 1], [], []>} : vector<1x64xf32>, vector<64x128xf32>, vector<1x128xf32> -> vector<1x128xf32>
    %300 = arith.addf %299, %30 : vector<1x128xf32>
    %301 = arith.negf %300 : vector<1x128xf32>
    %302 = math.exp %301 : vector<1x128xf32>
    %cst_72 = arith.constant 1.000000e+00 : f32
    %303 = vector.broadcast %cst_72 : f32 to vector<1x128xf32>
    %304 = arith.addf %303, %302 : vector<1x128xf32>
    %305 = arith.divf %303, %304 : vector<1x128xf32>
    %306 = math.tanh %300 : vector<1x128xf32>
    %307 = vector.extract_strided_slice %305 {offsets = [0, 0], sizes = [1, 32], strides = [1, 1]} : vector<1x128xf32> to vector<1x32xf32>
    %308 = vector.extract_strided_slice %305 {offsets = [0, 32], sizes = [1, 32], strides = [1, 1]} : vector<1x128xf32> to vector<1x32xf32>
    %309 = vector.extract_strided_slice %306 {offsets = [0, 64], sizes = [1, 32], strides = [1, 1]} : vector<1x128xf32> to vector<1x32xf32>
    %310 = vector.extract_strided_slice %305 {offsets = [0, 96], sizes = [1, 32], strides = [1, 1]} : vector<1x128xf32> to vector<1x32xf32>
    %311 = arith.mulf %308, %259 : vector<1x32xf32>
    %312 = arith.mulf %307, %309 : vector<1x32xf32>
    %313 = arith.addf %311, %312 : vector<1x32xf32>
    %314 = math.tanh %313 : vector<1x32xf32>
    %315 = arith.mulf %310, %314 : vector<1x32xf32>
    %316 = vector.extract_strided_slice %6 {offsets = [5, 0], sizes = [1, 128], strides = [1, 1]} : vector<8x128xf32> to vector<1x128xf32>
    %cst_73 = arith.constant dense<0.000000e+00> : vector<1x128xf32>
    %317 = tpu.matmul %279, %21, %cst_73 {dimension_numbers = #tpu.dot_dimension_numbers<[1], [0], [0], [1], [0, 0, 1, 1], [], []>} : vector<1x32xf32>, vector<32x128xf32>, vector<1x128xf32> -> vector<1x128xf32>
    %318 = arith.addf %316, %317 : vector<1x128xf32>
    %319 = arith.negf %318 : vector<1x128xf32>
    %320 = math.exp %319 : vector<1x128xf32>
    %cst_74 = arith.constant 1.000000e+00 : f32
    %321 = vector.broadcast %cst_74 : f32 to vector<1x128xf32>
    %322 = arith.addf %321, %320 : vector<1x128xf32>
    %323 = arith.divf %321, %322 : vector<1x128xf32>
    %324 = math.tanh %318 : vector<1x128xf32>
    %325 = vector.extract_strided_slice %323 {offsets = [0, 0], sizes = [1, 32], strides = [1, 1]} : vector<1x128xf32> to vector<1x32xf32>
    %326 = vector.extract_strided_slice %323 {offsets = [0, 32], sizes = [1, 32], strides = [1, 1]} : vector<1x128xf32> to vector<1x32xf32>
    %327 = vector.extract_strided_slice %324 {offsets = [0, 64], sizes = [1, 32], strides = [1, 1]} : vector<1x128xf32> to vector<1x32xf32>
    %328 = vector.extract_strided_slice %323 {offsets = [0, 96], sizes = [1, 32], strides = [1, 1]} : vector<1x128xf32> to vector<1x32xf32>
    %329 = arith.mulf %326, %277 : vector<1x32xf32>
    %330 = arith.mulf %325, %327 : vector<1x32xf32>
    %331 = arith.addf %329, %330 : vector<1x32xf32>
    %332 = math.tanh %331 : vector<1x32xf32>
    %333 = arith.mulf %328, %332 : vector<1x32xf32>
    %334 = tpu.concatenate %333, %297 in 1 : vector<1x32xf32>, vector<1x32xf32> -> vector<1x64xf32>
    %cst_75 = arith.constant dense<0.000000e+00> : vector<1x128xf32>
    %335 = tpu.matmul %334, %24, %cst_75 {dimension_numbers = #tpu.dot_dimension_numbers<[1], [0], [0], [1], [0, 0, 1, 1], [], []>} : vector<1x64xf32>, vector<64x128xf32>, vector<1x128xf32> -> vector<1x128xf32>
    %336 = arith.addf %335, %29 : vector<1x128xf32>
    %337 = arith.negf %336 : vector<1x128xf32>
    %338 = math.exp %337 : vector<1x128xf32>
    %cst_76 = arith.constant 1.000000e+00 : f32
    %339 = vector.broadcast %cst_76 : f32 to vector<1x128xf32>
    %340 = arith.addf %339, %338 : vector<1x128xf32>
    %341 = arith.divf %339, %340 : vector<1x128xf32>
    %342 = math.tanh %336 : vector<1x128xf32>
    %343 = vector.extract_strided_slice %341 {offsets = [0, 0], sizes = [1, 32], strides = [1, 1]} : vector<1x128xf32> to vector<1x32xf32>
    %344 = vector.extract_strided_slice %341 {offsets = [0, 32], sizes = [1, 32], strides = [1, 1]} : vector<1x128xf32> to vector<1x32xf32>
    %345 = vector.extract_strided_slice %342 {offsets = [0, 64], sizes = [1, 32], strides = [1, 1]} : vector<1x128xf32> to vector<1x32xf32>
    %346 = vector.extract_strided_slice %341 {offsets = [0, 96], sizes = [1, 32], strides = [1, 1]} : vector<1x128xf32> to vector<1x32xf32>
    %347 = arith.mulf %344, %295 : vector<1x32xf32>
    %348 = arith.mulf %343, %345 : vector<1x32xf32>
    %349 = arith.addf %347, %348 : vector<1x32xf32>
    %350 = math.tanh %349 : vector<1x32xf32>
    %351 = arith.mulf %346, %350 : vector<1x32xf32>
    %352 = tpu.concatenate %351, %315 in 1 : vector<1x32xf32>, vector<1x32xf32> -> vector<1x64xf32>
    %cst_77 = arith.constant dense<0.000000e+00> : vector<1x128xf32>
    %353 = tpu.matmul %352, %27, %cst_77 {dimension_numbers = #tpu.dot_dimension_numbers<[1], [0], [0], [1], [0, 0, 1, 1], [], []>} : vector<1x64xf32>, vector<64x128xf32>, vector<1x128xf32> -> vector<1x128xf32>
    %354 = arith.addf %353, %30 : vector<1x128xf32>
    %355 = arith.negf %354 : vector<1x128xf32>
    %356 = math.exp %355 : vector<1x128xf32>
    %cst_78 = arith.constant 1.000000e+00 : f32
    %357 = vector.broadcast %cst_78 : f32 to vector<1x128xf32>
    %358 = arith.addf %357, %356 : vector<1x128xf32>
    %359 = arith.divf %357, %358 : vector<1x128xf32>
    %360 = math.tanh %354 : vector<1x128xf32>
    %361 = vector.extract_strided_slice %359 {offsets = [0, 0], sizes = [1, 32], strides = [1, 1]} : vector<1x128xf32> to vector<1x32xf32>
    %362 = vector.extract_strided_slice %359 {offsets = [0, 32], sizes = [1, 32], strides = [1, 1]} : vector<1x128xf32> to vector<1x32xf32>
    %363 = vector.extract_strided_slice %360 {offsets = [0, 64], sizes = [1, 32], strides = [1, 1]} : vector<1x128xf32> to vector<1x32xf32>
    %364 = vector.extract_strided_slice %359 {offsets = [0, 96], sizes = [1, 32], strides = [1, 1]} : vector<1x128xf32> to vector<1x32xf32>
    %365 = arith.mulf %362, %313 : vector<1x32xf32>
    %366 = arith.mulf %361, %363 : vector<1x32xf32>
    %367 = arith.addf %365, %366 : vector<1x32xf32>
    %368 = math.tanh %367 : vector<1x32xf32>
    %369 = arith.mulf %364, %368 : vector<1x32xf32>
    %370 = vector.extract_strided_slice %6 {offsets = [6, 0], sizes = [1, 128], strides = [1, 1]} : vector<8x128xf32> to vector<1x128xf32>
    %cst_79 = arith.constant dense<0.000000e+00> : vector<1x128xf32>
    %371 = tpu.matmul %333, %21, %cst_79 {dimension_numbers = #tpu.dot_dimension_numbers<[1], [0], [0], [1], [0, 0, 1, 1], [], []>} : vector<1x32xf32>, vector<32x128xf32>, vector<1x128xf32> -> vector<1x128xf32>
    %372 = arith.addf %370, %371 : vector<1x128xf32>
    %373 = arith.negf %372 : vector<1x128xf32>
    %374 = math.exp %373 : vector<1x128xf32>
    %cst_80 = arith.constant 1.000000e+00 : f32
    %375 = vector.broadcast %cst_80 : f32 to vector<1x128xf32>
    %376 = arith.addf %375, %374 : vector<1x128xf32>
    %377 = arith.divf %375, %376 : vector<1x128xf32>
    %378 = math.tanh %372 : vector<1x128xf32>
    %379 = vector.extract_strided_slice %377 {offsets = [0, 0], sizes = [1, 32], strides = [1, 1]} : vector<1x128xf32> to vector<1x32xf32>
    %380 = vector.extract_strided_slice %377 {offsets = [0, 32], sizes = [1, 32], strides = [1, 1]} : vector<1x128xf32> to vector<1x32xf32>
    %381 = vector.extract_strided_slice %378 {offsets = [0, 64], sizes = [1, 32], strides = [1, 1]} : vector<1x128xf32> to vector<1x32xf32>
    %382 = vector.extract_strided_slice %377 {offsets = [0, 96], sizes = [1, 32], strides = [1, 1]} : vector<1x128xf32> to vector<1x32xf32>
    %383 = arith.mulf %380, %331 : vector<1x32xf32>
    %384 = arith.mulf %379, %381 : vector<1x32xf32>
    %385 = arith.addf %383, %384 : vector<1x32xf32>
    %386 = math.tanh %385 : vector<1x32xf32>
    %387 = arith.mulf %382, %386 : vector<1x32xf32>
    %388 = tpu.concatenate %387, %351 in 1 : vector<1x32xf32>, vector<1x32xf32> -> vector<1x64xf32>
    %cst_81 = arith.constant dense<0.000000e+00> : vector<1x128xf32>
    %389 = tpu.matmul %388, %24, %cst_81 {dimension_numbers = #tpu.dot_dimension_numbers<[1], [0], [0], [1], [0, 0, 1, 1], [], []>} : vector<1x64xf32>, vector<64x128xf32>, vector<1x128xf32> -> vector<1x128xf32>
    %390 = arith.addf %389, %29 : vector<1x128xf32>
    %391 = arith.negf %390 : vector<1x128xf32>
    %392 = math.exp %391 : vector<1x128xf32>
    %cst_82 = arith.constant 1.000000e+00 : f32
    %393 = vector.broadcast %cst_82 : f32 to vector<1x128xf32>
    %394 = arith.addf %393, %392 : vector<1x128xf32>
    %395 = arith.divf %393, %394 : vector<1x128xf32>
    %396 = math.tanh %390 : vector<1x128xf32>
    %397 = vector.extract_strided_slice %395 {offsets = [0, 0], sizes = [1, 32], strides = [1, 1]} : vector<1x128xf32> to vector<1x32xf32>
    %398 = vector.extract_strided_slice %395 {offsets = [0, 32], sizes = [1, 32], strides = [1, 1]} : vector<1x128xf32> to vector<1x32xf32>
    %399 = vector.extract_strided_slice %396 {offsets = [0, 64], sizes = [1, 32], strides = [1, 1]} : vector<1x128xf32> to vector<1x32xf32>
    %400 = vector.extract_strided_slice %395 {offsets = [0, 96], sizes = [1, 32], strides = [1, 1]} : vector<1x128xf32> to vector<1x32xf32>
    %401 = arith.mulf %398, %349 : vector<1x32xf32>
    %402 = arith.mulf %397, %399 : vector<1x32xf32>
    %403 = arith.addf %401, %402 : vector<1x32xf32>
    %404 = math.tanh %403 : vector<1x32xf32>
    %405 = arith.mulf %400, %404 : vector<1x32xf32>
    %406 = tpu.concatenate %405, %369 in 1 : vector<1x32xf32>, vector<1x32xf32> -> vector<1x64xf32>
    %cst_83 = arith.constant dense<0.000000e+00> : vector<1x128xf32>
    %407 = tpu.matmul %406, %27, %cst_83 {dimension_numbers = #tpu.dot_dimension_numbers<[1], [0], [0], [1], [0, 0, 1, 1], [], []>} : vector<1x64xf32>, vector<64x128xf32>, vector<1x128xf32> -> vector<1x128xf32>
    %408 = arith.addf %407, %30 : vector<1x128xf32>
    %409 = arith.negf %408 : vector<1x128xf32>
    %410 = math.exp %409 : vector<1x128xf32>
    %cst_84 = arith.constant 1.000000e+00 : f32
    %411 = vector.broadcast %cst_84 : f32 to vector<1x128xf32>
    %412 = arith.addf %411, %410 : vector<1x128xf32>
    %413 = arith.divf %411, %412 : vector<1x128xf32>
    %414 = math.tanh %408 : vector<1x128xf32>
    %415 = vector.extract_strided_slice %413 {offsets = [0, 0], sizes = [1, 32], strides = [1, 1]} : vector<1x128xf32> to vector<1x32xf32>
    %416 = vector.extract_strided_slice %413 {offsets = [0, 32], sizes = [1, 32], strides = [1, 1]} : vector<1x128xf32> to vector<1x32xf32>
    %417 = vector.extract_strided_slice %414 {offsets = [0, 64], sizes = [1, 32], strides = [1, 1]} : vector<1x128xf32> to vector<1x32xf32>
    %418 = vector.extract_strided_slice %413 {offsets = [0, 96], sizes = [1, 32], strides = [1, 1]} : vector<1x128xf32> to vector<1x32xf32>
    %419 = arith.mulf %416, %367 : vector<1x32xf32>
    %420 = arith.mulf %415, %417 : vector<1x32xf32>
    %421 = arith.addf %419, %420 : vector<1x32xf32>
    %422 = math.tanh %421 : vector<1x32xf32>
    %423 = arith.mulf %418, %422 : vector<1x32xf32>
    %424 = vector.extract_strided_slice %6 {offsets = [7, 0], sizes = [1, 128], strides = [1, 1]} : vector<8x128xf32> to vector<1x128xf32>
    %cst_85 = arith.constant dense<0.000000e+00> : vector<1x128xf32>
    %425 = tpu.matmul %387, %21, %cst_85 {dimension_numbers = #tpu.dot_dimension_numbers<[1], [0], [0], [1], [0, 0, 1, 1], [], []>} : vector<1x32xf32>, vector<32x128xf32>, vector<1x128xf32> -> vector<1x128xf32>
    %426 = arith.addf %424, %425 : vector<1x128xf32>
    %427 = arith.negf %426 : vector<1x128xf32>
    %428 = math.exp %427 : vector<1x128xf32>
    %cst_86 = arith.constant 1.000000e+00 : f32
    %429 = vector.broadcast %cst_86 : f32 to vector<1x128xf32>
    %430 = arith.addf %429, %428 : vector<1x128xf32>
    %431 = arith.divf %429, %430 : vector<1x128xf32>
    %432 = math.tanh %426 : vector<1x128xf32>
    %433 = vector.extract_strided_slice %431 {offsets = [0, 0], sizes = [1, 32], strides = [1, 1]} : vector<1x128xf32> to vector<1x32xf32>
    %434 = vector.extract_strided_slice %431 {offsets = [0, 32], sizes = [1, 32], strides = [1, 1]} : vector<1x128xf32> to vector<1x32xf32>
    %435 = vector.extract_strided_slice %432 {offsets = [0, 64], sizes = [1, 32], strides = [1, 1]} : vector<1x128xf32> to vector<1x32xf32>
    %436 = vector.extract_strided_slice %431 {offsets = [0, 96], sizes = [1, 32], strides = [1, 1]} : vector<1x128xf32> to vector<1x32xf32>
    %437 = arith.mulf %434, %385 : vector<1x32xf32>
    %438 = arith.mulf %433, %435 : vector<1x32xf32>
    %439 = arith.addf %437, %438 : vector<1x32xf32>
    %440 = math.tanh %439 : vector<1x32xf32>
    %441 = arith.mulf %436, %440 : vector<1x32xf32>
    %442 = tpu.concatenate %441, %405 in 1 : vector<1x32xf32>, vector<1x32xf32> -> vector<1x64xf32>
    %cst_87 = arith.constant dense<0.000000e+00> : vector<1x128xf32>
    %443 = tpu.matmul %442, %24, %cst_87 {dimension_numbers = #tpu.dot_dimension_numbers<[1], [0], [0], [1], [0, 0, 1, 1], [], []>} : vector<1x64xf32>, vector<64x128xf32>, vector<1x128xf32> -> vector<1x128xf32>
    %444 = arith.addf %443, %29 : vector<1x128xf32>
    %445 = arith.negf %444 : vector<1x128xf32>
    %446 = math.exp %445 : vector<1x128xf32>
    %cst_88 = arith.constant 1.000000e+00 : f32
    %447 = vector.broadcast %cst_88 : f32 to vector<1x128xf32>
    %448 = arith.addf %447, %446 : vector<1x128xf32>
    %449 = arith.divf %447, %448 : vector<1x128xf32>
    %450 = math.tanh %444 : vector<1x128xf32>
    %451 = vector.extract_strided_slice %449 {offsets = [0, 0], sizes = [1, 32], strides = [1, 1]} : vector<1x128xf32> to vector<1x32xf32>
    %452 = vector.extract_strided_slice %449 {offsets = [0, 32], sizes = [1, 32], strides = [1, 1]} : vector<1x128xf32> to vector<1x32xf32>
    %453 = vector.extract_strided_slice %450 {offsets = [0, 64], sizes = [1, 32], strides = [1, 1]} : vector<1x128xf32> to vector<1x32xf32>
    %454 = vector.extract_strided_slice %449 {offsets = [0, 96], sizes = [1, 32], strides = [1, 1]} : vector<1x128xf32> to vector<1x32xf32>
    %455 = arith.mulf %452, %403 : vector<1x32xf32>
    %456 = arith.mulf %451, %453 : vector<1x32xf32>
    %457 = arith.addf %455, %456 : vector<1x32xf32>
    %458 = math.tanh %457 : vector<1x32xf32>
    %459 = arith.mulf %454, %458 : vector<1x32xf32>
    %460 = tpu.concatenate %459, %423 in 1 : vector<1x32xf32>, vector<1x32xf32> -> vector<1x64xf32>
    %cst_89 = arith.constant dense<0.000000e+00> : vector<1x128xf32>
    %461 = tpu.matmul %460, %27, %cst_89 {dimension_numbers = #tpu.dot_dimension_numbers<[1], [0], [0], [1], [0, 0, 1, 1], [], []>} : vector<1x64xf32>, vector<64x128xf32>, vector<1x128xf32> -> vector<1x128xf32>
    %462 = arith.addf %461, %30 : vector<1x128xf32>
    %463 = arith.negf %462 : vector<1x128xf32>
    %464 = math.exp %463 : vector<1x128xf32>
    %cst_90 = arith.constant 1.000000e+00 : f32
    %465 = vector.broadcast %cst_90 : f32 to vector<1x128xf32>
    %466 = arith.addf %465, %464 : vector<1x128xf32>
    %467 = arith.divf %465, %466 : vector<1x128xf32>
    %468 = math.tanh %462 : vector<1x128xf32>
    %469 = vector.extract_strided_slice %467 {offsets = [0, 0], sizes = [1, 32], strides = [1, 1]} : vector<1x128xf32> to vector<1x32xf32>
    %470 = vector.extract_strided_slice %467 {offsets = [0, 32], sizes = [1, 32], strides = [1, 1]} : vector<1x128xf32> to vector<1x32xf32>
    %471 = vector.extract_strided_slice %468 {offsets = [0, 64], sizes = [1, 32], strides = [1, 1]} : vector<1x128xf32> to vector<1x32xf32>
    %472 = vector.extract_strided_slice %467 {offsets = [0, 96], sizes = [1, 32], strides = [1, 1]} : vector<1x128xf32> to vector<1x32xf32>
    %473 = arith.mulf %470, %421 : vector<1x32xf32>
    %474 = arith.mulf %469, %471 : vector<1x32xf32>
    %475 = arith.addf %473, %474 : vector<1x32xf32>
    %476 = math.tanh %475 : vector<1x32xf32>
    %477 = arith.mulf %472, %476 : vector<1x32xf32>
    %cst_91 = arith.constant dense<0.000000e+00> : vector<1x128xf32>
    %478 = tpu.matmul %441, %33, %cst_91 {dimension_numbers = #tpu.dot_dimension_numbers<[1], [0], [0], [1], [0, 0, 1, 1], [], []>} : vector<1x32xf32>, vector<32x128xf32>, vector<1x128xf32> -> vector<1x128xf32>
    %479 = arith.addf %12, %478 : vector<1x128xf32>
    %480 = arith.negf %479 : vector<1x128xf32>
    %481 = math.exp %480 : vector<1x128xf32>
    %cst_92 = arith.constant 1.000000e+00 : f32
    %482 = vector.broadcast %cst_92 : f32 to vector<1x128xf32>
    %483 = arith.addf %482, %481 : vector<1x128xf32>
    %484 = arith.divf %482, %483 : vector<1x128xf32>
    %485 = math.tanh %479 : vector<1x128xf32>
    %486 = vector.extract_strided_slice %484 {offsets = [0, 0], sizes = [1, 32], strides = [1, 1]} : vector<1x128xf32> to vector<1x32xf32>
    %487 = vector.extract_strided_slice %484 {offsets = [0, 32], sizes = [1, 32], strides = [1, 1]} : vector<1x128xf32> to vector<1x32xf32>
    %488 = vector.extract_strided_slice %485 {offsets = [0, 64], sizes = [1, 32], strides = [1, 1]} : vector<1x128xf32> to vector<1x32xf32>
    %489 = vector.extract_strided_slice %484 {offsets = [0, 96], sizes = [1, 32], strides = [1, 1]} : vector<1x128xf32> to vector<1x32xf32>
    %490 = arith.mulf %487, %439 : vector<1x32xf32>
    %491 = arith.mulf %486, %488 : vector<1x32xf32>
    %492 = arith.addf %490, %491 : vector<1x32xf32>
    %493 = math.tanh %492 : vector<1x32xf32>
    %494 = arith.mulf %489, %493 : vector<1x32xf32>
    %495 = tpu.concatenate %494, %459 in 1 : vector<1x32xf32>, vector<1x32xf32> -> vector<1x64xf32>
    %cst_93 = arith.constant dense<0.000000e+00> : vector<1x128xf32>
    %496 = tpu.matmul %495, %36, %cst_93 {dimension_numbers = #tpu.dot_dimension_numbers<[1], [0], [0], [1], [0, 0, 1, 1], [], []>} : vector<1x64xf32>, vector<64x128xf32>, vector<1x128xf32> -> vector<1x128xf32>
    %497 = arith.addf %496, %41 : vector<1x128xf32>
    %498 = arith.negf %497 : vector<1x128xf32>
    %499 = math.exp %498 : vector<1x128xf32>
    %cst_94 = arith.constant 1.000000e+00 : f32
    %500 = vector.broadcast %cst_94 : f32 to vector<1x128xf32>
    %501 = arith.addf %500, %499 : vector<1x128xf32>
    %502 = arith.divf %500, %501 : vector<1x128xf32>
    %503 = math.tanh %497 : vector<1x128xf32>
    %504 = vector.extract_strided_slice %502 {offsets = [0, 0], sizes = [1, 32], strides = [1, 1]} : vector<1x128xf32> to vector<1x32xf32>
    %505 = vector.extract_strided_slice %502 {offsets = [0, 32], sizes = [1, 32], strides = [1, 1]} : vector<1x128xf32> to vector<1x32xf32>
    %506 = vector.extract_strided_slice %503 {offsets = [0, 64], sizes = [1, 32], strides = [1, 1]} : vector<1x128xf32> to vector<1x32xf32>
    %507 = vector.extract_strided_slice %502 {offsets = [0, 96], sizes = [1, 32], strides = [1, 1]} : vector<1x128xf32> to vector<1x32xf32>
    %508 = arith.mulf %505, %457 : vector<1x32xf32>
    %509 = arith.mulf %504, %506 : vector<1x32xf32>
    %510 = arith.addf %508, %509 : vector<1x32xf32>
    %511 = math.tanh %510 : vector<1x32xf32>
    %512 = arith.mulf %507, %511 : vector<1x32xf32>
    %513 = tpu.concatenate %512, %477 in 1 : vector<1x32xf32>, vector<1x32xf32> -> vector<1x64xf32>
    %cst_95 = arith.constant dense<0.000000e+00> : vector<1x128xf32>
    %514 = tpu.matmul %513, %39, %cst_95 {dimension_numbers = #tpu.dot_dimension_numbers<[1], [0], [0], [1], [0, 0, 1, 1], [], []>} : vector<1x64xf32>, vector<64x128xf32>, vector<1x128xf32> -> vector<1x128xf32>
    %515 = arith.addf %514, %42 : vector<1x128xf32>
    %516 = arith.negf %515 : vector<1x128xf32>
    %517 = math.exp %516 : vector<1x128xf32>
    %cst_96 = arith.constant 1.000000e+00 : f32
    %518 = vector.broadcast %cst_96 : f32 to vector<1x128xf32>
    %519 = arith.addf %518, %517 : vector<1x128xf32>
    %520 = arith.divf %518, %519 : vector<1x128xf32>
    %521 = math.tanh %515 : vector<1x128xf32>
    %522 = vector.extract_strided_slice %520 {offsets = [0, 0], sizes = [1, 32], strides = [1, 1]} : vector<1x128xf32> to vector<1x32xf32>
    %523 = vector.extract_strided_slice %520 {offsets = [0, 32], sizes = [1, 32], strides = [1, 1]} : vector<1x128xf32> to vector<1x32xf32>
    %524 = vector.extract_strided_slice %521 {offsets = [0, 64], sizes = [1, 32], strides = [1, 1]} : vector<1x128xf32> to vector<1x32xf32>
    %525 = vector.extract_strided_slice %520 {offsets = [0, 96], sizes = [1, 32], strides = [1, 1]} : vector<1x128xf32> to vector<1x32xf32>
    %526 = arith.mulf %523, %475 : vector<1x32xf32>
    %527 = arith.mulf %522, %524 : vector<1x32xf32>
    %528 = arith.addf %526, %527 : vector<1x32xf32>
    %529 = math.tanh %528 : vector<1x32xf32>
    %530 = arith.mulf %525, %529 : vector<1x32xf32>
    %cst_97 = arith.constant dense<0.000000e+00> : vector<1x24xf32>
    %531 = tpu.matmul %530, %43, %cst_97 {dimension_numbers = #tpu.dot_dimension_numbers<[1], [0], [0], [1], [0, 0, 1, 1], [], []>} : vector<1x32xf32>, vector<32x24xf32>, vector<1x24xf32> -> vector<1x24xf32>
    %532 = arith.addf %531, %44 : vector<1x24xf32>
    %c0_98 = arith.constant 0 : index
    %c0_99 = arith.constant 0 : index
    %533 = vector.load %arg16[%c0_98, %c0_99] : memref<4x24xf32, #tpu.memory_space<vmem>>, vector<1x24xf32>
    tpu.vector_store %arg16[%c0_98, %c0_99], %532 {strides = array<i32>} : memref<4x24xf32, #tpu.memory_space<vmem>>, vector<1x24xf32>,
    %534 = tpu.concatenate %494, %532 in 1 : vector<1x32xf32>, vector<1x24xf32> -> vector<1x56xf32>
    %cst_100 = arith.constant dense<0.000000e+00> : vector<1x128xf32>
    %535 = tpu.matmul %534, %32, %cst_100 {dimension_numbers = #tpu.dot_dimension_numbers<[1], [0], [0], [1], [0, 0, 1, 1], [], []>} : vector<1x56xf32>, vector<56x128xf32>, vector<1x128xf32> -> vector<1x128xf32>
    %536 = vector.extract_strided_slice %19 {offsets = [1, 0], sizes = [1, 128], strides = [1, 1]} : vector<4x128xf32> to vector<1x128xf32>
    %537 = arith.addf %535, %536 : vector<1x128xf32>
    %538 = arith.negf %537 : vector<1x128xf32>
    %539 = math.exp %538 : vector<1x128xf32>
    %cst_101 = arith.constant 1.000000e+00 : f32
    %540 = vector.broadcast %cst_101 : f32 to vector<1x128xf32>
    %541 = arith.addf %540, %539 : vector<1x128xf32>
    %542 = arith.divf %540, %541 : vector<1x128xf32>
    %543 = math.tanh %537 : vector<1x128xf32>
    %544 = vector.extract_strided_slice %542 {offsets = [0, 0], sizes = [1, 32], strides = [1, 1]} : vector<1x128xf32> to vector<1x32xf32>
    %545 = vector.extract_strided_slice %542 {offsets = [0, 32], sizes = [1, 32], strides = [1, 1]} : vector<1x128xf32> to vector<1x32xf32>
    %546 = vector.extract_strided_slice %543 {offsets = [0, 64], sizes = [1, 32], strides = [1, 1]} : vector<1x128xf32> to vector<1x32xf32>
    %547 = vector.extract_strided_slice %542 {offsets = [0, 96], sizes = [1, 32], strides = [1, 1]} : vector<1x128xf32> to vector<1x32xf32>
    %548 = arith.mulf %545, %492 : vector<1x32xf32>
    %549 = arith.mulf %544, %546 : vector<1x32xf32>
    %550 = arith.addf %548, %549 : vector<1x32xf32>
    %551 = math.tanh %550 : vector<1x32xf32>
    %552 = arith.mulf %547, %551 : vector<1x32xf32>
    %553 = tpu.concatenate %552, %512 in 1 : vector<1x32xf32>, vector<1x32xf32> -> vector<1x64xf32>
    %cst_102 = arith.constant dense<0.000000e+00> : vector<1x128xf32>
    %554 = tpu.matmul %553, %36, %cst_102 {dimension_numbers = #tpu.dot_dimension_numbers<[1], [0], [0], [1], [0, 0, 1, 1], [], []>} : vector<1x64xf32>, vector<64x128xf32>, vector<1x128xf32> -> vector<1x128xf32>
    %555 = arith.addf %554, %41 : vector<1x128xf32>
    %556 = arith.negf %555 : vector<1x128xf32>
    %557 = math.exp %556 : vector<1x128xf32>
    %cst_103 = arith.constant 1.000000e+00 : f32
    %558 = vector.broadcast %cst_103 : f32 to vector<1x128xf32>
    %559 = arith.addf %558, %557 : vector<1x128xf32>
    %560 = arith.divf %558, %559 : vector<1x128xf32>
    %561 = math.tanh %555 : vector<1x128xf32>
    %562 = vector.extract_strided_slice %560 {offsets = [0, 0], sizes = [1, 32], strides = [1, 1]} : vector<1x128xf32> to vector<1x32xf32>
    %563 = vector.extract_strided_slice %560 {offsets = [0, 32], sizes = [1, 32], strides = [1, 1]} : vector<1x128xf32> to vector<1x32xf32>
    %564 = vector.extract_strided_slice %561 {offsets = [0, 64], sizes = [1, 32], strides = [1, 1]} : vector<1x128xf32> to vector<1x32xf32>
    %565 = vector.extract_strided_slice %560 {offsets = [0, 96], sizes = [1, 32], strides = [1, 1]} : vector<1x128xf32> to vector<1x32xf32>
    %566 = arith.mulf %563, %510 : vector<1x32xf32>
    %567 = arith.mulf %562, %564 : vector<1x32xf32>
    %568 = arith.addf %566, %567 : vector<1x32xf32>
    %569 = math.tanh %568 : vector<1x32xf32>
    %570 = arith.mulf %565, %569 : vector<1x32xf32>
    %571 = tpu.concatenate %570, %530 in 1 : vector<1x32xf32>, vector<1x32xf32> -> vector<1x64xf32>
    %cst_104 = arith.constant dense<0.000000e+00> : vector<1x128xf32>
    %572 = tpu.matmul %571, %39, %cst_104 {dimension_numbers = #tpu.dot_dimension_numbers<[1], [0], [0], [1], [0, 0, 1, 1], [], []>} : vector<1x64xf32>, vector<64x128xf32>, vector<1x128xf32> -> vector<1x128xf32>
    %573 = arith.addf %572, %42 : vector<1x128xf32>
    %574 = arith.negf %573 : vector<1x128xf32>
    %575 = math.exp %574 : vector<1x128xf32>
    %cst_105 = arith.constant 1.000000e+00 : f32
    %576 = vector.broadcast %cst_105 : f32 to vector<1x128xf32>
    %577 = arith.addf %576, %575 : vector<1x128xf32>
    %578 = arith.divf %576, %577 : vector<1x128xf32>
    %579 = math.tanh %573 : vector<1x128xf32>
    %580 = vector.extract_strided_slice %578 {offsets = [0, 0], sizes = [1, 32], strides = [1, 1]} : vector<1x128xf32> to vector<1x32xf32>
    %581 = vector.extract_strided_slice %578 {offsets = [0, 32], sizes = [1, 32], strides = [1, 1]} : vector<1x128xf32> to vector<1x32xf32>
    %582 = vector.extract_strided_slice %579 {offsets = [0, 64], sizes = [1, 32], strides = [1, 1]} : vector<1x128xf32> to vector<1x32xf32>
    %583 = vector.extract_strided_slice %578 {offsets = [0, 96], sizes = [1, 32], strides = [1, 1]} : vector<1x128xf32> to vector<1x32xf32>
    %584 = arith.mulf %581, %528 : vector<1x32xf32>
    %585 = arith.mulf %580, %582 : vector<1x32xf32>
    %586 = arith.addf %584, %585 : vector<1x32xf32>
    %587 = math.tanh %586 : vector<1x32xf32>
    %588 = arith.mulf %583, %587 : vector<1x32xf32>
    %cst_106 = arith.constant dense<0.000000e+00> : vector<1x24xf32>
    %589 = tpu.matmul %588, %43, %cst_106 {dimension_numbers = #tpu.dot_dimension_numbers<[1], [0], [0], [1], [0, 0, 1, 1], [], []>} : vector<1x32xf32>, vector<32x24xf32>, vector<1x24xf32> -> vector<1x24xf32>
    %590 = arith.addf %589, %44 : vector<1x24xf32>
    %c1_107 = arith.constant 1 : index
    %c0_108 = arith.constant 0 : index
    %591 = vector.load %arg16[%c1_107, %c0_108] : memref<4x24xf32, #tpu.memory_space<vmem>>, vector<1x24xf32>
    tpu.vector_store %arg16[%c1_107, %c0_108], %590 {strides = array<i32>} : memref<4x24xf32, #tpu.memory_space<vmem>>, vector<1x24xf32>,
    %592 = tpu.concatenate %552, %590 in 1 : vector<1x32xf32>, vector<1x24xf32> -> vector<1x56xf32>
    %cst_109 = arith.constant dense<0.000000e+00> : vector<1x128xf32>
    %593 = tpu.matmul %592, %32, %cst_109 {dimension_numbers = #tpu.dot_dimension_numbers<[1], [0], [0], [1], [0, 0, 1, 1], [], []>} : vector<1x56xf32>, vector<56x128xf32>, vector<1x128xf32> -> vector<1x128xf32>
    %594 = vector.extract_strided_slice %19 {offsets = [2, 0], sizes = [1, 128], strides = [1, 1]} : vector<4x128xf32> to vector<1x128xf32>
    %595 = arith.addf %593, %594 : vector<1x128xf32>
    %596 = arith.negf %595 : vector<1x128xf32>
    %597 = math.exp %596 : vector<1x128xf32>
    %cst_110 = arith.constant 1.000000e+00 : f32
    %598 = vector.broadcast %cst_110 : f32 to vector<1x128xf32>
    %599 = arith.addf %598, %597 : vector<1x128xf32>
    %600 = arith.divf %598, %599 : vector<1x128xf32>
    %601 = math.tanh %595 : vector<1x128xf32>
    %602 = vector.extract_strided_slice %600 {offsets = [0, 0], sizes = [1, 32], strides = [1, 1]} : vector<1x128xf32> to vector<1x32xf32>
    %603 = vector.extract_strided_slice %600 {offsets = [0, 32], sizes = [1, 32], strides = [1, 1]} : vector<1x128xf32> to vector<1x32xf32>
    %604 = vector.extract_strided_slice %601 {offsets = [0, 64], sizes = [1, 32], strides = [1, 1]} : vector<1x128xf32> to vector<1x32xf32>
    %605 = vector.extract_strided_slice %600 {offsets = [0, 96], sizes = [1, 32], strides = [1, 1]} : vector<1x128xf32> to vector<1x32xf32>
    %606 = arith.mulf %603, %550 : vector<1x32xf32>
    %607 = arith.mulf %602, %604 : vector<1x32xf32>
    %608 = arith.addf %606, %607 : vector<1x32xf32>
    %609 = math.tanh %608 : vector<1x32xf32>
    %610 = arith.mulf %605, %609 : vector<1x32xf32>
    %611 = tpu.concatenate %610, %570 in 1 : vector<1x32xf32>, vector<1x32xf32> -> vector<1x64xf32>
    %cst_111 = arith.constant dense<0.000000e+00> : vector<1x128xf32>
    %612 = tpu.matmul %611, %36, %cst_111 {dimension_numbers = #tpu.dot_dimension_numbers<[1], [0], [0], [1], [0, 0, 1, 1], [], []>} : vector<1x64xf32>, vector<64x128xf32>, vector<1x128xf32> -> vector<1x128xf32>
    %613 = arith.addf %612, %41 : vector<1x128xf32>
    %614 = arith.negf %613 : vector<1x128xf32>
    %615 = math.exp %614 : vector<1x128xf32>
    %cst_112 = arith.constant 1.000000e+00 : f32
    %616 = vector.broadcast %cst_112 : f32 to vector<1x128xf32>
    %617 = arith.addf %616, %615 : vector<1x128xf32>
    %618 = arith.divf %616, %617 : vector<1x128xf32>
    %619 = math.tanh %613 : vector<1x128xf32>
    %620 = vector.extract_strided_slice %618 {offsets = [0, 0], sizes = [1, 32], strides = [1, 1]} : vector<1x128xf32> to vector<1x32xf32>
    %621 = vector.extract_strided_slice %618 {offsets = [0, 32], sizes = [1, 32], strides = [1, 1]} : vector<1x128xf32> to vector<1x32xf32>
    %622 = vector.extract_strided_slice %619 {offsets = [0, 64], sizes = [1, 32], strides = [1, 1]} : vector<1x128xf32> to vector<1x32xf32>
    %623 = vector.extract_strided_slice %618 {offsets = [0, 96], sizes = [1, 32], strides = [1, 1]} : vector<1x128xf32> to vector<1x32xf32>
    %624 = arith.mulf %621, %568 : vector<1x32xf32>
    %625 = arith.mulf %620, %622 : vector<1x32xf32>
    %626 = arith.addf %624, %625 : vector<1x32xf32>
    %627 = math.tanh %626 : vector<1x32xf32>
    %628 = arith.mulf %623, %627 : vector<1x32xf32>
    %629 = tpu.concatenate %628, %588 in 1 : vector<1x32xf32>, vector<1x32xf32> -> vector<1x64xf32>
    %cst_113 = arith.constant dense<0.000000e+00> : vector<1x128xf32>
    %630 = tpu.matmul %629, %39, %cst_113 {dimension_numbers = #tpu.dot_dimension_numbers<[1], [0], [0], [1], [0, 0, 1, 1], [], []>} : vector<1x64xf32>, vector<64x128xf32>, vector<1x128xf32> -> vector<1x128xf32>
    %631 = arith.addf %630, %42 : vector<1x128xf32>
    %632 = arith.negf %631 : vector<1x128xf32>
    %633 = math.exp %632 : vector<1x128xf32>
    %cst_114 = arith.constant 1.000000e+00 : f32
    %634 = vector.broadcast %cst_114 : f32 to vector<1x128xf32>
    %635 = arith.addf %634, %633 : vector<1x128xf32>
    %636 = arith.divf %634, %635 : vector<1x128xf32>
    %637 = math.tanh %631 : vector<1x128xf32>
    %638 = vector.extract_strided_slice %636 {offsets = [0, 0], sizes = [1, 32], strides = [1, 1]} : vector<1x128xf32> to vector<1x32xf32>
    %639 = vector.extract_strided_slice %636 {offsets = [0, 32], sizes = [1, 32], strides = [1, 1]} : vector<1x128xf32> to vector<1x32xf32>
    %640 = vector.extract_strided_slice %637 {offsets = [0, 64], sizes = [1, 32], strides = [1, 1]} : vector<1x128xf32> to vector<1x32xf32>
    %641 = vector.extract_strided_slice %636 {offsets = [0, 96], sizes = [1, 32], strides = [1, 1]} : vector<1x128xf32> to vector<1x32xf32>
    %642 = arith.mulf %639, %586 : vector<1x32xf32>
    %643 = arith.mulf %638, %640 : vector<1x32xf32>
    %644 = arith.addf %642, %643 : vector<1x32xf32>
    %645 = math.tanh %644 : vector<1x32xf32>
    %646 = arith.mulf %641, %645 : vector<1x32xf32>
    %cst_115 = arith.constant dense<0.000000e+00> : vector<1x24xf32>
    %647 = tpu.matmul %646, %43, %cst_115 {dimension_numbers = #tpu.dot_dimension_numbers<[1], [0], [0], [1], [0, 0, 1, 1], [], []>} : vector<1x32xf32>, vector<32x24xf32>, vector<1x24xf32> -> vector<1x24xf32>
    %648 = arith.addf %647, %44 : vector<1x24xf32>
    %c2 = arith.constant 2 : index
    %c0_116 = arith.constant 0 : index
    %649 = vector.load %arg16[%c2, %c0_116] : memref<4x24xf32, #tpu.memory_space<vmem>>, vector<1x24xf32>
    tpu.vector_store %arg16[%c2, %c0_116], %648 {strides = array<i32>} : memref<4x24xf32, #tpu.memory_space<vmem>>, vector<1x24xf32>,
    %650 = tpu.concatenate %610, %648 in 1 : vector<1x32xf32>, vector<1x24xf32> -> vector<1x56xf32>
    %cst_117 = arith.constant dense<0.000000e+00> : vector<1x128xf32>
    %651 = tpu.matmul %650, %32, %cst_117 {dimension_numbers = #tpu.dot_dimension_numbers<[1], [0], [0], [1], [0, 0, 1, 1], [], []>} : vector<1x56xf32>, vector<56x128xf32>, vector<1x128xf32> -> vector<1x128xf32>
    %652 = vector.extract_strided_slice %19 {offsets = [3, 0], sizes = [1, 128], strides = [1, 1]} : vector<4x128xf32> to vector<1x128xf32>
    %653 = arith.addf %651, %652 : vector<1x128xf32>
    %654 = arith.negf %653 : vector<1x128xf32>
    %655 = math.exp %654 : vector<1x128xf32>
    %cst_118 = arith.constant 1.000000e+00 : f32
    %656 = vector.broadcast %cst_118 : f32 to vector<1x128xf32>
    %657 = arith.addf %656, %655 : vector<1x128xf32>
    %658 = arith.divf %656, %657 : vector<1x128xf32>
    %659 = math.tanh %653 : vector<1x128xf32>
    %660 = vector.extract_strided_slice %658 {offsets = [0, 0], sizes = [1, 32], strides = [1, 1]} : vector<1x128xf32> to vector<1x32xf32>
    %661 = vector.extract_strided_slice %658 {offsets = [0, 32], sizes = [1, 32], strides = [1, 1]} : vector<1x128xf32> to vector<1x32xf32>
    %662 = vector.extract_strided_slice %659 {offsets = [0, 64], sizes = [1, 32], strides = [1, 1]} : vector<1x128xf32> to vector<1x32xf32>
    %663 = vector.extract_strided_slice %658 {offsets = [0, 96], sizes = [1, 32], strides = [1, 1]} : vector<1x128xf32> to vector<1x32xf32>
    %664 = arith.mulf %661, %608 : vector<1x32xf32>
    %665 = arith.mulf %660, %662 : vector<1x32xf32>
    %666 = arith.addf %664, %665 : vector<1x32xf32>
    %667 = math.tanh %666 : vector<1x32xf32>
    %668 = arith.mulf %663, %667 : vector<1x32xf32>
    %669 = tpu.concatenate %668, %628 in 1 : vector<1x32xf32>, vector<1x32xf32> -> vector<1x64xf32>
    %cst_119 = arith.constant dense<0.000000e+00> : vector<1x128xf32>
    %670 = tpu.matmul %669, %36, %cst_119 {dimension_numbers = #tpu.dot_dimension_numbers<[1], [0], [0], [1], [0, 0, 1, 1], [], []>} : vector<1x64xf32>, vector<64x128xf32>, vector<1x128xf32> -> vector<1x128xf32>
    %671 = arith.addf %670, %41 : vector<1x128xf32>
    %672 = arith.negf %671 : vector<1x128xf32>
    %673 = math.exp %672 : vector<1x128xf32>
    %cst_120 = arith.constant 1.000000e+00 : f32
    %674 = vector.broadcast %cst_120 : f32 to vector<1x128xf32>
    %675 = arith.addf %674, %673 : vector<1x128xf32>
    %676 = arith.divf %674, %675 : vector<1x128xf32>
    %677 = math.tanh %671 : vector<1x128xf32>
    %678 = vector.extract_strided_slice %676 {offsets = [0, 0], sizes = [1, 32], strides = [1, 1]} : vector<1x128xf32> to vector<1x32xf32>
    %679 = vector.extract_strided_slice %676 {offsets = [0, 32], sizes = [1, 32], strides = [1, 1]} : vector<1x128xf32> to vector<1x32xf32>
    %680 = vector.extract_strided_slice %677 {offsets = [0, 64], sizes = [1, 32], strides = [1, 1]} : vector<1x128xf32> to vector<1x32xf32>
    %681 = vector.extract_strided_slice %676 {offsets = [0, 96], sizes = [1, 32], strides = [1, 1]} : vector<1x128xf32> to vector<1x32xf32>
    %682 = arith.mulf %679, %626 : vector<1x32xf32>
    %683 = arith.mulf %678, %680 : vector<1x32xf32>
    %684 = arith.addf %682, %683 : vector<1x32xf32>
    %685 = math.tanh %684 : vector<1x32xf32>
    %686 = arith.mulf %681, %685 : vector<1x32xf32>
    %687 = tpu.concatenate %686, %646 in 1 : vector<1x32xf32>, vector<1x32xf32> -> vector<1x64xf32>
    %cst_121 = arith.constant dense<0.000000e+00> : vector<1x128xf32>
    %688 = tpu.matmul %687, %39, %cst_121 {dimension_numbers = #tpu.dot_dimension_numbers<[1], [0], [0], [1], [0, 0, 1, 1], [], []>} : vector<1x64xf32>, vector<64x128xf32>, vector<1x128xf32> -> vector<1x128xf32>
    %689 = arith.addf %688, %42 : vector<1x128xf32>
    %690 = arith.negf %689 : vector<1x128xf32>
    %691 = math.exp %690 : vector<1x128xf32>
    %cst_122 = arith.constant 1.000000e+00 : f32
    %692 = vector.broadcast %cst_122 : f32 to vector<1x128xf32>
    %693 = arith.addf %692, %691 : vector<1x128xf32>
    %694 = arith.divf %692, %693 : vector<1x128xf32>
    %695 = math.tanh %689 : vector<1x128xf32>
    %696 = vector.extract_strided_slice %694 {offsets = [0, 0], sizes = [1, 32], strides = [1, 1]} : vector<1x128xf32> to vector<1x32xf32>
    %697 = vector.extract_strided_slice %694 {offsets = [0, 32], sizes = [1, 32], strides = [1, 1]} : vector<1x128xf32> to vector<1x32xf32>
    %698 = vector.extract_strided_slice %695 {offsets = [0, 64], sizes = [1, 32], strides = [1, 1]} : vector<1x128xf32> to vector<1x32xf32>
    %699 = vector.extract_strided_slice %694 {offsets = [0, 96], sizes = [1, 32], strides = [1, 1]} : vector<1x128xf32> to vector<1x32xf32>
    %700 = arith.mulf %697, %644 : vector<1x32xf32>
    %701 = arith.mulf %696, %698 : vector<1x32xf32>
    %702 = arith.addf %700, %701 : vector<1x32xf32>
    %703 = math.tanh %702 : vector<1x32xf32>
    %704 = arith.mulf %699, %703 : vector<1x32xf32>
    %cst_123 = arith.constant dense<0.000000e+00> : vector<1x24xf32>
    %705 = tpu.matmul %704, %43, %cst_123 {dimension_numbers = #tpu.dot_dimension_numbers<[1], [0], [0], [1], [0, 0, 1, 1], [], []>} : vector<1x32xf32>, vector<32x24xf32>, vector<1x24xf32> -> vector<1x24xf32>
    %706 = arith.addf %705, %44 : vector<1x24xf32>
    %c3 = arith.constant 3 : index
    %c0_124 = arith.constant 0 : index
    %707 = vector.load %arg16[%c3, %c0_124] : memref<4x24xf32, #tpu.memory_space<vmem>>, vector<1x24xf32>
    tpu.vector_store %arg16[%c3, %c0_124], %706 {strides = array<i32>} : memref<4x24xf32, #tpu.memory_space<vmem>>, vector<1x24xf32>,
    return
  }
}

</mosaic_0001>

<bundles_post_ra>
// kernel: seq2seq_forward.1
= control target key start
LH: loop header
LB: loop body
LE: loop exit
PB: predicated region body
PF: predicated region fallthrough
CT: control target
= control target key end

     0   :  { %s8026_s0 = inlined_call_operand.vmem [shape: f32[8,128], index: 0, kind: input, shape index: {}]   ;;  %s8027_s1 = inlined_call_operand.vmem [shape: f32[1,128], index: 1, kind: input, shape index: {}]   ;;  %s8028_s2 = inlined_call_operand.vmem [shape: f32[4,128], index: 2, kind: input, shape index: {}]   ;;  %s8029_s3 = inlined_call_operand.vmem [shape: bf16[128,128], index: 3, kind: input, shape index: {}]   ;;  %s8030_s4 = inlined_call_operand.vmem [shape: bf16[32,128], index: 4, kind: input, shape index: {}]   ;;  %s8031_s5 = inlined_call_operand.vmem [shape: bf16[2,64,128], index: 5, kind: input, shape index: {}]   ;;  %s8032_s6 = inlined_call_operand.vmem [shape: f32[1,128], index: 6, kind: input, shape index: {}]   ;;  %s8033_s7 = inlined_call_operand.vmem [shape: f32[2,128], index: 7, kind: input, shape index: {}]   ;;  %s8034_s8 = inlined_call_operand.vmem [shape: bf16[128,128], index: 8, kind: input, shape index: {}]   ;;  %s8035_s9 = inlined_call_operand.vmem [shape: bf16[56,128], index: 9, kind: input, shape index: {}]   ;;  %s8036_s10 = inlined_call_operand.vmem [shape: bf16[128,128], index: 10, kind: input, shape index: {}]   ;;  %s8037_s11 = inlined_call_operand.vmem [shape: f32[1,128], index: 11, kind: input, shape index: {}]   ;;  %s8038_s12 = inlined_call_operand.vmem [shape: bf16[2,64,128], index: 12, kind: input, shape index: {}]   ;;  %s8039_s13 = inlined_call_operand.vmem [shape: f32[2,128], index: 13, kind: input, shape index: {}]   ;;  %s8040_s14 = inlined_call_operand.vmem [shape: f32[32,24], index: 14, kind: input, shape index: {}]   ;;  %s8041_s15 = inlined_call_operand.vmem [shape: f32[1,24], index: 15, kind: input, shape index: {}]   ;;  %s8042_s16 = inlined_call_operand.hbm [shape: f32[4,24], index: 16, kind: output, shape index: {}]  }
   0x1   :  { %8043 = sst [smem:[#allocation5_spill]] %s8026_s0 }
   0x2   :  { %v4714_v0 = vld [vmem:[%s8034_s8] sm:$0xff]   ;;  %v6807_v2 = vmov 0.0|0.0   ;;  %v4868_v3 = vld [vmem:[%s8034_s8 + $0x8] sm:$0xff]   ;;  %vm6808_vm0 = vmmov 0   ;;  %v6809_v5 = vmov 0.0   ;;  %v4869_v6 = vld [vmem:[%s8034_s8 + $0x10] sm:$0xff]  }
   0x3   :  { %v4682_v1 = vld [vmem:[%s8029_s3] sm:$0xff]   ;;  %6034 = vmatprep.subr.bf16.mxu1 %v6807_v2  ;;  %6010 = vmatprep.subr.bf16.mxu0 %v6807_v2  ;;  %v4861_v4 = vld [vmem:[%s8029_s3 + $0x8] sm:$0xff]   ;;  %v4862_v7 = vld [vmem:[%s8029_s3 + $0x10] sm:$0xff]  }
   0x4   :  { %6036 = vmatpush3.bf16.msra.mxu1 %v4714_v0  ;;  %6012 = vmatpush3.bf16.msra.mxu0 %v4682_v1 }
   0x5   :  { %6037 = vmatprep.subr.bf16.mxu1 %v6807_v2  ;;  %6013 = vmatprep.subr.bf16.mxu0 %v6807_v2 }
   0x6   :  { %5322 = vmatprep.mubr.msk.f32.mxu1 %vm6808_vm0, %v6809_v5  ;;  %5287 = vmatprep.mubr.msk.f32.mxu0 %vm6808_vm0, %v6809_v5 }
   0x8   :  { %6039 = vmatpush3.bf16.msra.mxu1 %v4868_v3  ;;  %6015 = vmatpush3.bf16.msra.mxu0 %v4861_v4 }
   0x9   :  { %6040 = vmatprep.subr.bf16.mxu1 %v6807_v2  ;;  %6016 = vmatprep.subr.bf16.mxu0 %v6807_v2 }
   0xa   :  { %21 = vsyncpa [#allocation3], 0  ;;  %v4870_v8 = vld [vmem:[%s8034_s8 + $0x18] sm:$0xff]   ;;  %v4871_v10 = vld [vmem:[%s8034_s8 + $0x20] sm:$0xff]   ;;  %s8044_s27 = sld [smem:[#allocation5_spill]]  ;;  %s6810_s0 = smov 64  }
   0xb   :  { %v4863_v9 = vld [vmem:[%s8029_s3 + $0x18] sm:$0xff]   ;;  %v4864_v11 = vld [vmem:[%s8029_s3 + $0x20] sm:$0xff]   ;;  %v4872_v12 = vld [vmem:[%s8034_s8 + $0x28] sm:$0xff]   ;;  %vm472_vm1 = vcmask 261120   ;;  %vm576_vm2 = vcmask 523264   ;;  %vm3401_vm3 = vcmask 188416  }
   0xc   :  { %6042 = vmatpush3.bf16.msra.mxu1 %v4869_v6  ;;  %6018 = vmatpush3.bf16.msra.mxu0 %v4862_v7  ;;  %v4865_v13 = vld [vmem:[%s8029_s3 + $0x28] sm:$0xff]   ;;  %v4873_v14 = vld [vmem:[%s8034_s8 + $0x30] sm:$0xff]   ;;  %v4874_v16 = vld [vmem:[%s8034_s8 + $0x38] sm:$0xff]   ;;  %vm3411_vm4 = vcmask 457728  }
   0xd   :  { %6043 = vmatprep.subr.bf16.mxu1 %v6807_v2  ;;  %6019 = vmatprep.subr.bf16.mxu0 %v6807_v2  ;;  %v4866_v15 = vld [vmem:[%s8029_s3 + $0x30] sm:$0xff]   ;;  %v4867_v17 = vld [vmem:[%s8029_s3 + $0x38] sm:$0xff]   ;;  %v164_v18 = vld [vmem:[%s8027_s1] sm:$0x1] }
   0xe   :  { %v6976_v20 = vld [vmem:[%s8030_s4] sm:$0xff]   ;;  %v6986_v21 = vld [vmem:[%s8030_s4 + $0x8] sm:$0xff]   ;;  %v4876_v43 = vld [vmem:[%s8036_s10 + $0x10] sm:$0xff]  }
   0xf   :  { %v4589_v24 = vld [vmem:[%s8032_s6] ss:$0 sm:$0xff]  ;;  %s6811_s6 = smov 32   ;;  %v4875_v40 = vld [vmem:[%s8036_s10 + $0x8] sm:$0xff]   ;;  %v7034_v44 = vld [vmem:[%s8031_s5 + $0x10] sm:$0xff]  }
  0x10   :  { %6045 = vmatpush3.bf16.msra.mxu1 %v4870_v8  ;;  %6021 = vmatpush3.bf16.msra.mxu0 %v4863_v9  ;;  %v54_v19 = vld [vmem:[%s8044_s27] sm:$0xff]  ;;  %v7023_v42 = vld [vmem:[%s8031_s5 + $0x8] sm:$0xff]   ;;  %v4877_v46 = vld [vmem:[%s8036_s10 + $0x18] sm:$0xff]  }
  0x11   :  { %6046 = vmatprep.subr.bf16.mxu1 %v6807_v2  ;;  %6022 = vmatprep.subr.bf16.mxu0 %v6807_v2  ;;  %v4746_v39 = vld [vmem:[%s8036_s10] sm:$0xff]   ;;  %v7046_v47 = vld [vmem:[%s8031_s5 + $0x18] sm:$0xff]   ;;  %v4879_v49 = vld [vmem:[%s8036_s10 + $0x28] sm:$0xff]  }
  0x12   :  { %v7016_v41 = vld [vmem:[%s8031_s5] sm:$0xff]   ;;  %v4880_v50 = vld [vmem:[%s8036_s10 + $0x30] sm:$0xff]   ;;  %v4881_v51 = vld [vmem:[%s8036_s10 + $0x38] sm:$0xff]  }
  0x13   :  { %v4878_v48 = vld [vmem:[%s8036_s10 + $0x20] sm:$0xff]  }
  0x14   :  { %6048 = vmatpush3.bf16.msra.mxu1 %v4871_v10  ;;  %6024 = vmatpush3.bf16.msra.mxu0 %v4864_v11  ;;  %v268_v52 = vld [vmem:[%s8028_s2] sm:$0xf] }
  0x15   :  { %6049 = vmatprep.subr.bf16.mxu1 %v6807_v2  ;;  %6025 = vmatprep.subr.bf16.mxu0 %v6807_v2  ;;  %v7097_v59 = vld [vmem:[%s8033_s7] sm:$0x3] }
  0x18   :  { %6051 = vmatpush3.bf16.msra.mxu1 %v4872_v12  ;;  %6027 = vmatpush3.bf16.msra.mxu0 %v4865_v13 }
  0x19   :  { %6052 = vmatprep.subr.bf16.mxu1 %v6807_v2  ;;  %6028 = vmatprep.subr.bf16.mxu0 %v6807_v2 }
  0x1c   :  { %6054 = vmatpush3.bf16.msra.mxu1 %v4873_v14  ;;  %6030 = vmatpush3.bf16.msra.mxu0 %v4866_v15 }
  0x1d   :  { %6055 = vmatprep.subr.bf16.mxu1 %v6807_v2  ;;  %6031 = vmatprep.subr.bf16.mxu0 %v6807_v2 }
  0x20   :  { %6057 = vmatpush3.bf16.msra.mxu1 %v4874_v16  ;;  %6033 = vmatpush3.bf16.msra.mxu0 %v4867_v17 }
  0x21   :  { %6082 = vmatprep.subr.bf16.mxu1 %v6807_v2  ;;  %6058 = vmatprep.subr.bf16.mxu0 %v6807_v2 }
  0x23   :  { %5323 = vmatmul.mubr.f32.vlgmr.msra.gmra.mrb[0].mxu1 %v164_v18  ;;  %5288 = vmatmul.mubr.f32.vlgmr.msra.gmra.mrb[0].mxu0 %v54_v19 }
  0x24   :  { %6084 = vmatpush3.bf16.msra.mxu1 %v6976_v20  ;;  %5368 = vmatprep.mubr.msk.f32.mxu1 %vm6808_vm0, %v6809_v5 }
  0x25   :  { %6085 = vmatprep.subr.bf16.mxu1 %v6807_v2  ;;  %5357 = vmatprep.mubr.msk.f32.mxu0 %vm6808_vm0, %v6809_v5 }
  0x26   :  { %6060 = vmatpush3.bf16.msra.mxu0 %v4746_v39 }
  0x27   :  { %6061 = vmatprep.subr.bf16.mxu0 %v6807_v2 }
  0x28   :  { %6087 = vmatpush3.bf16.msra.mxu1 %v6986_v21 }
  0x29   :  { %6088 = vmatprep.subr.bf16.mxu1 %v6807_v2 }
  0x2a   :  { %6063 = vmatpush3.bf16.msra.mxu0 %v4875_v40 }
  0x2b   :  { %5369 = vmatmul.mubr.f32.vlgmr.msra.gmra.mrb[2].mxu1 %v6809_v5  ;;  %6064 = vmatprep.subr.bf16.mxu0 %v6807_v2 }
  0x2c   :  { %5387 = vmatprep.mubr.msk.f32.mxu1 %vm6808_vm0, %v6809_v5  ;;  %6090 = vmatpush3.bf16.msra.mxu1 %v7016_v41 }
  0x2d   :  { %6091 = vmatprep.subr.bf16.mxu1 %v6807_v2 }
  0x2e   :  { %6066 = vmatpush3.bf16.msra.mxu0 %v4876_v43 }
  0x2f   :  { %6067 = vmatprep.subr.bf16.mxu0 %v6807_v2 }
  0x30   :  { %6093 = vmatpush3.bf16.msra.mxu1 %v7023_v42 }
  0x31   :  { %6094 = vmatprep.subr.bf16.mxu1 %v6807_v2 }
  0x32   :  { %6069 = vmatpush3.bf16.msra.mxu0 %v4877_v46 }
  0x33   :  { %6070 = vmatprep.subr.bf16.mxu0 %v6807_v2 }
  0x34   :  { %6096 = vmatpush3.bf16.msra.mxu1 %v7034_v44 }
  0x35   :  { %6097 = vmatprep.subr.bf16.mxu1 %v6807_v2 }
  0x36   :  { %6072 = vmatpush3.bf16.msra.mxu0 %v4878_v48 }
  0x37   :  { %6073 = vmatprep.subr.bf16.mxu0 %v6807_v2 }
  0x38   :  { %6099 = vmatpush3.bf16.msra.mxu1 %v7046_v47 }
  0x39   :  { %6100 = vmatprep.subr.bf16.mxu1 %v6807_v2 }
  0x3a   :  { %6075 = vmatpush3.bf16.msra.mxu0 %v4879_v49 }
  0x3b   :  { %6076 = vmatprep.subr.bf16.mxu0 %v6807_v2 }
  0x3e   :  { %6078 = vmatpush3.bf16.msra.mxu0 %v4880_v50 }
  0x3f   :  { %6079 = vmatprep.subr.bf16.mxu0 %v6807_v2 }
  0x42   :  { %6081 = vmatpush3.bf16.msra.mxu0 %v4881_v51 }
  0x43   :  { %6112 = vmatprep.subr.bf16.mxu0 %v6807_v2 }
  0x45   :  { %5358 = vmatmul.mubr.f32.vlgmr.msra.gmra.mrb[2].mxu0 %v268_v52  ;;  %v7178_v52 = vrot.slane %v7097_v59, 1 }
  0x46   :  { %6114 = vmatpush3.bf16.msra.mxu0 %v6976_v20  ;;  %5417 = vmatprep.mubr.msk.f32.mxu0 %vm6808_vm0, %v6809_v5 }
  0x47   :  { %6115 = vmatprep.subr.bf16.mxu0 %v6807_v2 }
  0x4a   :  { %6117 = vmatpush3.bf16.msra.mxu0 %v6986_v21 }
  0x4b   :  { %6118 = vmatprep.subr.bf16.mxu0 %v6807_v2 }
  0xf6   :  { %v160_v22 = vpop.f32.mrb[0].mxu0 }
  0xf7   :  { %v5289_v23 = vpop.f32.mrb[1].mxu0  ;;  %v6998_v25 = vadd.f32 %v4589_v24, %v160_v22 }
  0xfe   :  { %v542_v26 = vpop.f32.mrb[2].mxu1 }
  0xff   :  { %v546_v27 = vadd.f32 %v542_v26, %v6998_v25  ;;  %v5370_v28 = vpop.f32.mrb[3].mxu1 }
 0x101   :  { %6484 = vtanh.f32 %v546_v27  ;;  %v4606_v30 = vmul.f32 -1.442695, %v546_v27 }
 0x103   :  { %6486 = vpow2.f32 %v4606_v30  ;;  %v7122_v30 = vld [vmem:[%s8031_s5 + $0x28] sm:$0xff]  }
 0x10b   :  { %v6485_v29 = vpop.eup %6484 }
 0x10c   :  { %556 = vrot.lane.b32.xlu0 %v6485_v29, %s6810_s0  ;;  %v7115_v29 = vld [vmem:[%s8031_s5 + $0x20] sm:$0xff]  }
 0x10d   :  { %v6487_v31 = vpop.eup %6486 }
 0x10e   :  { %v550_v32 = vadd.f32 1.0, %v6487_v31 }
 0x110   :  { %6488 = vrcp.f32 %v550_v32 }
 0x118   :  { %v7079_v57 = vpop.f32.mrb[2].mxu0 }
 0x119   :  { %v5359_v58 = vpop.f32.mrb[3].mxu0 }
 0x11a   :  { %v6489_v33 = vpop.eup %6488 }
 0x11b   :  { %v554_v36 = vmul.f32 0.0, %v6489_v33 }
 0x17e   :  { %v557_v34 = vpop.permute.xlu0 %556 }
 0x17f   :  { %v559_v35 = vmul.f32 %v6489_v33, %v557_v34  ;;  %v7138_v34 = vld [vmem:[%s8031_s5 + $0x38] sm:$0xff]  }
 0x181   :  { %561 = vrot.lane.b32.xlu0 %v559_v35, %s6811_s6 }
 0x1f3   :  { %v562_v37 = vpop.permute.xlu0 %561 }
 0x1f4   :  { %v7003_v38 = vadd.f32 %v562_v37, %v554_v36 }
 0x1f6   :  { %6490 = vtanh.f32 %v7003_v38  ;;  %v863_v19 = vrot.slane %v7003_v38, 7 }
 0x200   :  { %v6491_v45 = vpop.eup %6490 }
 0x201   :  { %567 = vrot.lane.b32.xlu1 %v6491_v45, %s6810_s0 }
 0x273   :  { %v568_v53 = vpop.permute.xlu1 %567 }
 0x274   :  { %v570_v54 = vmul.f32 %v6489_v33, %v568_v53  ;;  %v7131_v33 = vld [vmem:[%s8031_s5 + $0x30] sm:$0xff]  }
 0x276   :  { %572 = vrot.lane.b32.xlu1 %v570_v54, %s6811_s6 }
 0x2e8   :  { %v573_v55 = vpop.permute.xlu1 %572 }
 0x2e9   :  { %v575_v56 = vsel %vm472_vm1, %v573_v55, 0.0  ;;  %5418 = vmatmul.mubr.msk.f32.vlgmr.msra.gmra.mrb[4].mxu0 %vm472_vm1, %v573_v55 }
 0x2ea   :  { %5388 = vmatmul.mubr.msk.f32.vlgmr.msra.gmra.mrb[4].mxu1 %vm576_vm2, %v575_v56  ;;  %6120 = vmatpush3.bf16.msra.mxu0 %v7016_v41 }
 0x2eb   :  { %6121 = vmatprep.subr.bf16.mxu0 %v6807_v2  ;;  %5436 = vmatprep.mubr.msk.f32.mxu0 %vm6808_vm0, %v6809_v5 }
 0x2ec   :  { %5406 = vmatprep.mubr.msk.f32.mxu1 %vm6808_vm0, %v6809_v5  ;;  %6102 = vmatpush3.bf16.msra.mxu1 %v7115_v29 }
 0x2ed   :  { %6103 = vmatprep.subr.bf16.mxu1 %v6807_v2 }
 0x2ee   :  { %6123 = vmatpush3.bf16.msra.mxu0 %v7023_v42 }
 0x2ef   :  { %6124 = vmatprep.subr.bf16.mxu0 %v6807_v2 }
 0x2f0   :  { %6105 = vmatpush3.bf16.msra.mxu1 %v7122_v30 }
 0x2f1   :  { %6106 = vmatprep.subr.bf16.mxu1 %v6807_v2 }
 0x2f2   :  { %6126 = vmatpush3.bf16.msra.mxu0 %v7034_v44 }
 0x2f3   :  { %6127 = vmatprep.subr.bf16.mxu0 %v6807_v2 }
 0x2f4   :  { %6108 = vmatpush3.bf16.msra.mxu1 %v7131_v33 }
 0x2f5   :  { %6109 = vmatprep.subr.bf16.mxu1 %v6807_v2 }
 0x2f6   :  { %6129 = vmatpush3.bf16.msra.mxu0 %v7046_v47 }
 0x2f7   :  { %6142 = vmatprep.subr.bf16.mxu0 %v6807_v2 }
 0x2f8   :  { %6111 = vmatpush3.bf16.msra.mxu1 %v7138_v34 }
 0x2f9   :  { %6130 = vmatprep.subr.bf16.mxu1 %v6807_v2 }
 0x3bc   :  { %v847_v60 = vpop.f32.mrb[4].mxu0 }
 0x3bd   :  { %v852_v61 = vrot.slane %v847_v60, 7  ;;  %v646_v62 = vpop.f32.mrb[4].mxu1  ;;  %v5419_v63 = vpop.f32.mrb[5].mxu0 }
 0x3be   :  { %v647_v0 = vadd.f32 %v646_v62, %v7097_v59  ;;  %v5389_v1 = vpop.f32.mrb[5].mxu1 }
 0x3bf   :  { %v854_v3 = vadd.f32 %v852_v61, %v6998_v25 }
 0x3c0   :  { %6492 = vtanh.f32 %v647_v0  ;;  %v4608_v7 = vmul.f32 -1.442695, %v647_v0 }
 0x3c1   :  { %6494 = vtanh.f32 %v854_v3  ;;  %v4612_v8 = vmul.f32 -1.442695, %v854_v3 }
 0x3c2   :  { %6496 = vpow2.f32 %v4608_v7 }
 0x3c3   :  { %6498 = vpow2.f32 %v4612_v8 }
 0x3ca   :  { %v6493_v4 = vpop.eup %6492 }
 0x3cb   :  { %v6495_v6 = vpop.eup %6494  ;;  %659 = vrot.lane.b32.xlu0 %v6493_v4, %s6810_s0 }
 0x3cc   :  { %867 = vrot.lane.b32.xlu1 %v6495_v6, %s6810_s0  ;;  %v6497_v9 = vpop.eup %6496 }
 0x3cd   :  { %v6499_v10 = vpop.eup %6498  ;;  %v653_v11 = vadd.f32 1.0, %v6497_v9 }
 0x3ce   :  { %v858_v12 = vadd.f32 1.0, %v6499_v10 }
 0x3cf   :  { %6500 = vrcp.f32 %v653_v11 }
 0x3d0   :  { %6502 = vrcp.f32 %v858_v12 }
 0x3d9   :  { %v6501_v13 = vpop.eup %6500 }
 0x3da   :  { %v6503_v15 = vpop.eup %6502  ;;  %v657_v22 = vmul.f32 0.0, %v6501_v13 }
 0x3db   :  { %v865_v24 = vmul.f32 %v6503_v15, %v863_v19 }
 0x43d   :  { %v660_v14 = vpop.permute.xlu0 %659 }
 0x43e   :  { %v662_v16 = vmul.f32 %v6501_v13, %v660_v14  ;;  %v868_v17 = vpop.permute.xlu1 %867 }
 0x43f   :  { %v870_v18 = vmul.f32 %v6503_v15, %v868_v17 }
 0x440   :  { %664 = vrot.lane.b32.xlu0 %v662_v16, %s6811_s6 }
 0x441   :  { %872 = vrot.lane.b32.xlu1 %v870_v18, %s6811_s6 }
 0x4b2   :  { %v665_v23 = vpop.permute.xlu0 %664 }
 0x4b3   :  { %v7106_v26 = vadd.f32 %v665_v23, %v657_v22  ;;  %v873_v27 = vpop.permute.xlu1 %872 }
 0x4b4   :  { %v7108_v28 = vadd.f32 %v873_v27, %v865_v24 }
 0x4b5   :  { %6504 = vtanh.f32 %v7106_v26 }
 0x4b6   :  { %6506 = vtanh.f32 %v7108_v28 }
 0x4bf   :  { %v6505_v31 = vpop.eup %6504 }
 0x4c0   :  { %v6507_v32 = vpop.eup %6506  ;;  %670 = vrot.lane.b32.xlu0 %v6505_v31, %s6810_s0 }
 0x4c1   :  { %878 = vrot.lane.b32.xlu1 %v6507_v32, %s6810_s0 }
 0x532   :  { %v671_v35 = vpop.permute.xlu0 %670 }
 0x533   :  { %v673_v36 = vmul.f32 %v6501_v13, %v671_v35  ;;  %v879_v37 = vpop.permute.xlu1 %878 }
 0x534   :  { %v881_v38 = vmul.f32 %v6503_v15, %v879_v37 }
 0x535   :  { %v886_v39 = vrot.slane %v673_v36, 7 }
 0x536   :  { %883 = vrot.lane.b32.xlu0 %v881_v38, %s6811_s6  ;;  %v1095_v40 = vrot.slane %v881_v38, 1 }
 0x537   :  { %887 = vrot.lane.b32.xlu1 %v886_v39, %s6810_s0  ;;  %v1182_v39 = vrot.slane %v7108_v28, 7 }
 0x53a   :  { %675 = vrot.lane.b32.xlu0 %v673_v36, %s6811_s6 }
 0x53b   :  { %1096 = vrot.lane.b32.xlu1 %v1095_v40, %s6811_s6 }
 0x5a8   :  { %v884_v43 = vpop.permute.xlu0 %883 }
 0x5a9   :  { %v888_v45 = vpop.permute.xlu1 %887 }
 0x5aa   :  { %v890_v46 = vsel %vm472_vm1, %v884_v43, %v888_v45 }
 0x5ab   :  { %v892_v48 = vrot.slane %v890_v46, 1 }
 0x5ac   :  { %v676_v49 = vpop.permute.xlu0 %675 }
 0x5ad   :  { %v678_v50 = vsel %vm472_vm1, %v676_v49, 0.0  ;;  %5437 = vmatmul.mubr.msk.f32.vlgmr.msra.gmra.mrb[6].mxu0 %vm576_vm2, %v892_v48  ;;  %v1097_v51 = vpop.permute.xlu1 %1096 }
 0x5ae   :  { %6144 = vmatpush3.bf16.msra.mxu0 %v6976_v20  ;;  %5407 = vmatmul.mubr.msk.f32.vlgmr.msra.gmra.mrb[6].mxu1 %vm576_vm2, %v678_v50 }
 0x5af   :  { %6145 = vmatprep.subr.bf16.mxu0 %v6807_v2  ;;  %5466 = vmatprep.mubr.msk.f32.mxu0 %vm6808_vm0, %v6809_v5 }
 0x5b0   :  { %6132 = vmatpush3.bf16.msra.mxu1 %v7115_v29  ;;  %5455 = vmatprep.mubr.msk.f32.mxu1 %vm6808_vm0, %v6809_v5 }
 0x5b1   :  { %6133 = vmatprep.subr.bf16.mxu1 %v6807_v2 }
 0x5b2   :  { %6147 = vmatpush3.bf16.msra.mxu0 %v6986_v21 }
 0x5b3   :  { %6160 = vmatprep.subr.bf16.mxu0 %v6807_v2 }
 0x5b4   :  { %6135 = vmatpush3.bf16.msra.mxu1 %v7122_v30 }
 0x5b5   :  { %5467 = vmatmul.mubr.msk.f32.vlgmr.msra.gmra.mrb[8].mxu0 %vm472_vm1, %v1097_v51  ;;  %6136 = vmatprep.subr.bf16.mxu1 %v6807_v2 }
 0x5b6   :  { %6162 = vmatpush3.bf16.msra.mxu0 %v7115_v29  ;;  %5504 = vmatprep.mubr.msk.f32.mxu0 %vm6808_vm0, %v6809_v5 }
 0x5b7   :  { %6163 = vmatprep.subr.bf16.mxu0 %v6807_v2 }
 0x5b8   :  { %6138 = vmatpush3.bf16.msra.mxu1 %v7131_v33 }
 0x5b9   :  { %6139 = vmatprep.subr.bf16.mxu1 %v6807_v2 }
 0x5ba   :  { %6165 = vmatpush3.bf16.msra.mxu0 %v7122_v30 }
 0x5bb   :  { %6166 = vmatprep.subr.bf16.mxu0 %v6807_v2 }
 0x5bc   :  { %6141 = vmatpush3.bf16.msra.mxu1 %v7138_v34 }
 0x5bd   :  { %6148 = vmatprep.subr.bf16.mxu1 %v6807_v2 }
 0x5be   :  { %6168 = vmatpush3.bf16.msra.mxu0 %v7131_v33 }
 0x5bf   :  { %6169 = vmatprep.subr.bf16.mxu0 %v6807_v2 }
 0x5c2   :  { %6171 = vmatpush3.bf16.msra.mxu0 %v7138_v34 }
 0x5c3   :  { %6178 = vmatprep.subr.bf16.mxu0 %v6807_v2 }
 0x680   :  { %v961_v53 = vpop.f32.mrb[6].mxu0 }
 0x681   :  { %v962_v54 = vadd.f32 %v961_v53, %v7097_v59  ;;  %v751_v55 = vpop.f32.mrb[6].mxu1  ;;  %v5438_v56 = vpop.f32.mrb[7].mxu0 }
 0x682   :  { %v752_v58 = vadd.f32 %v751_v55, %v7178_v52  ;;  %v5408_v60 = vpop.f32.mrb[7].mxu1 }
 0x683   :  { %6508 = vtanh.f32 %v962_v54  ;;  %v4614_v6 = vmul.f32 -1.442695, %v962_v54 }
 0x684   :  { %6510 = vtanh.f32 %v752_v58  ;;  %v4610_v7 = vmul.f32 -1.442695, %v752_v58 }
 0x688   :  { %v1166_v61 = vpop.f32.mrb[8].mxu0 }
 0x689   :  { %v1171_v62 = vrot.slane %v1166_v61, 6  ;;  %v5468_v63 = vpop.f32.mrb[9].mxu0 }
 0x68b   :  { %v1173_v0 = vadd.f32 %v1171_v62, %v6998_v25 }
 0x68d   :  { %v6509_v1 = vpop.eup %6508  ;;  %6512 = vtanh.f32 %v1173_v0  ;;  %v4618_v8 = vmul.f32 -1.442695, %v1173_v0 }
 0x68e   :  { %v6511_v3 = vpop.eup %6510  ;;  %974 = vrot.lane.b32.xlu1 %v6509_v1, %s6810_s0  ;;  %6514 = vpow2.f32 %v4614_v6 }
 0x68f   :  { %764 = vrot.lane.b32.xlu0 %v6511_v3, %s6810_s0  ;;  %6516 = vpow2.f32 %v4610_v7 }
 0x690   :  { %6518 = vpow2.f32 %v4618_v8 }
 0x697   :  { %v6513_v4 = vpop.eup %6512 }
 0x698   :  { %1186 = vrot.lane.b32.xlu0 %v6513_v4, %s6810_s0  ;;  %v6515_v9 = vpop.eup %6514 }
 0x699   :  { %v6517_v10 = vpop.eup %6516  ;;  %v968_v11 = vadd.f32 1.0, %v6515_v9 }
 0x69a   :  { %v758_v12 = vadd.f32 1.0, %v6517_v10  ;;  %v6519_v13 = vpop.eup %6518 }
 0x69b   :  { %6520 = vrcp.f32 %v968_v11  ;;  %v1177_v14 = vadd.f32 1.0, %v6519_v13 }
 0x69c   :  { %6522 = vrcp.f32 %v758_v12 }
 0x69d   :  { %6524 = vrcp.f32 %v1177_v14 }
 0x6a5   :  { %v6521_v15 = vpop.eup %6520 }
 0x6a6   :  { %v6523_v17 = vpop.eup %6522  ;;  %v972_v31 = vmul.f32 %v6521_v15, %v7106_v26 }
 0x6a7   :  { %v6525_v23 = vpop.eup %6524  ;;  %v762_v35 = vmul.f32 0.0, %v6523_v17 }
 0x6a8   :  { %v1184_v40 = vmul.f32 %v6525_v23, %v1182_v39 }
 0x700   :  { %v975_v16 = vpop.permute.xlu1 %974 }
 0x701   :  { %v977_v18 = vmul.f32 %v6521_v15, %v975_v16  ;;  %v765_v19 = vpop.permute.xlu0 %764 }
 0x702   :  { %v767_v22 = vmul.f32 %v6523_v17, %v765_v19 }
 0x703   :  { %979 = vrot.lane.b32.xlu0 %v977_v18, %s6811_s6 }
 0x704   :  { %769 = vrot.lane.b32.xlu1 %v767_v22, %s6811_s6 }
 0x70a   :  { %v1187_v24 = vpop.permute.xlu0 %1186 }
 0x70b   :  { %v1189_v27 = vmul.f32 %v6525_v23, %v1187_v24 }
 0x70d   :  { %1191 = vrot.lane.b32.xlu1 %v1189_v27, %s6811_s6 }
 0x775   :  { %v980_v32 = vpop.permute.xlu0 %979 }
 0x776   :  { %v7190_v36 = vadd.f32 %v980_v32, %v972_v31  ;;  %v770_v37 = vpop.permute.xlu1 %769 }
 0x777   :  { %v7192_v38 = vadd.f32 %v770_v37, %v762_v35 }
 0x778   :  { %6526 = vtanh.f32 %v7190_v36 }
 0x779   :  { %6528 = vtanh.f32 %v7192_v38 }
 0x77f   :  { %v1192_v43 = vpop.permute.xlu1 %1191 }
 0x780   :  { %v7197_v45 = vadd.f32 %v1192_v43, %v1184_v40 }
 0x782   :  { %v6527_v46 = vpop.eup %6526  ;;  %6530 = vtanh.f32 %v7197_v45 }
 0x783   :  { %v6529_v26 = vpop.eup %6528  ;;  %985 = vrot.lane.b32.xlu1 %v6527_v46, %s6810_s0 }
 0x784   :  { %775 = vrot.lane.b32.xlu0 %v6529_v26, %s6810_s0 }
 0x78c   :  { %v6531_v48 = vpop.eup %6530 }
 0x78d   :  { %1197 = vrot.lane.b32.xlu0 %v6531_v48, %s6810_s0 }
 0x7f5   :  { %v986_v49 = vpop.permute.xlu1 %985 }
 0x7f6   :  { %v988_v50 = vmul.f32 %v6521_v15, %v986_v49  ;;  %v776_v51 = vpop.permute.xlu0 %775 }
 0x7f7   :  { %v778_v53 = vmul.f32 %v6523_v17, %v776_v51 }
 0x7f8   :  { %990 = vrot.lane.b32.xlu1 %v988_v50, %s6811_s6  ;;  %v1205_v28 = vrot.slane %v988_v50, 6 }
 0x7f9   :  { %994 = vrot.lane.b32.xlu0 %v778_v53, %s6810_s0 }
 0x7fd   :  { %1206 = vrot.lane.b32.xlu0 %v1205_v28, %s6810_s0 }
 0x7ff   :  { %v1198_v54 = vpop.permute.xlu0 %1197 }
 0x800   :  { %v1200_v55 = vmul.f32 %v6525_v23, %v1198_v54 }
 0x802   :  { %1202 = vrot.lane.b32.xlu1 %v1200_v55, %s6811_s6  ;;  %v1414_v56 = vrot.slane %v1200_v55, 2 }
 0x806   :  { %1415 = vrot.lane.b32.xlu1 %v1414_v56, %s6811_s6 }
 0x86a   :  { %v991_v58 = vpop.permute.xlu1 %990 }
 0x86b   :  { %v995_v60 = vpop.permute.xlu0 %994 }
 0x86c   :  { %v997_v61 = vsel %vm472_vm1, %v991_v58, %v995_v60  ;;  %v1501_v60 = vrot.slane %v7197_v45, 7 }
 0x86d   :  { %5456 = vmatmul.mubr.msk.f32.vlgmr.msra.gmra.mrb[8].mxu1 %vm576_vm2, %v997_v61 }
 0x86e   :  { %6150 = vmatpush3.bf16.msra.mxu1 %v7016_v41  ;;  %5485 = vmatprep.mubr.msk.f32.mxu1 %vm6808_vm0, %v6809_v5 }
 0x86f   :  { %6151 = vmatprep.subr.bf16.mxu1 %v6807_v2  ;;  %v1207_v63 = vpop.permute.xlu0 %1206 }
 0x872   :  { %6153 = vmatpush3.bf16.msra.mxu1 %v7023_v42 }
 0x873   :  { %6154 = vmatprep.subr.bf16.mxu1 %v6807_v2 }
 0x874   :  { %v1203_v62 = vpop.permute.xlu1 %1202 }
 0x875   :  { %v1209_v0 = vsel %vm472_vm1, %v1203_v62, %v1207_v63 }
 0x876   :  { %6156 = vmatpush3.bf16.msra.mxu1 %v7034_v44  ;;  %v1211_v1 = vrot.slane %v1209_v0, 2 }
 0x877   :  { %6157 = vmatprep.subr.bf16.mxu1 %v6807_v2 }
 0x878   :  { %v1416_v3 = vpop.permute.xlu1 %1415 }
 0x87a   :  { %6159 = vmatpush3.bf16.msra.mxu1 %v7046_v47 }
 0x87b   :  { %6172 = vmatprep.subr.bf16.mxu1 %v6807_v2 }
 0x87d   :  { %5486 = vmatmul.mubr.msk.f32.vlgmr.msra.gmra.mrb[10].mxu1 %vm576_vm2, %v1211_v1 }
 0x87e   :  { %6174 = vmatpush3.bf16.msra.mxu1 %v6976_v20  ;;  %5515 = vmatprep.mubr.msk.f32.mxu1 %vm6808_vm0, %v6809_v5 }
 0x87f   :  { %6175 = vmatprep.subr.bf16.mxu1 %v6807_v2 }
 0x882   :  { %6177 = vmatpush3.bf16.msra.mxu1 %v6986_v21 }
 0x883   :  { %6190 = vmatprep.subr.bf16.mxu1 %v6807_v2 }
 0x885   :  { %5516 = vmatmul.mubr.msk.f32.vlgmr.msra.gmra.mrb[12].mxu1 %vm472_vm1, %v1416_v3 }
 0x886   :  { %6192 = vmatpush3.bf16.msra.mxu1 %v7115_v29  ;;  %5553 = vmatprep.mubr.msk.f32.mxu1 %vm6808_vm0, %v6809_v5 }
 0x887   :  { %6193 = vmatprep.subr.bf16.mxu1 %v6807_v2 }
 0x88a   :  { %6195 = vmatpush3.bf16.msra.mxu1 %v7122_v30 }
 0x88b   :  { %6196 = vmatprep.subr.bf16.mxu1 %v6807_v2 }
 0x88e   :  { %6198 = vmatpush3.bf16.msra.mxu1 %v7131_v33 }
 0x88f   :  { %6199 = vmatprep.subr.bf16.mxu1 %v6807_v2 }
 0x892   :  { %6201 = vmatpush3.bf16.msra.mxu1 %v7138_v34 }
 0x893   :  { %6208 = vmatprep.subr.bf16.mxu1 %v6807_v2 }
 0x940   :  { %v1067_v4 = vpop.f32.mrb[8].mxu1 }
 0x941   :  { %v1068_v6 = vadd.f32 %v1067_v4, %v7178_v52  ;;  %v5457_v7 = vpop.f32.mrb[9].mxu1 }
 0x943   :  { %6532 = vtanh.f32 %v1068_v6  ;;  %v4616_v18 = vmul.f32 -1.442695, %v1068_v6 }
 0x94d   :  { %v6533_v8 = vpop.eup %6532 }
 0x94e   :  { %1080 = vrot.lane.b32.xlu0 %v6533_v8, %s6810_s0 }
 0x950   :  { %v1280_v9 = vpop.f32.mrb[10].mxu1 }
 0x951   :  { %v1281_v10 = vadd.f32 %v1280_v9, %v7097_v59  ;;  %v5487_v11 = vpop.f32.mrb[11].mxu1 }
 0x953   :  { %6534 = vtanh.f32 %v1281_v10  ;;  %v4620_v22 = vmul.f32 -1.442695, %v1281_v10 }
 0x958   :  { %v1485_v12 = vpop.f32.mrb[12].mxu1 }
 0x959   :  { %v1490_v13 = vrot.slane %v1485_v12, 5  ;;  %v5517_v14 = vpop.f32.mrb[13].mxu1 }
 0x95b   :  { %v1492_v15 = vadd.f32 %v1490_v13, %v6998_v25 }
 0x95d   :  { %v6535_v16 = vpop.eup %6534  ;;  %6536 = vtanh.f32 %v1492_v15  ;;  %v4624_v24 = vmul.f32 -1.442695, %v1492_v15 }
 0x95e   :  { %1293 = vrot.lane.b32.xlu1 %v6535_v16, %s6810_s0  ;;  %6538 = vpow2.f32 %v4616_v18 }
 0x95f   :  { %6540 = vpow2.f32 %v4620_v22 }
 0x967   :  { %v6537_v17 = vpop.eup %6536 }
 0x968   :  { %1505 = vrot.lane.b32.xlu0 %v6537_v17, %s6810_s0  ;;  %v6539_v19 = vpop.eup %6538 }
 0x969   :  { %v1074_v23 = vadd.f32 1.0, %v6539_v19  ;;  %v6541_v27 = vpop.eup %6540 }
 0x96a   :  { %v1287_v37 = vadd.f32 1.0, %v6541_v27 }
 0x96b   :  { %6542 = vrcp.f32 %v1074_v23 }
 0x96c   :  { %6544 = vpow2.f32 %v4624_v24 }
 0x96d   :  { %6546 = vrcp.f32 %v1287_v37 }
 0x975   :  { %v6543_v31 = vpop.eup %6542 }
 0x976   :  { %v6545_v39 = vpop.eup %6544  ;;  %v1078_v51 = vmul.f32 %v6543_v31, %v7192_v38 }
 0x977   :  { %v1496_v40 = vadd.f32 1.0, %v6545_v39  ;;  %v6547_v43 = vpop.eup %6546 }
 0x978   :  { %v1291_v55 = vmul.f32 %v6547_v43, %v7190_v36 }
 0x979   :  { %6548 = vrcp.f32 %v1496_v40 }
 0x983   :  { %v6549_v48 = vpop.eup %6548 }
 0x984   :  { %v1503_v61 = vmul.f32 %v6549_v48, %v1501_v60 }
 0x9c0   :  { %v1081_v32 = vpop.permute.xlu0 %1080 }
 0x9c1   :  { %v1083_v35 = vmul.f32 %v6543_v31, %v1081_v32 }
 0x9c3   :  { %1085 = vrot.lane.b32.xlu1 %v1083_v35, %s6811_s6 }
 0x9d0   :  { %v1294_v46 = vpop.permute.xlu1 %1293 }
 0x9d1   :  { %v1296_v26 = vmul.f32 %v6547_v43, %v1294_v46 }
 0x9d3   :  { %1298 = vrot.lane.b32.xlu0 %v1296_v26, %s6811_s6 }
 0x9da   :  { %v1506_v49 = vpop.permute.xlu0 %1505 }
 0x9db   :  { %v1508_v50 = vmul.f32 %v6549_v48, %v1506_v49 }
 0x9dd   :  { %1510 = vrot.lane.b32.xlu1 %v1508_v50, %s6811_s6 }
 0xa35   :  { %v1086_v53 = vpop.permute.xlu1 %1085 }
 0xa36   :  { %v7249_v28 = vadd.f32 %v1086_v53, %v1078_v51 }
 0xa38   :  { %6550 = vtanh.f32 %v7249_v28 }
 0xa42   :  { %v6551_v54 = vpop.eup %6550 }
 0xa43   :  { %1091 = vrot.lane.b32.xlu0 %v6551_v54, %s6810_s0 }
 0xa45   :  { %v1299_v56 = vpop.permute.xlu0 %1298 }
 0xa46   :  { %v7254_v58 = vadd.f32 %v1299_v56, %v1291_v55 }
 0xa48   :  { %6552 = vtanh.f32 %v7254_v58 }
 0xa4f   :  { %v1511_v62 = vpop.permute.xlu1 %1510 }
 0xa50   :  { %v7258_v38 = vadd.f32 %v1511_v62, %v1503_v61 }
 0xa52   :  { %v6553_v63 = vpop.eup %6552  ;;  %6554 = vtanh.f32 %v7258_v38 }
 0xa53   :  { %1304 = vrot.lane.b32.xlu1 %v6553_v63, %s6810_s0 }
 0xa5c   :  { %v6555_v0 = vpop.eup %6554 }
 0xa5d   :  { %1516 = vrot.lane.b32.xlu0 %v6555_v0, %s6810_s0 }
 0xab5   :  { %v1092_v36 = vpop.permute.xlu0 %1091 }
 0xab6   :  { %v1094_v1 = vmul.f32 %v6543_v31, %v1092_v36 }
 0xab8   :  { %1313 = vrot.lane.b32.xlu0 %v1094_v1, %s6810_s0 }
 0xac5   :  { %v1305_v3 = vpop.permute.xlu1 %1304 }
 0xac6   :  { %v1307_v4 = vmul.f32 %v6547_v43, %v1305_v3 }
 0xac8   :  { %v1524_v6 = vrot.slane %v1307_v4, 5  ;;  %1309 = vrot.lane.b32.xlu1 %v1307_v4, %s6811_s6 }
 0xaca   :  { %1525 = vrot.lane.b32.xlu0 %v1524_v6, %s6810_s0 }
 0xacf   :  { %v1517_v45 = vpop.permute.xlu0 %1516 }
 0xad0   :  { %v1519_v7 = vmul.f32 %v6549_v48, %v1517_v45 }
 0xad2   :  { %1521 = vrot.lane.b32.xlu1 %v1519_v7, %s6811_s6  ;;  %v1733_v8 = vrot.slane %v1519_v7, 3 }
 0xad6   :  { %1734 = vrot.lane.b32.xlu1 %v1733_v8, %s6811_s6  ;;  %v1820_v8 = vrot.slane %v7258_v38, 7 }
 0xb2a   :  { %v1314_v9 = vpop.permute.xlu0 %1313 }
 0xb3a   :  { %v1310_v10 = vpop.permute.xlu1 %1309 }
 0xb3b   :  { %v1316_v11 = vsel %vm472_vm1, %v1310_v10, %v1314_v9 }
 0xb3c   :  { %5505 = vmatmul.mubr.msk.f32.vlgmr.msra.gmra.mrb[10].mxu0 %vm576_vm2, %v1316_v11  ;;  %v1526_v13 = vpop.permute.xlu0 %1525 }
 0xb3d   :  { %6180 = vmatpush3.bf16.msra.mxu0 %v7016_v41  ;;  %5534 = vmatprep.mubr.msk.f32.mxu0 %vm6808_vm0, %v6809_v5 }
 0xb3e   :  { %6181 = vmatprep.subr.bf16.mxu0 %v6807_v2 }
 0xb41   :  { %6183 = vmatpush3.bf16.msra.mxu0 %v7023_v42 }
 0xb42   :  { %6184 = vmatprep.subr.bf16.mxu0 %v6807_v2 }
 0xb44   :  { %v1522_v12 = vpop.permute.xlu1 %1521 }
 0xb45   :  { %6186 = vmatpush3.bf16.msra.mxu0 %v7034_v44  ;;  %v1528_v14 = vsel %vm472_vm1, %v1522_v12, %v1526_v13 }
 0xb46   :  { %6187 = vmatprep.subr.bf16.mxu0 %v6807_v2  ;;  %v1530_v15 = vrot.slane %v1528_v14, 3 }
 0xb48   :  { %v1735_v16 = vpop.permute.xlu1 %1734 }
 0xb49   :  { %6189 = vmatpush3.bf16.msra.mxu0 %v7046_v47 }
 0xb4a   :  { %6202 = vmatprep.subr.bf16.mxu0 %v6807_v2 }
 0xb4c   :  { %5535 = vmatmul.mubr.msk.f32.vlgmr.msra.gmra.mrb[12].mxu0 %vm576_vm2, %v1530_v15 }
 0xb4d   :  { %6204 = vmatpush3.bf16.msra.mxu0 %v6976_v20  ;;  %5564 = vmatprep.mubr.msk.f32.mxu0 %vm6808_vm0, %v6809_v5 }
 0xb4e   :  { %6205 = vmatprep.subr.bf16.mxu0 %v6807_v2 }
 0xb51   :  { %6207 = vmatpush3.bf16.msra.mxu0 %v6986_v21 }
 0xb52   :  { %6220 = vmatprep.subr.bf16.mxu0 %v6807_v2 }
 0xb54   :  { %5565 = vmatmul.mubr.msk.f32.vlgmr.msra.gmra.mrb[14].mxu0 %vm472_vm1, %v1735_v16 }
 0xb55   :  { %6222 = vmatpush3.bf16.msra.mxu0 %v7115_v29  ;;  %5602 = vmatprep.mubr.msk.f32.mxu0 %vm6808_vm0, %v6809_v5 }
 0xb56   :  { %6223 = vmatprep.subr.bf16.mxu0 %v6807_v2 }
 0xb59   :  { %6225 = vmatpush3.bf16.msra.mxu0 %v7122_v30 }
 0xb5a   :  { %6226 = vmatprep.subr.bf16.mxu0 %v6807_v2 }
 0xb5d   :  { %6228 = vmatpush3.bf16.msra.mxu0 %v7131_v33 }
 0xb5e   :  { %6229 = vmatprep.subr.bf16.mxu0 %v6807_v2 }
 0xb61   :  { %6231 = vmatpush3.bf16.msra.mxu0 %v7138_v34 }
 0xb62   :  { %6238 = vmatprep.subr.bf16.mxu0 %v6807_v2 }
 0xc0f   :  { %v1386_v20 = vpop.f32.mrb[10].mxu0 }
 0xc10   :  { %v1387_v21 = vadd.f32 %v1386_v20, %v7178_v52  ;;  %v5506_v17 = vpop.f32.mrb[11].mxu0 }
 0xc12   :  { %6556 = vtanh.f32 %v1387_v21  ;;  %v4622_v39 = vmul.f32 -1.442695, %v1387_v21 }
 0xc1c   :  { %v6557_v18 = vpop.eup %6556 }
 0xc1d   :  { %1399 = vrot.lane.b32.xlu0 %v6557_v18, %s6810_s0 }
 0xc1f   :  { %v1599_v19 = vpop.f32.mrb[12].mxu0 }
 0xc20   :  { %v1600_v22 = vadd.f32 %v1599_v19, %v7097_v59  ;;  %v5536_v23 = vpop.f32.mrb[13].mxu0 }
 0xc22   :  { %6558 = vtanh.f32 %v1600_v22  ;;  %v4626_v43 = vmul.f32 -1.442695, %v1600_v22 }
 0xc27   :  { %v1804_v24 = vpop.f32.mrb[14].mxu0 }
 0xc28   :  { %v1809_v27 = vrot.slane %v1804_v24, 4  ;;  %v5566_v31 = vpop.f32.mrb[15].mxu0 }
 0xc2a   :  { %v1811_v32 = vadd.f32 %v1809_v27, %v6998_v25 }
 0xc2c   :  { %v6559_v35 = vpop.eup %6558  ;;  %6560 = vtanh.f32 %v1811_v32  ;;  %v4630_v26 = vmul.f32 -1.442695, %v1811_v32 }
 0xc2d   :  { %1612 = vrot.lane.b32.xlu1 %v6559_v35, %s6810_s0  ;;  %6562 = vpow2.f32 %v4622_v39 }
 0xc2e   :  { %6564 = vpow2.f32 %v4626_v43 }
 0xc36   :  { %v6561_v37 = vpop.eup %6560 }
 0xc37   :  { %1824 = vrot.lane.b32.xlu0 %v6561_v37, %s6810_s0  ;;  %v6563_v40 = vpop.eup %6562 }
 0xc38   :  { %v1393_v46 = vadd.f32 1.0, %v6563_v40  ;;  %v6565_v48 = vpop.eup %6564 }
 0xc39   :  { %v1606_v53 = vadd.f32 1.0, %v6565_v48 }
 0xc3a   :  { %6566 = vrcp.f32 %v1393_v46 }
 0xc3b   :  { %6568 = vpow2.f32 %v4630_v26 }
 0xc3c   :  { %6570 = vrcp.f32 %v1606_v53 }
 0xc44   :  { %v6567_v49 = vpop.eup %6566 }
 0xc45   :  { %v6569_v54 = vpop.eup %6568  ;;  %v1397_v36 = vmul.f32 %v6567_v49, %v7249_v28 }
 0xc46   :  { %v1815_v55 = vadd.f32 1.0, %v6569_v54  ;;  %v6571_v56 = vpop.eup %6570 }
 0xc47   :  { %v1610_v6 = vmul.f32 %v6571_v56, %v7254_v58 }
 0xc48   :  { %6572 = vrcp.f32 %v1815_v55 }
 0xc52   :  { %v6573_v62 = vpop.eup %6572 }
 0xc53   :  { %v1822_v9 = vmul.f32 %v6573_v62, %v1820_v8 }
 0xc8f   :  { %v1400_v50 = vpop.permute.xlu0 %1399 }
 0xc90   :  { %v1402_v51 = vmul.f32 %v6567_v49, %v1400_v50 }
 0xc92   :  { %1404 = vrot.lane.b32.xlu1 %v1402_v51, %s6811_s6 }
 0xc9f   :  { %v1613_v60 = vpop.permute.xlu1 %1612 }
 0xca0   :  { %v1615_v61 = vmul.f32 %v6571_v56, %v1613_v60 }
 0xca2   :  { %1617 = vrot.lane.b32.xlu0 %v1615_v61, %s6811_s6 }
 0xca9   :  { %v1825_v63 = vpop.permute.xlu0 %1824 }
 0xcaa   :  { %v1827_v0 = vmul.f32 %v6573_v62, %v1825_v63 }
 0xcac   :  { %1829 = vrot.lane.b32.xlu1 %v1827_v0, %s6811_s6 }
 0xd04   :  { %v1405_v1 = vpop.permute.xlu1 %1404 }
 0xd05   :  { %v7309_v3 = vadd.f32 %v1405_v1, %v1397_v36 }
 0xd07   :  { %6574 = vtanh.f32 %v7309_v3 }
 0xd11   :  { %v6575_v4 = vpop.eup %6574 }
 0xd12   :  { %1410 = vrot.lane.b32.xlu0 %v6575_v4, %s6810_s0 }
 0xd14   :  { %v1618_v45 = vpop.permute.xlu0 %1617 }
 0xd15   :  { %v7314_v7 = vadd.f32 %v1618_v45, %v1610_v6 }
 0xd17   :  { %6576 = vtanh.f32 %v7314_v7 }
 0xd1e   :  { %v1830_v10 = vpop.permute.xlu1 %1829 }
 0xd1f   :  { %v7318_v28 = vadd.f32 %v1830_v10, %v1822_v9 }
 0xd21   :  { %v6577_v11 = vpop.eup %6576  ;;  %6578 = vtanh.f32 %v7318_v28 }
 0xd22   :  { %1623 = vrot.lane.b32.xlu1 %v6577_v11, %s6810_s0 }
 0xd2b   :  { %v6579_v12 = vpop.eup %6578 }
 0xd2c   :  { %1835 = vrot.lane.b32.xlu0 %v6579_v12, %s6810_s0 }
 0xd84   :  { %v1411_v58 = vpop.permute.xlu0 %1410 }
 0xd85   :  { %v1413_v13 = vmul.f32 %v6567_v49, %v1411_v58 }
 0xd87   :  { %1632 = vrot.lane.b32.xlu0 %v1413_v13, %s6810_s0 }
 0xd94   :  { %v1624_v14 = vpop.permute.xlu1 %1623 }
 0xd95   :  { %v1626_v15 = vmul.f32 %v6571_v56, %v1624_v14 }
 0xd97   :  { %v1843_v16 = vrot.slane %v1626_v15, 4  ;;  %1628 = vrot.lane.b32.xlu1 %v1626_v15, %s6811_s6 }
 0xd99   :  { %1844 = vrot.lane.b32.xlu0 %v1843_v16, %s6810_s0  ;;  %v2139_v16 = vrot.slane %v7318_v28, 7 }
 0xd9e   :  { %v1836_v38 = vpop.permute.xlu0 %1835 }
 0xd9f   :  { %v1838_v20 = vmul.f32 %v6573_v62, %v1836_v38 }
 0xda1   :  { %1840 = vrot.lane.b32.xlu1 %v1838_v20, %s6811_s6  ;;  %v2052_v21 = vrot.slane %v1838_v20, 4 }
 0xda5   :  { %2053 = vrot.lane.b32.xlu1 %v2052_v21, %s6811_s6 }
 0xdf9   :  { %v1633_v17 = vpop.permute.xlu0 %1632 }
 0xe09   :  { %v1629_v18 = vpop.permute.xlu1 %1628 }
 0xe0a   :  { %v1635_v19 = vsel %vm472_vm1, %v1629_v18, %v1633_v17 }
 0xe0b   :  { %5554 = vmatmul.mubr.msk.f32.vlgmr.msra.gmra.mrb[14].mxu1 %vm576_vm2, %v1635_v19  ;;  %v1845_v23 = vpop.permute.xlu0 %1844 }
 0xe0c   :  { %6210 = vmatpush3.bf16.msra.mxu1 %v7016_v41  ;;  %5583 = vmatprep.mubr.msk.f32.mxu1 %vm6808_vm0, %v6809_v5 }
 0xe0d   :  { %6211 = vmatprep.subr.bf16.mxu1 %v6807_v2 }
 0xe10   :  { %6213 = vmatpush3.bf16.msra.mxu1 %v7023_v42  ;;  %v7345_v42 = vld [vmem:[%s8030_s4] sm:$0xff]  }
 0xe11   :  { %6214 = vmatprep.subr.bf16.mxu1 %v6807_v2 }
 0xe13   :  { %v1841_v22 = vpop.permute.xlu1 %1840 }
 0xe14   :  { %6216 = vmatpush3.bf16.msra.mxu1 %v7034_v44  ;;  %v1847_v24 = vsel %vm472_vm1, %v1841_v22, %v1845_v23  ;;  %v7354_v44 = vld [vmem:[%s8030_s4 + $0x8] sm:$0xff]  }
 0xe15   :  { %6217 = vmatprep.subr.bf16.mxu1 %v6807_v2  ;;  %v1849_v41 = vrot.slane %v1847_v24, 4 }
 0xe18   :  { %6219 = vmatpush3.bf16.msra.mxu1 %v7046_v47  ;;  %v2054_v47 = vpop.permute.xlu1 %2053 }
 0xe19   :  { %6232 = vmatprep.subr.bf16.mxu1 %v6807_v2 }
 0xe1b   :  { %5584 = vmatmul.mubr.msk.f32.vlgmr.msra.gmra.mrb[16].mxu1 %vm576_vm2, %v1849_v41 }
 0xe1c   :  { %6234 = vmatpush3.bf16.msra.mxu1 %v7345_v42  ;;  %5613 = vmatprep.mubr.msk.f32.mxu1 %vm6808_vm0, %v6809_v5 }
 0xe1d   :  { %6235 = vmatprep.subr.bf16.mxu1 %v6807_v2 }
 0xe20   :  { %6237 = vmatpush3.bf16.msra.mxu1 %v7354_v44 }
 0xe21   :  { %6250 = vmatprep.subr.bf16.mxu1 %v6807_v2 }
 0xe23   :  { %5614 = vmatmul.mubr.msk.f32.vlgmr.msra.gmra.mrb[18].mxu1 %vm472_vm1, %v2054_v47 }
 0xe24   :  { %6252 = vmatpush3.bf16.msra.mxu1 %v7115_v29  ;;  %5651 = vmatprep.mubr.msk.f32.mxu1 %vm6808_vm0, %v6809_v5 }
 0xe25   :  { %6253 = vmatprep.subr.bf16.mxu1 %v6807_v2 }
 0xe28   :  { %6255 = vmatpush3.bf16.msra.mxu1 %v7122_v30 }
 0xe29   :  { %6256 = vmatprep.subr.bf16.mxu1 %v6807_v2 }
 0xe2c   :  { %6258 = vmatpush3.bf16.msra.mxu1 %v7131_v33 }
 0xe2d   :  { %6259 = vmatprep.subr.bf16.mxu1 %v6807_v2 }
 0xe30   :  { %6261 = vmatpush3.bf16.msra.mxu1 %v7138_v34 }
 0xe31   :  { %6268 = vmatprep.subr.bf16.mxu1 %v6807_v2 }
 0xede   :  { %v1705_v27 = vpop.f32.mrb[14].mxu1 }
 0xedf   :  { %v1706_v31 = vadd.f32 %v1705_v27, %v7178_v52  ;;  %v5555_v32 = vpop.f32.mrb[15].mxu1 }
 0xee0   :  { %v7403_v32 = vld [vmem:[%s8031_s5] sm:$0xff]  }
 0xee1   :  { %6580 = vtanh.f32 %v1706_v31  ;;  %v4628_v51 = vmul.f32 -1.442695, %v1706_v31 }
 0xeeb   :  { %v6581_v35 = vpop.eup %6580 }
 0xeec   :  { %1718 = vrot.lane.b32.xlu0 %v6581_v35, %s6810_s0  ;;  %v7412_v35 = vld [vmem:[%s8031_s5 + $0x8] sm:$0xff]  }
 0xeee   :  { %v1918_v37 = vpop.f32.mrb[16].mxu1 }
 0xeef   :  { %v1919_v39 = vadd.f32 %v1918_v37, %v7097_v59  ;;  %v5585_v40 = vpop.f32.mrb[17].mxu1 }
 0xef1   :  { %6582 = vtanh.f32 %v1919_v39  ;;  %v4632_v54 = vmul.f32 -1.442695, %v1919_v39  ;;  %v7419_v39 = vld [vmem:[%s8031_s5 + $0x10] sm:$0xff]  }
 0xef6   :  { %v2123_v43 = vpop.f32.mrb[18].mxu1 }
 0xef7   :  { %v2128_v46 = vrot.slane %v2123_v43, 3  ;;  %v5615_v26 = vpop.f32.mrb[19].mxu1 }
 0xef9   :  { %v2130_v48 = vadd.f32 %v2128_v46, %v6998_v25  ;;  %v7427_v46 = vld [vmem:[%s8031_s5 + $0x18] sm:$0xff]  }
 0xefb   :  { %v6583_v49 = vpop.eup %6582  ;;  %6584 = vtanh.f32 %v2130_v48  ;;  %v4636_v59 = vmul.f32 -1.442695, %v2130_v48 }
 0xefc   :  { %1931 = vrot.lane.b32.xlu1 %v6583_v49, %s6810_s0  ;;  %6586 = vpow2.f32 %v4628_v51 }
 0xefd   :  { %6588 = vpow2.f32 %v4632_v54 }
 0xf05   :  { %v6585_v50 = vpop.eup %6584 }
 0xf06   :  { %2143 = vrot.lane.b32.xlu0 %v6585_v50, %s6810_s0  ;;  %v6587_v53 = vpop.eup %6586 }
 0xf07   :  { %v1712_v55 = vadd.f32 1.0, %v6587_v53  ;;  %v6589_v56 = vpop.eup %6588 }
 0xf08   :  { %v1925_v63 = vadd.f32 1.0, %v6589_v56 }
 0xf09   :  { %6590 = vrcp.f32 %v1712_v55 }
 0xf0a   :  { %6592 = vpow2.f32 %v4636_v59 }
 0xf0b   :  { %6594 = vrcp.f32 %v1925_v63 }
 0xf13   :  { %v6591_v60 = vpop.eup %6590 }
 0xf14   :  { %v6593_v0 = vpop.eup %6592  ;;  %v1716_v10 = vmul.f32 %v6591_v60, %v7309_v3 }
 0xf15   :  { %v2134_v36 = vadd.f32 1.0, %v6593_v0  ;;  %v6595_v1 = vpop.eup %6594 }
 0xf16   :  { %v1929_v13 = vmul.f32 %v6595_v1, %v7314_v7 }
 0xf17   :  { %6596 = vrcp.f32 %v2134_v36 }
 0xf21   :  { %v6597_v45 = vpop.eup %6596 }
 0xf22   :  { %v2141_v38 = vmul.f32 %v6597_v45, %v2139_v16 }
 0xf5e   :  { %v1719_v61 = vpop.permute.xlu0 %1718 }
 0xf5f   :  { %v1721_v62 = vmul.f32 %v6591_v60, %v1719_v61 }
 0xf61   :  { %1723 = vrot.lane.b32.xlu1 %v1721_v62, %s6811_s6 }
 0xf6e   :  { %v1932_v4 = vpop.permute.xlu1 %1931 }
 0xf6f   :  { %v1934_v6 = vmul.f32 %v6595_v1, %v1932_v4 }
 0xf71   :  { %1936 = vrot.lane.b32.xlu0 %v1934_v6, %s6811_s6 }
 0xf78   :  { %v2144_v8 = vpop.permute.xlu0 %2143 }
 0xf79   :  { %v2146_v9 = vmul.f32 %v6597_v45, %v2144_v8 }
 0xf7b   :  { %2148 = vrot.lane.b32.xlu1 %v2146_v9, %s6811_s6 }
 0xfd3   :  { %v1724_v11 = vpop.permute.xlu1 %1723 }
 0xfd4   :  { %v7379_v12 = vadd.f32 %v1724_v11, %v1716_v10 }
 0xfd6   :  { %6598 = vtanh.f32 %v7379_v12 }
 0xfe0   :  { %v6599_v58 = vpop.eup %6598 }
 0xfe1   :  { %1729 = vrot.lane.b32.xlu0 %v6599_v58, %s6810_s0 }
 0xfe3   :  { %v1937_v14 = vpop.permute.xlu0 %1936 }
 0xfe4   :  { %v7384_v15 = vadd.f32 %v1937_v14, %v1929_v13 }
 0xfe6   :  { %6600 = vtanh.f32 %v7384_v15 }
 0xfed   :  { %v2149_v20 = vpop.permute.xlu1 %2148 }
 0xfee   :  { %v7388_v3 = vadd.f32 %v2149_v20, %v2141_v38 }
 0xff0   :  { %v6601_v21 = vpop.eup %6600  ;;  %6602 = vtanh.f32 %v7388_v3 }
 0xff1   :  { %1942 = vrot.lane.b32.xlu1 %v6601_v21, %s6810_s0 }
 0xffa   :  { %v6603_v17 = vpop.eup %6602 }
 0xffb   :  { %2154 = vrot.lane.b32.xlu0 %v6603_v17, %s6810_s0 }
0x1053   :  { %v1730_v7 = vpop.permute.xlu0 %1729 }
0x1054   :  { %v1732_v18 = vmul.f32 %v6591_v60, %v1730_v7 }
0x1056   :  { %1951 = vrot.lane.b32.xlu0 %v1732_v18, %s6810_s0 }
0x1063   :  { %v1943_v19 = vpop.permute.xlu1 %1942 }
0x1064   :  { %v1945_v22 = vmul.f32 %v6595_v1, %v1943_v19 }
0x1066   :  { %v2162_v23 = vrot.slane %v1945_v22, 3  ;;  %1947 = vrot.lane.b32.xlu1 %v1945_v22, %s6811_s6 }
0x1068   :  { %2163 = vrot.lane.b32.xlu0 %v2162_v23, %s6810_s0 }
0x106d   :  { %v2155_v28 = vpop.permute.xlu0 %2154 }
0x106e   :  { %v2157_v24 = vmul.f32 %v6597_v45, %v2155_v28  ;;  %v2458_v28 = vrot.slane %v7388_v3, 7 }
0x1070   :  { %2159 = vrot.lane.b32.xlu1 %v2157_v24, %s6811_s6  ;;  %v2371_v41 = vrot.slane %v2157_v24, 5 }
0x1074   :  { %2372 = vrot.lane.b32.xlu1 %v2371_v41, %s6811_s6 }
0x10c8   :  { %v1952_v47 = vpop.permute.xlu0 %1951 }
0x10d8   :  { %v1948_v27 = vpop.permute.xlu1 %1947 }
0x10d9   :  { %v1954_v31 = vsel %vm472_vm1, %v1948_v27, %v1952_v47 }
0x10da   :  { %5603 = vmatmul.mubr.msk.f32.vlgmr.msra.gmra.mrb[16].mxu0 %vm576_vm2, %v1954_v31  ;;  %v2164_v40 = vpop.permute.xlu0 %2163 }
0x10db   :  { %6240 = vmatpush3.bf16.msra.mxu0 %v7403_v32  ;;  %5632 = vmatprep.mubr.msk.f32.mxu0 %vm6808_vm0, %v6809_v5 }
0x10dc   :  { %6241 = vmatprep.subr.bf16.mxu0 %v6807_v2 }
0x10df   :  { %6243 = vmatpush3.bf16.msra.mxu0 %v7412_v35 }
0x10e0   :  { %6244 = vmatprep.subr.bf16.mxu0 %v6807_v2 }
0x10e2   :  { %v2160_v37 = vpop.permute.xlu1 %2159 }
0x10e3   :  { %6246 = vmatpush3.bf16.msra.mxu0 %v7419_v39  ;;  %v2166_v43 = vsel %vm472_vm1, %v2160_v37, %v2164_v40 }
0x10e4   :  { %6247 = vmatprep.subr.bf16.mxu0 %v6807_v2  ;;  %v2168_v26 = vrot.slane %v2166_v43, 5 }
0x10e6   :  { %v2373_v48 = vpop.permute.xlu1 %2372 }
0x10e7   :  { %6249 = vmatpush3.bf16.msra.mxu0 %v7427_v46 }
0x10e8   :  { %6262 = vmatprep.subr.bf16.mxu0 %v6807_v2 }
0x10ea   :  { %5633 = vmatmul.mubr.msk.f32.vlgmr.msra.gmra.mrb[18].mxu0 %vm576_vm2, %v2168_v26 }
0x10eb   :  { %6264 = vmatpush3.bf16.msra.mxu0 %v7345_v42  ;;  %5662 = vmatprep.mubr.msk.f32.mxu0 %vm6808_vm0, %v6809_v5 }
0x10ec   :  { %6265 = vmatprep.subr.bf16.mxu0 %v6807_v2 }
0x10ef   :  { %6267 = vmatpush3.bf16.msra.mxu0 %v7354_v44 }
0x10f0   :  { %6280 = vmatprep.subr.bf16.mxu0 %v6807_v2 }
0x10f2   :  { %5663 = vmatmul.mubr.msk.f32.vlgmr.msra.gmra.mrb[20].mxu0 %vm472_vm1, %v2373_v48 }
0x10f3   :  { %6282 = vmatpush3.bf16.msra.mxu0 %v7115_v29  ;;  %5700 = vmatprep.mubr.msk.f32.mxu0 %vm6808_vm0, %v6809_v5 }
0x10f4   :  { %6283 = vmatprep.subr.bf16.mxu0 %v6807_v2 }
0x10f7   :  { %6285 = vmatpush3.bf16.msra.mxu0 %v7122_v30  ;;  %v7454_v30 = vld [vmem:[%s8033_s7] sm:$0x3] }
0x10f8   :  { %6286 = vmatprep.subr.bf16.mxu0 %v6807_v2 }
0x10fb   :  { %6288 = vmatpush3.bf16.msra.mxu0 %v7131_v33 }
0x10fc   :  { %6289 = vmatprep.subr.bf16.mxu0 %v6807_v2 }
0x10ff   :  { %6291 = vmatpush3.bf16.msra.mxu0 %v7138_v34 }
0x1100   :  { %6298 = vmatprep.subr.bf16.mxu0 %v6807_v2 }
0x11ad   :  { %v2024_v49 = vpop.f32.mrb[16].mxu0 }
0x11ae   :  { %v2025_v29 = vadd.f32 %v2024_v49, %v7178_v52  ;;  %v5604_v50 = vpop.f32.mrb[17].mxu0 }
0x11b0   :  { %6604 = vtanh.f32 %v2025_v29  ;;  %v4634_v62 = vmul.f32 -1.442695, %v2025_v29 }
0x11ba   :  { %v6605_v51 = vpop.eup %6604 }
0x11bb   :  { %2037 = vrot.lane.b32.xlu0 %v6605_v51, %s6810_s0 }
0x11bd   :  { %v2237_v53 = vpop.f32.mrb[18].mxu0 }
0x11be   :  { %v2238_v33 = vadd.f32 %v7454_v30, %v2237_v53  ;;  %v5634_v54 = vpop.f32.mrb[19].mxu0 }
0x11c0   :  { %6606 = vtanh.f32 %v2238_v33  ;;  %v4638_v0 = vmul.f32 -1.442695, %v2238_v33 }
0x11c5   :  { %v2442_v34 = vpop.f32.mrb[20].mxu0 }
0x11c6   :  { %v2447_v55 = vrot.slane %v2442_v34, 2  ;;  %v5664_v59 = vpop.f32.mrb[21].mxu0 }
0x11c7   :  { %v6782_v59 = vld [vmem:[%s8031_s5 + $0x38] sm:$0xff]  }
0x11c8   :  { %v2449_v56 = vadd.f32 %v2447_v55, %v6998_v25  ;;  %v6779_v55 = vld [vmem:[%s8031_s5 + $0x20] sm:$0xff]  }
0x11ca   :  { %v6607_v60 = vpop.eup %6606  ;;  %6608 = vtanh.f32 %v2449_v56  ;;  %v4642_v1 = vmul.f32 -1.442695, %v2449_v56 }
0x11cb   :  { %2250 = vrot.lane.b32.xlu1 %v6607_v60, %s6810_s0  ;;  %6610 = vpow2.f32 %v4634_v62 }
0x11cc   :  { %6612 = vpow2.f32 %v4638_v0 }
0x11d4   :  { %v6609_v61 = vpop.eup %6608 }
0x11d5   :  { %2462 = vrot.lane.b32.xlu0 %v6609_v61, %s6810_s0  ;;  %v6611_v63 = vpop.eup %6610 }
0x11d6   :  { %v2031_v36 = vadd.f32 1.0, %v6611_v63  ;;  %v6613_v4 = vpop.eup %6612 }
0x11d7   :  { %v2244_v9 = vadd.f32 1.0, %v6613_v4 }
0x11d8   :  { %6614 = vrcp.f32 %v2031_v36 }
0x11d9   :  { %6616 = vpow2.f32 %v4642_v1 }
0x11da   :  { %6618 = vrcp.f32 %v2244_v9 }
0x11e2   :  { %v6615_v6 = vpop.eup %6614 }
0x11e3   :  { %v6617_v10 = vpop.eup %6616  ;;  %v2035_v21 = vmul.f32 %v6615_v6, %v7379_v12 }
0x11e4   :  { %v2453_v11 = vadd.f32 1.0, %v6617_v10  ;;  %v6619_v58 = vpop.eup %6618 }
0x11e5   :  { %v2248_v19 = vmul.f32 %v6619_v58, %v7384_v15 }
0x11e6   :  { %6620 = vrcp.f32 %v2453_v11 }
0x11f0   :  { %v6621_v16 = vpop.eup %6620 }
0x11f1   :  { %v2460_v24 = vmul.f32 %v6621_v16, %v2458_v28 }
0x122d   :  { %v2038_v45 = vpop.permute.xlu0 %2037 }
0x122e   :  { %v2040_v8 = vmul.f32 %v6615_v6, %v2038_v45 }
0x1230   :  { %2042 = vrot.lane.b32.xlu1 %v2040_v8, %s6811_s6 }
0x123d   :  { %v2251_v13 = vpop.permute.xlu1 %2250 }
0x123e   :  { %v2253_v14 = vmul.f32 %v6619_v58, %v2251_v13 }
0x1240   :  { %2255 = vrot.lane.b32.xlu0 %v2253_v14, %s6811_s6 }
0x1247   :  { %v2463_v38 = vpop.permute.xlu0 %2462 }
0x1248   :  { %v2465_v20 = vmul.f32 %v6621_v16, %v2463_v38 }
0x124a   :  { %2467 = vrot.lane.b32.xlu1 %v2465_v20, %s6811_s6 }
0x12a2   :  { %v2043_v17 = vpop.permute.xlu1 %2042 }
0x12a3   :  { %v7464_v7 = vadd.f32 %v2043_v17, %v2035_v21 }
0x12a5   :  { %6622 = vtanh.f32 %v7464_v7 }
0x12af   :  { %v6623_v18 = vpop.eup %6622 }
0x12b0   :  { %2048 = vrot.lane.b32.xlu0 %v6623_v18, %s6810_s0 }
0x12b2   :  { %v2256_v22 = vpop.permute.xlu0 %2255 }
0x12b3   :  { %v7469_v23 = vadd.f32 %v2256_v22, %v2248_v19 }
0x12b5   :  { %6624 = vtanh.f32 %v7469_v23 }
0x12bc   :  { %v2468_v41 = vpop.permute.xlu1 %2467 }
0x12bd   :  { %v7473_v12 = vadd.f32 %v2468_v41, %v2460_v24 }
0x12bf   :  { %v6625_v47 = vpop.eup %6624  ;;  %6626 = vtanh.f32 %v7473_v12 }
0x12c0   :  { %2261 = vrot.lane.b32.xlu1 %v6625_v47, %s6810_s0 }
0x12c9   :  { %v6627_v27 = vpop.eup %6626 }
0x12ca   :  { %2473 = vrot.lane.b32.xlu0 %v6627_v27, %s6810_s0 }
0x1322   :  { %v2049_v15 = vpop.permute.xlu0 %2048 }
0x1323   :  { %v2051_v31 = vmul.f32 %v6615_v6, %v2049_v15 }
0x1325   :  { %2270 = vrot.lane.b32.xlu0 %v2051_v31, %s6810_s0 }
0x1332   :  { %v2262_v37 = vpop.permute.xlu1 %2261 }
0x1333   :  { %v2264_v40 = vmul.f32 %v6619_v58, %v2262_v37 }
0x1335   :  { %v2481_v43 = vrot.slane %v2264_v40, 2  ;;  %2266 = vrot.lane.b32.xlu1 %v2264_v40, %s6811_s6 }
0x1337   :  { %2482 = vrot.lane.b32.xlu0 %v2481_v43, %s6810_s0 }
0x133c   :  { %v2474_v3 = vpop.permute.xlu0 %2473 }
0x133d   :  { %v2476_v26 = vmul.f32 %v6621_v16, %v2474_v3 }
0x133f   :  { %2478 = vrot.lane.b32.xlu1 %v2476_v26, %s6811_s6  ;;  %v2690_v48 = vrot.slane %v2476_v26, 6  ;;  %v2777_v26 = vrot.slane %v7473_v12, 7 }
0x1343   :  { %2691 = vrot.lane.b32.xlu1 %v2690_v48, %s6811_s6 }
0x1397   :  { %v2271_v49 = vpop.permute.xlu0 %2270 }
0x13a7   :  { %v2267_v29 = vpop.permute.xlu1 %2266 }
0x13a8   :  { %v2273_v50 = vsel %vm472_vm1, %v2267_v29, %v2271_v49 }
0x13a9   :  { %5652 = vmatmul.mubr.msk.f32.vlgmr.msra.gmra.mrb[20].mxu1 %vm576_vm2, %v2273_v50  ;;  %v2483_v53 = vpop.permute.xlu0 %2482 }
0x13aa   :  { %6270 = vmatpush3.bf16.msra.mxu1 %v7403_v32  ;;  %5681 = vmatprep.mubr.msk.f32.mxu1 %vm6808_vm0, %v6809_v5 }
0x13ab   :  { %6271 = vmatprep.subr.bf16.mxu1 %v6807_v2 }
0x13ae   :  { %6273 = vmatpush3.bf16.msra.mxu1 %v7412_v35 }
0x13af   :  { %6274 = vmatprep.subr.bf16.mxu1 %v6807_v2 }
0x13b1   :  { %v2479_v51 = vpop.permute.xlu1 %2478 }
0x13b2   :  { %6276 = vmatpush3.bf16.msra.mxu1 %v7419_v39  ;;  %v2485_v33 = vsel %vm472_vm1, %v2479_v51, %v2483_v53 }
0x13b3   :  { %6277 = vmatprep.subr.bf16.mxu1 %v6807_v2  ;;  %v2487_v54 = vrot.slane %v2485_v33, 6 }
0x13b5   :  { %v2692_v34 = vpop.permute.xlu1 %2691 }
0x13b6   :  { %6279 = vmatpush3.bf16.msra.mxu1 %v7427_v46 }
0x13b7   :  { %6292 = vmatprep.subr.bf16.mxu1 %v6807_v2 }
0x13b9   :  { %5682 = vmatmul.mubr.msk.f32.vlgmr.msra.gmra.mrb[22].mxu1 %vm576_vm2, %v2487_v54 }
0x13ba   :  { %6294 = vmatpush3.bf16.msra.mxu1 %v7345_v42  ;;  %5711 = vmatprep.mubr.msk.f32.mxu1 %vm6808_vm0, %v6809_v5  ;;  %v6780_v42 = vld [vmem:[%s8031_s5 + $0x28] sm:$0xff]  }
0x13bb   :  { %6295 = vmatprep.subr.bf16.mxu1 %v6807_v2 }
0x13be   :  { %6297 = vmatpush3.bf16.msra.mxu1 %v7354_v44  ;;  %v6781_v44 = vld [vmem:[%s8031_s5 + $0x30] sm:$0xff]  }
0x13bf   :  { %6310 = vmatprep.subr.bf16.mxu1 %v6807_v2 }
0x13c1   :  { %5712 = vmatmul.mubr.msk.f32.vlgmr.msra.gmra.mrb[24].mxu1 %vm472_vm1, %v2692_v34 }
0x13c2   :  { %6312 = vmatpush3.bf16.msra.mxu1 %v6779_v55  ;;  %5749 = vmatprep.mubr.msk.f32.mxu1 %vm6808_vm0, %v6809_v5 }
0x13c3   :  { %6313 = vmatprep.subr.bf16.mxu1 %v6807_v2 }
0x13c6   :  { %6315 = vmatpush3.bf16.msra.mxu1 %v6780_v42 }
0x13c7   :  { %6316 = vmatprep.subr.bf16.mxu1 %v6807_v2 }
0x13ca   :  { %6318 = vmatpush3.bf16.msra.mxu1 %v6781_v44 }
0x13cb   :  { %6319 = vmatprep.subr.bf16.mxu1 %v6807_v2 }
0x13ce   :  { %6321 = vmatpush3.bf16.msra.mxu1 %v6782_v59 }
0x13cf   :  { %6322 = vmatprep.subr.bf16.mxu1 %v6807_v2 }
0x147c   :  { %v2343_v56 = vpop.f32.mrb[20].mxu1 }
0x147d   :  { %v2344_v60 = vadd.f32 %v2343_v56, %v7178_v52  ;;  %v5653_v61 = vpop.f32.mrb[21].mxu1 }
0x147f   :  { %6628 = vtanh.f32 %v2344_v60  ;;  %v4640_v10 = vmul.f32 -1.442695, %v2344_v60 }
0x1489   :  { %v6629_v62 = vpop.eup %6628 }
0x148a   :  { %2356 = vrot.lane.b32.xlu0 %v6629_v62, %s6810_s0 }
0x148c   :  { %v2556_v63 = vpop.f32.mrb[22].mxu1 }
0x148d   :  { %v2557_v0 = vadd.f32 %v7454_v30, %v2556_v63  ;;  %v5683_v36 = vpop.f32.mrb[23].mxu1 }
0x148f   :  { %6630 = vtanh.f32 %v2557_v0  ;;  %v4644_v58 = vmul.f32 -1.442695, %v2557_v0 }
0x1494   :  { %v2761_v1 = vpop.f32.mrb[24].mxu1 }
0x1495   :  { %v2766_v4 = vrot.slane %v2761_v1, 1  ;;  %v5713_v6 = vpop.f32.mrb[25].mxu1 }
0x1497   :  { %v2768_v45 = vadd.f32 %v2766_v4, %v6998_v25 }
0x1499   :  { %v6631_v8 = vpop.eup %6630  ;;  %6632 = vtanh.f32 %v2768_v45  ;;  %v4648_v14 = vmul.f32 -1.442695, %v2768_v45 }
0x149a   :  { %2569 = vrot.lane.b32.xlu1 %v6631_v8, %s6810_s0  ;;  %6634 = vpow2.f32 %v4640_v10 }
0x149b   :  { %6636 = vpow2.f32 %v4644_v58 }
0x14a3   :  { %v6633_v9 = vpop.eup %6632 }
0x14a4   :  { %2781 = vrot.lane.b32.xlu0 %v6633_v9, %s6810_s0  ;;  %v6635_v11 = vpop.eup %6634 }
0x14a5   :  { %v2350_v13 = vadd.f32 1.0, %v6635_v11  ;;  %v6637_v16 = vpop.eup %6636 }
0x14a6   :  { %v2563_v21 = vadd.f32 1.0, %v6637_v16 }
0x14a7   :  { %6638 = vrcp.f32 %v2350_v13 }
0x14a8   :  { %6640 = vpow2.f32 %v4648_v14 }
0x14a9   :  { %6642 = vrcp.f32 %v2563_v21 }
0x14b1   :  { %v6639_v38 = vpop.eup %6638 }
0x14b2   :  { %v6641_v17 = vpop.eup %6640  ;;  %v2354_v27 = vmul.f32 %v6639_v38, %v7464_v7 }
0x14b3   :  { %v2772_v18 = vadd.f32 1.0, %v6641_v17  ;;  %v6643_v19 = vpop.eup %6642 }
0x14b4   :  { %v2567_v40 = vmul.f32 %v6643_v19, %v7469_v23 }
0x14b5   :  { %6644 = vrcp.f32 %v2772_v18 }
0x14bf   :  { %v6645_v24 = vpop.eup %6644 }
0x14c0   :  { %v2779_v48 = vmul.f32 %v6645_v24, %v2777_v26 }
0x14fc   :  { %v2357_v20 = vpop.permute.xlu0 %2356 }
0x14fd   :  { %v2359_v25 = vmul.f32 %v6639_v38, %v2357_v20 }
0x14ff   :  { %2361 = vrot.lane.b32.xlu1 %v2359_v25, %s6811_s6 }
0x150c   :  { %v2570_v22 = vpop.permute.xlu1 %2569 }
0x150d   :  { %v2572_v28 = vmul.f32 %v6643_v19, %v2570_v22 }
0x150f   :  { %2574 = vrot.lane.b32.xlu0 %v2572_v28, %s6811_s6 }
0x1516   :  { %v2782_v41 = vpop.permute.xlu0 %2781 }
0x1517   :  { %v2784_v47 = vmul.f32 %v6645_v24, %v2782_v41 }
0x1519   :  { %2786 = vrot.lane.b32.xlu1 %v2784_v47, %s6811_s6 }
0x1571   :  { %v2362_v15 = vpop.permute.xlu1 %2361 }
0x1572   :  { %v7532_v31 = vadd.f32 %v2362_v15, %v2354_v27 }
0x1574   :  { %6646 = vtanh.f32 %v7532_v31 }
0x157e   :  { %v6647_v37 = vpop.eup %6646 }
0x157f   :  { %2367 = vrot.lane.b32.xlu0 %v6647_v37, %s6810_s0 }
0x1581   :  { %v2575_v43 = vpop.permute.xlu0 %2574 }
0x1582   :  { %v7537_v3 = vadd.f32 %v2575_v43, %v2567_v40  ;;  %v7603_v40 = vld [vmem:[%s8035_s9 + $0x8] sm:$0xff]  }
0x1584   :  { %6648 = vtanh.f32 %v7537_v3 }
0x158b   :  { %v2787_v49 = vpop.permute.xlu1 %2786 }
0x158c   :  { %v7541_v7 = vadd.f32 %v2787_v49, %v2779_v48  ;;  %v7613_v48 = vld [vmem:[%s8037_s11] sm:$0x1] }
0x158e   :  { %v6649_v29 = vpop.eup %6648  ;;  %6650 = vtanh.f32 %v7541_v7 }
0x158f   :  { %2580 = vrot.lane.b32.xlu1 %v6649_v29, %s6810_s0 }
0x1598   :  { %v6651_v50 = vpop.eup %6650 }
0x1599   :  { %2792 = vrot.lane.b32.xlu0 %v6651_v50, %s6810_s0 }
0x15f1   :  { %v2368_v23 = vpop.permute.xlu0 %2367 }
0x15f2   :  { %v2370_v51 = vmul.f32 %v6639_v38, %v2368_v23 }
0x15f4   :  { %2589 = vrot.lane.b32.xlu0 %v2370_v51, %s6810_s0 }
0x1601   :  { %v2581_v53 = vpop.permute.xlu1 %2580 }
0x1602   :  { %v2583_v33 = vmul.f32 %v6643_v19, %v2581_v53 }
0x1604   :  { %v2800_v54 = vrot.slane %v2583_v33, 1  ;;  %2585 = vrot.lane.b32.xlu1 %v2583_v33, %s6811_s6 }
0x1606   :  { %2801 = vrot.lane.b32.xlu0 %v2800_v54, %s6810_s0 }
0x160b   :  { %v2793_v12 = vpop.permute.xlu0 %2792 }
0x160c   :  { %v7549_v34 = vmul.f32 %v6645_v24, %v2793_v12 }
0x160e   :  { %2797 = vrot.lane.b32.xlu1 %v7549_v34, %s6811_s6  ;;  %v3009_v47 = vrot.slane %v7549_v34, 7 }
0x1666   :  { %v2590_v55 = vpop.permute.xlu0 %2589 }
0x1676   :  { %v2586_v42 = vpop.permute.xlu1 %2585 }
0x1677   :  { %v2592_v44 = vsel %vm472_vm1, %v2586_v42, %v2590_v55  ;;  %v3093_v55 = vrot.slane %v7541_v7, 7 }
0x1678   :  { %5701 = vmatmul.mubr.msk.f32.vlgmr.msra.gmra.mrb[22].mxu0 %vm576_vm2, %v2592_v44  ;;  %v2802_v56 = vpop.permute.xlu0 %2801 }
0x1679   :  { %6300 = vmatpush3.bf16.msra.mxu0 %v7403_v32  ;;  %5730 = vmatprep.mubr.msk.f32.mxu0 %vm6808_vm0, %v6809_v5 }
0x167a   :  { %6301 = vmatprep.subr.bf16.mxu0 %v6807_v2 }
0x167d   :  { %6303 = vmatpush3.bf16.msra.mxu0 %v7412_v35 }
0x167e   :  { %6304 = vmatprep.subr.bf16.mxu0 %v6807_v2 }
0x1680   :  { %v2798_v59 = vpop.permute.xlu1 %2797 }
0x1681   :  { %6306 = vmatpush3.bf16.msra.mxu0 %v7419_v39  ;;  %v2804_v60 = vsel %vm472_vm1, %v2798_v59, %v2802_v56  ;;  %v7625_v56 = vld [vmem:[%s8038_s12] sm:$0xff]  }
0x1682   :  { %6307 = vmatprep.subr.bf16.mxu0 %v6807_v2  ;;  %v2806_v32 = vrot.slane %v2804_v60, 7  ;;  %v7632_v60 = vld [vmem:[%s8038_s12 + $0x8] sm:$0xff]  }
0x1685   :  { %6309 = vmatpush3.bf16.msra.mxu0 %v7427_v46 }
0x1686   :  { %6328 = vmatprep.subr.bf16.mxu0 %v6807_v2 }
0x1688   :  { %5731 = vmatmul.mubr.msk.f32.vlgmr.msra.gmra.mrb[24].mxu0 %vm576_vm2, %v2806_v32  ;;  %v7639_v32 = vld [vmem:[%s8038_s12 + $0x10] sm:$0xff]  }
0x1689   :  { %5779 = vmatprep.mubr.msk.f32.mxu0 %vm6808_vm0, %v6809_v5  ;;  %6330 = vmatpush3.bf16.msra.mxu0 %v7625_v56 }
0x168a   :  { %6331 = vmatprep.subr.bf16.mxu0 %v6807_v2 }
0x168d   :  { %6333 = vmatpush3.bf16.msra.mxu0 %v7632_v60 }
0x168e   :  { %6334 = vmatprep.subr.bf16.mxu0 %v6807_v2 }
0x1691   :  { %6336 = vmatpush3.bf16.msra.mxu0 %v7639_v32 }
0x1692   :  { %6337 = vmatprep.subr.bf16.mxu0 %v6807_v2 }
0x174b   :  { %v2662_v35 = vpop.f32.mrb[22].mxu0 }
0x174c   :  { %v2663_v61 = vadd.f32 %v2662_v35, %v7178_v52  ;;  %v5702_v62 = vpop.f32.mrb[23].mxu0  ;;  %v7647_v35 = vld [vmem:[%s8038_s12 + $0x18] sm:$0xff]  }
0x174d   :  { %6339 = vmatpush3.bf16.msra.mxu0 %v7647_v35 }
0x174e   :  { %6652 = vtanh.f32 %v2663_v61  ;;  %v4646_v1 = vmul.f32 -1.442695, %v2663_v61  ;;  %6352 = vmatprep.subr.bf16.mxu0 %v6807_v2 }
0x1758   :  { %v6653_v39 = vpop.eup %6652 }
0x1759   :  { %2675 = vrot.lane.b32.xlu1 %v6653_v39, %s6810_s0 }
0x175b   :  { %v2875_v63 = vpop.f32.mrb[24].mxu0 }
0x175c   :  { %v2876_v0 = vadd.f32 %v7454_v30, %v2875_v63  ;;  %v5732_v46 = vpop.f32.mrb[25].mxu0 }
0x175e   :  { %6654 = vtanh.f32 %v2876_v0  ;;  %v4650_v6 = vmul.f32 -1.442695, %v2876_v0 }
0x175f   :  { %6656 = vpow2.f32 %v4646_v1 }
0x1760   :  { %6658 = vpow2.f32 %v4650_v6 }
0x1768   :  { %v6655_v36 = vpop.eup %6654 }
0x1769   :  { %2888 = vrot.lane.b32.xlu0 %v6655_v36, %s6810_s0  ;;  %v6657_v4 = vpop.eup %6656 }
0x176a   :  { %v2669_v45 = vadd.f32 1.0, %v6657_v4  ;;  %v6659_v8 = vpop.eup %6658 }
0x176b   :  { %v2882_v58 = vadd.f32 1.0, %v6659_v8 }
0x176c   :  { %6660 = vrcp.f32 %v2669_v45 }
0x176d   :  { %6662 = vrcp.f32 %v2882_v58 }
0x1776   :  { %v6661_v9 = vpop.eup %6660 }
0x1777   :  { %v6663_v30 = vpop.eup %6662  ;;  %v2673_v16 = vmul.f32 %v6661_v9, %v7532_v31  ;;  %v7592_v31 = vld [vmem:[%s8035_s9] sm:$0xff]  }
0x1778   :  { %v2886_v21 = vmul.f32 %v6663_v30, %v7537_v3 }
0x17cb   :  { %v2676_v10 = vpop.permute.xlu1 %2675 }
0x17cc   :  { %v2678_v11 = vmul.f32 %v6661_v9, %v2676_v10 }
0x17ce   :  { %2680 = vrot.lane.b32.xlu1 %v2678_v11, %s6811_s6 }
0x17db   :  { %v2889_v13 = vpop.permute.xlu0 %2888 }
0x17dc   :  { %v2891_v14 = vmul.f32 %v6663_v30, %v2889_v13 }
0x17de   :  { %2893 = vrot.lane.b32.xlu0 %v2891_v14, %s6811_s6 }
0x1840   :  { %v2681_v38 = vpop.permute.xlu1 %2680 }
0x1841   :  { %v7576_v20 = vadd.f32 %v2681_v38, %v2673_v16 }
0x1843   :  { %6664 = vtanh.f32 %v7576_v20 }
0x184d   :  { %v6665_v25 = vpop.eup %6664 }
0x184e   :  { %2686 = vrot.lane.b32.xlu1 %v6665_v25, %s6810_s0 }
0x1850   :  { %v2894_v17 = vpop.permute.xlu0 %2893 }
0x1851   :  { %v7581_v18 = vadd.f32 %v2894_v17, %v2886_v21 }
0x1853   :  { %6666 = vtanh.f32 %v7581_v18 }
0x185d   :  { %v6667_v19 = vpop.eup %6666 }
0x185e   :  { %2899 = vrot.lane.b32.xlu0 %v6667_v19, %s6810_s0 }
0x18c0   :  { %v2687_v22 = vpop.permute.xlu1 %2686 }
0x18c1   :  { %v2689_v28 = vmul.f32 %v6661_v9, %v2687_v22 }
0x18c3   :  { %2908 = vrot.lane.b32.xlu0 %v2689_v28, %s6810_s0 }
0x18d0   :  { %v2900_v24 = vpop.permute.xlu0 %2899 }
0x18d1   :  { %v2902_v41 = vmul.f32 %v6663_v30, %v2900_v24  ;;  %v7671_v30 = vld [vmem:[%s8039_s13] sm:$0x3] }
0x18d3   :  { %2904 = vrot.lane.b32.xlu1 %v2902_v41, %s6811_s6 }
0x18d7   :  { %3010 = vrot.lane.b32.xlu1 %v3009_v47, %s6811_s6  ;;  %v7683_v47 = vld [vmem:[%s8038_s12 + $0x20] sm:$0xff]  }
0x1935   :  { %v2909_v27 = vpop.permute.xlu0 %2908 }
0x1945   :  { %v2905_v15 = vpop.permute.xlu1 %2904 }
0x1946   :  { %v2911_v37 = vsel %vm472_vm1, %v2905_v15, %v2909_v27  ;;  %v7690_v27 = vld [vmem:[%s8038_s12 + $0x28] sm:$0xff]  }
0x1947   :  { %5750 = vmatmul.mubr.msk.f32.vlgmr.msra.gmra.mrb[26].mxu1 %vm576_vm2, %v2911_v37 }
0x1948   :  { %6324 = vmatpush3.bf16.msra.mxu1 %v7592_v31  ;;  %5760 = vmatprep.mubr.msk.f32.mxu1 %vm6808_vm0, %v6809_v5 }
0x1949   :  { %6325 = vmatprep.subr.bf16.mxu1 %v6807_v2  ;;  %v3011_v43 = vpop.permute.xlu1 %3010 }
0x194c   :  { %6327 = vmatpush3.bf16.msra.mxu1 %v7603_v40 }
0x194d   :  { %6340 = vmatprep.subr.bf16.mxu1 %v6807_v2 }
0x194f   :  { %5761 = vmatmul.mubr.msk.f32.vlgmr.msra.gmra.mrb[0].mxu1 %vm472_vm1, %v3011_v43  ;;  %v7705_v43 = vld [vmem:[%s8038_s12 + $0x38] sm:$0xff]  }
0x1950   :  { %5798 = vmatprep.mubr.msk.f32.mxu1 %vm6808_vm0, %v6809_v5  ;;  %6342 = vmatpush3.bf16.msra.mxu1 %v7683_v47 }
0x1951   :  { %6343 = vmatprep.subr.bf16.mxu1 %v6807_v2 }
0x1954   :  { %6345 = vmatpush3.bf16.msra.mxu1 %v7690_v27 }
0x1955   :  { %6346 = vmatprep.subr.bf16.mxu1 %v6807_v2 }
0x1a1a   :  { %v2981_v3 = vpop.f32.mrb[26].mxu1 }
0x1a1b   :  { %v5751_v26 = vpop.f32.mrb[27].mxu1  ;;  %v2982_v61 = vadd.f32 %v2981_v3, %v7178_v52 }
0x1a1d   :  { %v4652_v0 = vmul.f32 -1.442695, %v2982_v61 }
0x1a22   :  { %v3080_v49 = vpop.f32.mrb[0].mxu1 }
0x1a23   :  { %v6475_v29 = vadd.f32 %v3080_v49, %v7613_v48  ;;  %v5762_v50 = vpop.f32.mrb[1].mxu1 }
0x1a25   :  { %6668 = vtanh.f32 %v6475_v29  ;;  %v4654_v51 = vmul.f32 -1.442695, %v6475_v29 }
0x1a27   :  { %6670 = vpow2.f32 %v4654_v51  ;;  %v7727_v51 = vrot.slane %v7671_v30, 1 }
0x1a2f   :  { %v6669_v23 = vpop.eup %6668 }
0x1a30   :  { %3097 = vrot.lane.b32.xlu0 %v6669_v23, %s6810_s0 }
0x1a31   :  { %v6671_v53 = vpop.eup %6670 }
0x1a32   :  { %v3088_v33 = vadd.f32 1.0, %v6671_v53 }
0x1a34   :  { %6672 = vrcp.f32 %v3088_v33 }
0x1a3e   :  { %v6673_v54 = vpop.eup %6672 }
0x1a3f   :  { %v3095_v42 = vmul.f32 %v6673_v54, %v3093_v55 }
0x1aa2   :  { %v3098_v12 = vpop.permute.xlu0 %3097 }
0x1aa3   :  { %v3100_v34 = vmul.f32 %v6673_v54, %v3098_v12 }
0x1aa5   :  { %3102 = vrot.lane.b32.xlu1 %v3100_v34, %s6811_s6 }
0x1b17   :  { %v3103_v44 = vpop.permute.xlu1 %3102 }
0x1b18   :  { %v7619_v59 = vadd.f32 %v3103_v44, %v3095_v42 }
0x1b1a   :  { %6674 = vtanh.f32 %v7619_v59 }
0x1b1b   :  { %6676 = vtanh.f32 %v2982_v61 }
0x1b1c   :  { %6678 = vpow2.f32 %v4652_v0  ;;  %v467_v0 = vld [vmem:[%s8040_s14] sm:$0xff] }
0x1b24   :  { %v6675_v7 = vpop.eup %6674 }
0x1b25   :  { %3108 = vrot.lane.b32.xlu0 %v6675_v7, %s6810_s0  ;;  %v6677_v63 = vpop.eup %6676 }
0x1b26   :  { %v6679_v46 = vpop.eup %6678 }
0x1b27   :  { %v2988_v36 = vadd.f32 1.0, %v6679_v46  ;;  %v468_v46 = vld [vmem:[%s8040_s14 + $0x8] sm:$0xff] }
0x1b29   :  { %3116 = vrot.lane.b32.xlu0 %v2902_v41, %s6810_s0  ;;  %6680 = vrcp.f32 %v2988_v36  ;;  %v469_v36 = vld [vmem:[%s8040_s14 + $0x10] sm:$0xff] }
0x1b33   :  { %v6681_v52 = vpop.eup %6680 }
0x1b34   :  { %v2992_v9 = vmul.f32 %v6681_v52, %v7576_v20 }
0x1b97   :  { %v3109_v62 = vpop.permute.xlu0 %3108 }
0x1b98   :  { %v3111_v39 = vmul.f32 %v6673_v54, %v3109_v62 }
0x1b9a   :  { %3113 = vrot.lane.b32.xlu1 %v3111_v39, %s6811_s6 }
0x1b9b   :  { %v3117_v1 = vpop.permute.xlu0 %3116 }
0x1b9e   :  { %2994 = vrot.lane.b32.xlu1 %v6677_v63, %s6810_s0 }
0x1c0c   :  { %v7655_v4 = vpop.permute.xlu1 %3113 }
0x1c0d   :  { %v3119_v6 = vsel %vm472_vm1, %v7655_v4, %v3117_v1  ;;  %v7745_v1 = vpack.c.bf16 %v468_v46, %v467_v0 }
0x1c0e   :  { %5780 = vmatmul.mubr.msk.f32.vlgmr.msra.gmra.mrb[26].mxu0 %vm576_vm2, %v3119_v6  ;;  %v470_v6 = vld [vmem:[%s8040_s14 + $0x18] sm:$0xff] }
0x1c0f   :  { %5809 = vmatprep.mubr.msk.f32.mxu0 %vm6808_vm0, %v6809_v5  ;;  %6354 = vmatpush3.bf16.msra.mxu0 %v7745_v1 }
0x1c10   :  { %v2995_v45 = vpop.permute.xlu1 %2994  ;;  %6355 = vmatprep.subr.bf16.mxu0 %v6807_v2 }
0x1c11   :  { %v2997_v8 = vmul.f32 %v6681_v52, %v2995_v45 }
0x1c13   :  { %2999 = vrot.lane.b32.xlu1 %v2997_v8, %s6811_s6 }
0x1c85   :  { %v3000_v10 = vpop.permute.xlu1 %2999 }
0x1c86   :  { %v7664_v11 = vadd.f32 %v3000_v10, %v2992_v9 }
0x1c88   :  { %6682 = vtanh.f32 %v7664_v11 }
0x1c92   :  { %v6683_v58 = vpop.eup %6682 }
0x1c93   :  { %3005 = vrot.lane.b32.xlu1 %v6683_v58, %s6810_s0  ;;  %v425_v58 = vld [vmem:[%s8035_s9 + $0x18] sm:$0xf] }
0x1ce1   :  { %v3189_v13 = vpop.f32.mrb[26].mxu0 }
0x1ce2   :  { %v3190_v14 = vadd.f32 %v3189_v13, %v7671_v30  ;;  %v5781_v16 = vpop.f32.mrb[27].mxu0  ;;  %v7778_v13 = vunpack.c.l.bf16 %v425_v58 }
0x1ce4   :  { %6684 = vtanh.f32 %v3190_v14  ;;  %v4656_v20 = vmul.f32 -1.442695, %v3190_v14  ;;  %v7785_v14 = vld [vmem:[%s8041_s15] sm:$0x1] }
0x1ce6   :  { %6686 = vpow2.f32 %v4656_v20 }
0x1cee   :  { %v6685_v38 = vpop.eup %6684 }
0x1cef   :  { %3202 = vrot.lane.b32.xlu0 %v6685_v38, %s6810_s0 }
0x1cf0   :  { %v6687_v25 = vpop.eup %6686 }
0x1cf1   :  { %v3196_v21 = vadd.f32 1.0, %v6687_v25 }
0x1cf3   :  { %6688 = vrcp.f32 %v3196_v21 }
0x1cfd   :  { %v6689_v17 = vpop.eup %6688 }
0x1cfe   :  { %v3200_v28 = vmul.f32 %v6689_v17, %v7581_v18  ;;  %v7697_v18 = vld [vmem:[%s8038_s12 + $0x30] sm:$0xff]  }
0x1cff   :  { %6348 = vmatpush3.bf16.msra.mxu1 %v7697_v18 }
0x1d00   :  { %6349 = vmatprep.subr.bf16.mxu1 %v6807_v2 }
0x1d03   :  { %6351 = vmatpush3.bf16.msra.mxu1 %v7705_v43 }
0x1d04   :  { %6367 = vmatprep.subr.bf16.mxu1 %v6807_v2 }
0x1d05   :  { %v3006_v37 = vpop.permute.xlu1 %3005 }
0x1d06   :  { %v3008_v3 = vmul.f32 %v6681_v52, %v3006_v37  ;;  %v7751_v52 = vpack.c.bf16 %v470_v6, %v469_v36 }
0x1d08   :  { %6357 = vmatpush3.bf16.msra.mxu0 %v7751_v52 }
0x1d09   :  { %6358 = vmatprep.subr.bf16.mxu0 %v6807_v2 }
0x1d61   :  { %v3203_v19 = vpop.permute.xlu0 %3202 }
0x1d62   :  { %v3205_v22 = vmul.f32 %v6689_v17, %v3203_v19 }
0x1d64   :  { %3207 = vrot.lane.b32.xlu0 %v3205_v22, %s6811_s6 }
0x1dd6   :  { %v3208_v24 = vpop.permute.xlu0 %3207 }
0x1dd7   :  { %v7677_v41 = vadd.f32 %v3208_v24, %v3200_v28 }
0x1dd9   :  { %6690 = vtanh.f32 %v7677_v41 }
0x1de3   :  { %v6691_v15 = vpop.eup %6690 }
0x1de4   :  { %3213 = vrot.lane.b32.xlu0 %v6691_v15, %s6810_s0 }
0x1de8   :  { %3222 = vrot.lane.b32.xlu0 %v3008_v3, %s6810_s0 }
0x1e56   :  { %v3214_v26 = vpop.permute.xlu0 %3213 }
0x1e57   :  { %v7710_v49 = vmul.f32 %v6689_v17, %v3214_v26 }
0x1e59   :  { %3218 = vrot.lane.b32.xlu1 %v7710_v49, %s6811_s6 }
0x1e5a   :  { %v3223_v29 = vpop.permute.xlu0 %3222 }
0x1ecb   :  { %v3219_v50 = vpop.permute.xlu1 %3218 }
0x1ecc   :  { %v3225_v23 = vsel %vm472_vm1, %v3219_v50, %v3223_v29 }
0x1ecd   :  { %5799 = vmatmul.mubr.msk.f32.vlgmr.msra.gmra.mrb[28].mxu1 %vm576_vm2, %v3225_v23 }
0x1ece   :  { %6369 = vmatpush3.bf16.msra.mxu1 %v7625_v56  ;;  %5845 = vmatprep.mubr.msk.f32.mxu1 %vm6808_vm0, %v6809_v5 }
0x1ecf   :  { %6370 = vmatprep.subr.bf16.mxu1 %v6807_v2 }
0x1ed2   :  { %6372 = vmatpush3.bf16.msra.mxu1 %v7632_v60 }
0x1ed3   :  { %6373 = vmatprep.subr.bf16.mxu1 %v6807_v2 }
0x1ed6   :  { %6375 = vmatpush3.bf16.msra.mxu1 %v7639_v32 }
0x1ed7   :  { %6376 = vmatprep.subr.bf16.mxu1 %v6807_v2 }
0x1eda   :  { %6378 = vmatpush3.bf16.msra.mxu1 %v7647_v35 }
0x1edb   :  { %6391 = vmatprep.subr.bf16.mxu1 %v6807_v2 }
0x1fa0   :  { %v3298_v53 = vpop.f32.mrb[28].mxu1 }
0x1fa1   :  { %v3299_v33 = vadd.f32 %v3298_v53, %v7727_v51  ;;  %v5800_v54 = vpop.f32.mrb[29].mxu1 }
0x1fa3   :  { %6692 = vtanh.f32 %v3299_v33  ;;  %v4658_v34 = vmul.f32 -1.442695, %v3299_v33 }
0x1fa5   :  { %6694 = vpow2.f32 %v4658_v34 }
0x1fad   :  { %v6693_v12 = vpop.eup %6692 }
0x1fae   :  { %3311 = vrot.lane.b32.xlu1 %v6693_v12, %s6810_s0 }
0x1faf   :  { %v6695_v55 = vpop.eup %6694 }
0x1fb0   :  { %v3305_v42 = vadd.f32 1.0, %v6695_v55 }
0x1fb2   :  { %6696 = vrcp.f32 %v3305_v42 }
0x1fbc   :  { %v6697_v44 = vpop.eup %6696 }
0x1fbd   :  { %v3309_v62 = vmul.f32 %v6697_v44, %v7664_v11  ;;  %v7771_v11 = vld [vmem:[%s8035_s9 + $0x10] sm:$0xff]   ;;  %s6812_s9 = smov [#allocation2]  }
0x1fbe   :  { %s4581_s15 = sshll.u32 %s6812_s9, 4  ;;  %s4582_s15 = int_to_ptr.vmem [resolvable:$true] %s4581_s15 }
0x1fbf   :  { %s6783_s10 = scalar_lea.vmem %s4582_s15, 64  ;;  %p6788_p1 = scmp.lt.s32.totalorder %s4582_s15, %s4582_s15 }
0x1fc0   :  { %p6784_p0 = scmp.ne.s32.totalorder %s4582_s15, %s6783_s10  ;;  %p6789_p2 = scmp.lt.s32.totalorder %s6783_s10, %s6783_s10 }
0x1fc2   :  { %p6790_p3 = por %p6789_p2, %p6788_p1 }
0x1fc4   :  { %p6791_p4 = pnand %p6790_p3, %p6784_p0 }
0x2020   :  { %v3312_v7 = vpop.permute.xlu1 %3311 }
0x2021   :  { %v3314_v61 = vmul.f32 %v6697_v44, %v3312_v7 }
0x2023   :  { %3316 = vrot.lane.b32.xlu0 %v3314_v61, %s6811_s6 }
0x2095   :  { %v3317_v39 = vpop.permute.xlu0 %3316 }
0x2096   :  { %v7733_v63 = vadd.f32 %v3317_v39, %v3309_v62 }
0x2098   :  { %6698 = vtanh.f32 %v7733_v63 }
0x20a2   :  { %v6699_v45 = vpop.eup %6698 }
0x20a3   :  { %3322 = vrot.lane.b32.xlu1 %v6699_v45, %s6810_s0 }
0x2115   :  { %v3323_v8 = vpop.permute.xlu1 %3322 }
0x2116   :  { %v7757_v9 = vmul.f32 %v6697_v44, %v3323_v8 }
0x2118   :  { %3327 = vrot.lane.b32.xlu0 %v7757_v9, %s6811_s6 }
0x218a   :  { %v3328_v10 = vpop.permute.xlu0 %3327 }
0x218b   :  { %5810 = vmatmul.mubr.msk.f32.vlgmr.msra.gmra.mrb[28].mxu0 %vm472_vm1, %v3328_v10 }
0x218c   :  { %6360 = vmatpush3.bf16.msra.mxu0 %v7592_v31  ;;  %5826 = vmatprep.mubr.msk.f32.mxu0 %vm6808_vm0, %v6809_v5 }
0x218d   :  { %6361 = vmatprep.subr.bf16.mxu0 %v6807_v2 }
0x2190   :  { %6363 = vmatpush3.bf16.msra.mxu0 %v7603_v40 }
0x2191   :  { %6364 = vmatprep.subr.bf16.mxu0 %v6807_v2 }
0x2194   :  { %6366 = vmatpush3.bf16.msra.mxu0 %v7771_v11 }
0x2195   :  { %5824 = vmatprep.subr.mxu0 %v6809_v5 }
0x2198   :  { %5825 = vmatpush3.msra.mxu0 %v7778_v13 }
0x2199   :  { %6379 = vmatprep.subr.bf16.mxu0 %v6807_v2 }
0x225e   :  { %v3397_v16 = vpop.f32.mrb[28].mxu0 }
0x225f   :  { %v3398_v38 = vadd.f32 %v3397_v16, %v7785_v14  ;;  %v5811_v20 = vpop.f32.mrb[29].mxu0 }
0x2261   :  { %3402 = vst.msk [vmem:[#allocation2] sm:$0x1] %vm3401_vm3, %v3398_v38  ;;  %3404 = vrot.lane.b32.xlu1 %v3398_v38, %s6811_s6 }
0x22d3   :  { %v3405_v25 = vpop.permute.xlu1 %3404 }
0x22d4   :  { %v3407_v21 = vsel %vm472_vm1, %v7655_v4, %v3405_v25  ;;  %v302_v4 = vlaneseq }
0x22d5   :  { %5827 = vmatmul.mubr.msk.f32.vlgmr.msra.gmra.mrb[30].mxu0 %vm3411_vm4, %v3407_v21 }
0x22d6   :  { %6381 = vmatpush3.bf16.msra.mxu0 %v7683_v47  ;;  %5864 = vmatprep.mubr.msk.f32.mxu0 %vm6808_vm0, %v6809_v5  ;;  %v303_v17 = vshrl.u32 %v302_v4, 7 }
0x22d7   :  { %6382 = vmatprep.subr.bf16.mxu0 %v6807_v2 }
0x22d8   :  { %v304_v19 = vsub.s32 0, %v303_v17 }
0x22da   :  { %6384 = vmatpush3.bf16.msra.mxu0 %v7690_v27  ;;  %v305_v22 = vrot.slane %v7613_v48, %v304_v19 }
0x22db   :  { %6385 = vmatprep.subr.bf16.mxu0 %v6807_v2 }
0x22dc   :  { %v7805_v28 = vadd.f32 %v7079_v57, %v305_v22 }
0x22de   :  { %6387 = vmatpush3.bf16.msra.mxu0 %v7697_v18  ;;  %v3409_v24 = vrot.slane %v7805_v28, 1 }
0x22df   :  { %6388 = vmatprep.subr.bf16.mxu0 %v6807_v2 }
0x22e2   :  { %6390 = vmatpush3.bf16.msra.mxu0 %v7705_v43 }
0x22e3   :  { %6406 = vmatprep.subr.bf16.mxu0 %v6807_v2 }
0x23a8   :  { %v3481_v15 = vpop.f32.mrb[30].mxu0 }
0x23a9   :  { %v3482_v37 = vadd.f32 %v3481_v15, %v3409_v24  ;;  %v5828_v3 = vpop.f32.mrb[31].mxu0 }
0x23ab   :  { %6700 = vtanh.f32 %v3482_v37  ;;  %v4661_v29 = vmul.f32 -1.442695, %v3482_v37 }
0x23ad   :  { %6702 = vpow2.f32 %v4661_v29 }
0x23b5   :  { %v6701_v26 = vpop.eup %6700 }
0x23b6   :  { %3494 = vrot.lane.b32.xlu0 %v6701_v26, %s6810_s0 }
0x23b7   :  { %v6703_v50 = vpop.eup %6702 }
0x23b8   :  { %v3488_v23 = vadd.f32 1.0, %v6703_v50 }
0x23ba   :  { %6704 = vrcp.f32 %v3488_v23 }
0x23c4   :  { %v6705_v53 = vpop.eup %6704 }
0x23c5   :  { %v3492_v57 = vmul.f32 %v6705_v53, %v7619_v59 }
0x2428   :  { %v3495_v33 = vpop.permute.xlu0 %3494 }
0x2429   :  { %v3497_v48 = vmul.f32 %v6705_v53, %v3495_v33 }
0x242b   :  { %3499 = vrot.lane.b32.xlu1 %v3497_v48, %s6811_s6 }
0x249d   :  { %v3500_v54 = vpop.permute.xlu1 %3499 }
0x249e   :  { %v7811_v12 = vadd.f32 %v3500_v54, %v3492_v57 }
0x24a0   :  { %6706 = vtanh.f32 %v7811_v12 }
0x24aa   :  { %v6707_v34 = vpop.eup %6706 }
0x24ab   :  { %3505 = vrot.lane.b32.xlu0 %v6707_v34, %s6810_s0 }
0x24af   :  { %3513 = vrot.lane.b32.xlu0 %v7710_v49, %s6810_s0 }
0x251d   :  { %v3506_v55 = vpop.permute.xlu0 %3505 }
0x251e   :  { %v3508_v42 = vmul.f32 %v6705_v53, %v3506_v55 }
0x2520   :  { %3510 = vrot.lane.b32.xlu1 %v3508_v42, %s6811_s6 }
0x2521   :  { %v3514_v44 = vpop.permute.xlu0 %3513 }
0x2592   :  { %v7818_v7 = vpop.permute.xlu1 %3510 }
0x2593   :  { %v3516_v59 = vsel %vm472_vm1, %v7818_v7, %v3514_v44 }
0x2594   :  { %5846 = vmatmul.mubr.msk.f32.vlgmr.msra.gmra.mrb[30].mxu1 %vm576_vm2, %v3516_v59 }
0x2595   :  { %6393 = vmatpush3.bf16.msra.mxu1 %v7745_v1  ;;  %5875 = vmatprep.mubr.msk.f32.mxu1 %vm6808_vm0, %v6809_v5 }
0x2596   :  { %6394 = vmatprep.subr.bf16.mxu1 %v6807_v2 }
0x2599   :  { %6396 = vmatpush3.bf16.msra.mxu1 %v7751_v52 }
0x259a   :  { %6397 = vmatprep.subr.bf16.mxu1 %v6807_v2 }
0x2667   :  { %v3586_v49 = vpop.f32.mrb[30].mxu1 }
0x2668   :  { %v3587_v61 = vadd.f32 %v3586_v49, %v7671_v30  ;;  %v5847_v62 = vpop.f32.mrb[31].mxu1 }
0x266a   :  { %6708 = vtanh.f32 %v3587_v61  ;;  %v4663_v0 = vmul.f32 -1.442695, %v3587_v61 }
0x266c   :  { %6710 = vpow2.f32 %v4663_v0 }
0x2674   :  { %v6709_v39 = vpop.eup %6708 }
0x2675   :  { %3599 = vrot.lane.b32.xlu1 %v6709_v39, %s6810_s0 }
0x2676   :  { %v6711_v46 = vpop.eup %6710 }
0x2677   :  { %v3593_v36 = vadd.f32 1.0, %v6711_v46 }
0x2679   :  { %6712 = vrcp.f32 %v3593_v36 }
0x2683   :  { %v6713_v6 = vpop.eup %6712 }
0x2684   :  { %v3597_v10 = vmul.f32 %v6713_v6, %v7677_v41 }
0x26e7   :  { %v3600_v45 = vpop.permute.xlu1 %3599 }
0x26e8   :  { %v3602_v8 = vmul.f32 %v6713_v6, %v3600_v45 }
0x26ea   :  { %3604 = vrot.lane.b32.xlu0 %v3602_v8, %s6811_s6 }
0x275c   :  { %v3605_v58 = vpop.permute.xlu0 %3604 }
0x275d   :  { %v7833_v16 = vadd.f32 %v3605_v58, %v3597_v10 }
0x275f   :  { %6714 = vtanh.f32 %v7833_v16 }
0x2769   :  { %v6715_v38 = vpop.eup %6714 }
0x276a   :  { %3610 = vrot.lane.b32.xlu1 %v6715_v38, %s6810_s0 }
0x276e   :  { %3618 = vrot.lane.b32.xlu1 %v7757_v9, %s6810_s0 }
0x27dc   :  { %v3611_v20 = vpop.permute.xlu1 %3610 }
0x27dd   :  { %v7839_v25 = vmul.f32 %v6713_v6, %v3611_v20 }
0x27df   :  { %3615 = vrot.lane.b32.xlu0 %v7839_v25, %s6811_s6 }
0x27e0   :  { %v3619_v21 = vpop.permute.xlu1 %3618 }
0x2851   :  { %v3616_v4 = vpop.permute.xlu0 %3615 }
0x2852   :  { %v3621_v41 = vsel %vm472_vm1, %v3616_v4, %v3619_v21 }
0x2853   :  { %5865 = vmatmul.mubr.msk.f32.vlgmr.msra.gmra.mrb[32].mxu0 %vm576_vm2, %v3621_v41 }
0x2854   :  { %6408 = vmatpush3.bf16.msra.mxu0 %v7625_v56  ;;  %5911 = vmatprep.mubr.msk.f32.mxu0 %vm6808_vm0, %v6809_v5 }
0x2855   :  { %6409 = vmatprep.subr.bf16.mxu0 %v6807_v2 }
0x2858   :  { %6411 = vmatpush3.bf16.msra.mxu0 %v7632_v60 }
0x2859   :  { %6412 = vmatprep.subr.bf16.mxu0 %v6807_v2 }
0x285c   :  { %6414 = vmatpush3.bf16.msra.mxu0 %v7639_v32 }
0x285d   :  { %6415 = vmatprep.subr.bf16.mxu0 %v6807_v2 }
0x2860   :  { %6417 = vmatpush3.bf16.msra.mxu0 %v7647_v35 }
0x2861   :  { %6430 = vmatprep.subr.bf16.mxu0 %v6807_v2 }
0x2926   :  { %v3691_v9 = vpop.f32.mrb[32].mxu0 }
0x2927   :  { %v3692_v17 = vadd.f32 %v3691_v9, %v7727_v51  ;;  %v5866_v19 = vpop.f32.mrb[33].mxu0 }
0x2929   :  { %6716 = vtanh.f32 %v3692_v17  ;;  %v4665_v24 = vmul.f32 -1.442695, %v3692_v17 }
0x292b   :  { %6718 = vpow2.f32 %v4665_v24 }
0x2933   :  { %v6717_v22 = vpop.eup %6716 }
0x2934   :  { %3704 = vrot.lane.b32.xlu0 %v6717_v22, %s6810_s0 }
0x2935   :  { %v6719_v15 = vpop.eup %6718 }
0x2936   :  { %v3698_v37 = vadd.f32 1.0, %v6719_v15 }
0x2938   :  { %6720 = vrcp.f32 %v3698_v37 }
0x2942   :  { %v6721_v3 = vpop.eup %6720 }
0x2943   :  { %v3702_v50 = vmul.f32 %v6721_v3, %v7733_v63 }
0x29a6   :  { %v3705_v26 = vpop.permute.xlu0 %3704 }
0x29a7   :  { %v3707_v29 = vmul.f32 %v6721_v3, %v3705_v26 }
0x29a9   :  { %3709 = vrot.lane.b32.xlu1 %v3707_v29, %s6811_s6 }
0x2a1b   :  { %v3710_v23 = vpop.permute.xlu1 %3709 }
0x2a1c   :  { %v7859_v53 = vadd.f32 %v3710_v23, %v3702_v50 }
0x2a1e   :  { %6722 = vtanh.f32 %v7859_v53 }
0x2a28   :  { %v6723_v33 = vpop.eup %6722 }
0x2a29   :  { %3715 = vrot.lane.b32.xlu0 %v6723_v33, %s6810_s0 }
0x2a9b   :  { %v3716_v48 = vpop.permute.xlu0 %3715 }
0x2a9c   :  { %v7863_v57 = vmul.f32 %v6721_v3, %v3716_v48 }
0x2a9e   :  { %3720 = vrot.lane.b32.xlu1 %v7863_v57, %s6811_s6 }
0x2b10   :  { %v3721_v54 = vpop.permute.xlu1 %3720 }
0x2b11   :  { %5876 = vmatmul.mubr.msk.f32.vlgmr.msra.gmra.mrb[32].mxu1 %vm472_vm1, %v3721_v54 }
0x2b12   :  { %6399 = vmatpush3.bf16.msra.mxu1 %v7592_v31  ;;  %5892 = vmatprep.mubr.msk.f32.mxu1 %vm6808_vm0, %v6809_v5 }
0x2b13   :  { %6400 = vmatprep.subr.bf16.mxu1 %v6807_v2 }
0x2b16   :  { %6402 = vmatpush3.bf16.msra.mxu1 %v7603_v40 }
0x2b17   :  { %6403 = vmatprep.subr.bf16.mxu1 %v6807_v2 }
0x2b1a   :  { %6405 = vmatpush3.bf16.msra.mxu1 %v7771_v11 }
0x2b1b   :  { %5890 = vmatprep.subr.mxu1 %v6809_v5 }
0x2b1e   :  { %5891 = vmatpush3.msra.mxu1 %v7778_v13 }
0x2b1f   :  { %6418 = vmatprep.subr.bf16.mxu1 %v6807_v2 }
0x2be4   :  { %v3790_v63 = vpop.f32.mrb[32].mxu1 }
0x2be5   :  { %v3791_v34 = vadd.f32 %v3790_v63, %v7785_v14  ;;  %v5877_v55 = vpop.f32.mrb[33].mxu1 }
0x2be7   :  { %3794 = vst.msk [vmem:[#allocation2 + $0x1] sm:$0x1] %vm3401_vm3, %v3791_v34  ;;  %3796 = vrot.lane.b32.xlu0 %v3791_v34, %s6811_s6 }
0x2c59   :  { %v3797_v42 = vpop.permute.xlu0 %3796 }
0x2c5a   :  { %v3799_v44 = vsel %vm472_vm1, %v7818_v7, %v3797_v42  ;;  %v3800_v7 = vrot.slane %v7805_v28, 2 }
0x2c5b   :  { %5893 = vmatmul.mubr.msk.f32.vlgmr.msra.gmra.mrb[34].mxu1 %vm3411_vm4, %v3799_v44 }
0x2c5c   :  { %6420 = vmatpush3.bf16.msra.mxu1 %v7683_v47  ;;  %5930 = vmatprep.mubr.msk.f32.mxu1 %vm6808_vm0, %v6809_v5 }
0x2c5d   :  { %6421 = vmatprep.subr.bf16.mxu1 %v6807_v2 }
0x2c60   :  { %6423 = vmatpush3.bf16.msra.mxu1 %v7690_v27 }
0x2c61   :  { %6424 = vmatprep.subr.bf16.mxu1 %v6807_v2 }
0x2c64   :  { %6426 = vmatpush3.bf16.msra.mxu1 %v7697_v18 }
0x2c65   :  { %6427 = vmatprep.subr.bf16.mxu1 %v6807_v2 }
0x2c68   :  { %6429 = vmatpush3.bf16.msra.mxu1 %v7705_v43 }
0x2c69   :  { %6445 = vmatprep.subr.bf16.mxu1 %v6807_v2 }
0x2d2e   :  { %v3871_v59 = vpop.f32.mrb[34].mxu1 }
0x2d2f   :  { %v3872_v49 = vadd.f32 %v3871_v59, %v3800_v7  ;;  %v5894_v61 = vpop.f32.mrb[35].mxu1 }
0x2d31   :  { %6724 = vtanh.f32 %v3872_v49  ;;  %v4668_v39 = vmul.f32 -1.442695, %v3872_v49 }
0x2d33   :  { %6726 = vpow2.f32 %v4668_v39 }
0x2d3b   :  { %v6725_v62 = vpop.eup %6724 }
0x2d3c   :  { %3884 = vrot.lane.b32.xlu1 %v6725_v62, %s6810_s0 }
0x2d3d   :  { %v6727_v0 = vpop.eup %6726 }
0x2d3e   :  { %v3878_v46 = vadd.f32 1.0, %v6727_v0 }
0x2d40   :  { %6728 = vrcp.f32 %v3878_v46 }
0x2d4a   :  { %v6729_v36 = vpop.eup %6728 }
0x2d4b   :  { %v3882_v8 = vmul.f32 %v6729_v36, %v7811_v12 }
0x2dae   :  { %v3885_v6 = vpop.permute.xlu1 %3884 }
0x2daf   :  { %v3887_v45 = vmul.f32 %v6729_v36, %v3885_v6 }
0x2db1   :  { %3889 = vrot.lane.b32.xlu0 %v3887_v45, %s6811_s6 }
0x2e23   :  { %v3890_v10 = vpop.permute.xlu0 %3889 }
0x2e24   :  { %v7898_v58 = vadd.f32 %v3890_v10, %v3882_v8 }
0x2e26   :  { %6730 = vtanh.f32 %v7898_v58 }
0x2e30   :  { %v6731_v38 = vpop.eup %6730 }
0x2e31   :  { %3895 = vrot.lane.b32.xlu1 %v6731_v38, %s6810_s0 }
0x2e35   :  { %3903 = vrot.lane.b32.xlu1 %v7839_v25, %s6810_s0 }
0x2ea3   :  { %v3896_v20 = vpop.permute.xlu1 %3895 }
0x2ea4   :  { %v3898_v21 = vmul.f32 %v6729_v36, %v3896_v20 }
0x2ea6   :  { %3900 = vrot.lane.b32.xlu0 %v3898_v21, %s6811_s6 }
0x2ea7   :  { %v3904_v4 = vpop.permute.xlu1 %3903 }
0x2f18   :  { %v7905_v41 = vpop.permute.xlu0 %3900 }
0x2f19   :  { %v3906_v12 = vsel %vm472_vm1, %v7905_v41, %v3904_v4 }
0x2f1a   :  { %5912 = vmatmul.mubr.msk.f32.vlgmr.msra.gmra.mrb[34].mxu0 %vm576_vm2, %v3906_v12 }
0x2f1b   :  { %6432 = vmatpush3.bf16.msra.mxu0 %v7745_v1  ;;  %5941 = vmatprep.mubr.msk.f32.mxu0 %vm6808_vm0, %v6809_v5 }
0x2f1c   :  { %6433 = vmatprep.subr.bf16.mxu0 %v6807_v2 }
0x2f1f   :  { %6435 = vmatpush3.bf16.msra.mxu0 %v7751_v52 }
0x2f20   :  { %6436 = vmatprep.subr.bf16.mxu0 %v6807_v2 }
0x2fed   :  { %v3976_v25 = vpop.f32.mrb[34].mxu0 }
0x2fee   :  { %v3977_v9 = vadd.f32 %v3976_v25, %v7671_v30  ;;  %v5913_v17 = vpop.f32.mrb[35].mxu0 }
0x2ff0   :  { %6732 = vtanh.f32 %v3977_v9  ;;  %v4670_v22 = vmul.f32 -1.442695, %v3977_v9 }
0x2ff2   :  { %6734 = vpow2.f32 %v4670_v22 }
0x2ffa   :  { %v6733_v19 = vpop.eup %6732 }
0x2ffb   :  { %3989 = vrot.lane.b32.xlu0 %v6733_v19, %s6810_s0 }
0x2ffc   :  { %v6735_v24 = vpop.eup %6734 }
0x2ffd   :  { %v3983_v15 = vadd.f32 1.0, %v6735_v24 }
0x2fff   :  { %6736 = vrcp.f32 %v3983_v15 }
0x3009   :  { %v6737_v37 = vpop.eup %6736 }
0x300a   :  { %v3987_v29 = vmul.f32 %v6737_v37, %v7833_v16 }
0x306d   :  { %v3990_v3 = vpop.permute.xlu0 %3989 }
0x306e   :  { %v3992_v26 = vmul.f32 %v6737_v37, %v3990_v3 }
0x3070   :  { %3994 = vrot.lane.b32.xlu1 %v3992_v26, %s6811_s6 }
0x30e2   :  { %v3995_v50 = vpop.permute.xlu1 %3994 }
0x30e3   :  { %v7920_v23 = vadd.f32 %v3995_v50, %v3987_v29 }
0x30e5   :  { %6738 = vtanh.f32 %v7920_v23 }
0x30ef   :  { %v6739_v33 = vpop.eup %6738 }
0x30f0   :  { %4000 = vrot.lane.b32.xlu0 %v6739_v33, %s6810_s0 }
0x30f4   :  { %4008 = vrot.lane.b32.xlu0 %v7863_v57, %s6810_s0 }
0x3162   :  { %v4001_v48 = vpop.permute.xlu0 %4000 }
0x3163   :  { %v7926_v54 = vmul.f32 %v6737_v37, %v4001_v48 }
0x3165   :  { %4005 = vrot.lane.b32.xlu1 %v7926_v54, %s6811_s6 }
0x3166   :  { %v4009_v63 = vpop.permute.xlu0 %4008 }
0x31d7   :  { %v4006_v34 = vpop.permute.xlu1 %4005 }
0x31d8   :  { %v4011_v16 = vsel %vm472_vm1, %v4006_v34, %v4009_v63 }
0x31d9   :  { %5931 = vmatmul.mubr.msk.f32.vlgmr.msra.gmra.mrb[36].mxu1 %vm576_vm2, %v4011_v16 }
0x31da   :  { %6447 = vmatpush3.bf16.msra.mxu1 %v7625_v56  ;;  %5977 = vmatprep.mubr.msk.f32.mxu1 %vm6808_vm0, %v6809_v5 }
0x31db   :  { %6448 = vmatprep.subr.bf16.mxu1 %v6807_v2 }
0x31de   :  { %6450 = vmatpush3.bf16.msra.mxu1 %v7632_v60 }
0x31df   :  { %6451 = vmatprep.subr.bf16.mxu1 %v6807_v2 }
0x31e2   :  { %6453 = vmatpush3.bf16.msra.mxu1 %v7639_v32 }
0x31e3   :  { %6454 = vmatprep.subr.bf16.mxu1 %v6807_v2 }
0x31e6   :  { %6456 = vmatpush3.bf16.msra.mxu1 %v7647_v35 }
0x31e7   :  { %6469 = vmatprep.subr.bf16.mxu1 %v6807_v2 }
0x32ac   :  { %v4081_v57 = vpop.f32.mrb[36].mxu1 }
0x32ad   :  { %v4082_v56 = vadd.f32 %v4081_v57, %v7727_v51  ;;  %v5932_v55 = vpop.f32.mrb[37].mxu1 }
0x32af   :  { %6740 = vtanh.f32 %v4082_v56  ;;  %v4672_v44 = vmul.f32 -1.442695, %v4082_v56 }
0x32b1   :  { %6742 = vpow2.f32 %v4672_v44 }
0x32b9   :  { %v6741_v42 = vpop.eup %6740 }
0x32ba   :  { %4094 = vrot.lane.b32.xlu1 %v6741_v42, %s6810_s0 }
0x32bb   :  { %v6743_v60 = vpop.eup %6742 }
0x32bc   :  { %v4088_v7 = vadd.f32 1.0, %v6743_v60 }
0x32be   :  { %6744 = vrcp.f32 %v4088_v7 }
0x32c8   :  { %v6745_v32 = vpop.eup %6744 }
0x32c9   :  { %v4092_v35 = vmul.f32 %v6745_v32, %v7859_v53 }
0x332c   :  { %v4095_v59 = vpop.permute.xlu1 %4094 }
0x332d   :  { %v4097_v49 = vmul.f32 %v6745_v32, %v4095_v59 }
0x332f   :  { %4099 = vrot.lane.b32.xlu0 %v4097_v49, %s6811_s6 }
0x33a1   :  { %v4100_v61 = vpop.permute.xlu0 %4099 }
0x33a2   :  { %v7946_v62 = vadd.f32 %v4100_v61, %v4092_v35 }
0x33a4   :  { %6746 = vtanh.f32 %v7946_v62 }
0x33ae   :  { %v6747_v39 = vpop.eup %6746 }
0x33af   :  { %4105 = vrot.lane.b32.xlu1 %v6747_v39, %s6810_s0 }
0x3421   :  { %v4106_v0 = vpop.permute.xlu1 %4105 }
0x3422   :  { %v7950_v46 = vmul.f32 %v6745_v32, %v4106_v0 }
0x3424   :  { %4110 = vrot.lane.b32.xlu0 %v7950_v46, %s6811_s6 }
0x3496   :  { %v4111_v36 = vpop.permute.xlu0 %4110 }
0x3497   :  { %5942 = vmatmul.mubr.msk.f32.vlgmr.msra.gmra.mrb[36].mxu0 %vm472_vm1, %v4111_v36 }
0x3498   :  { %6438 = vmatpush3.bf16.msra.mxu0 %v7592_v31  ;;  %5958 = vmatprep.mubr.msk.f32.mxu0 %vm6808_vm0, %v6809_v5 }
0x3499   :  { %6439 = vmatprep.subr.bf16.mxu0 %v6807_v2 }
0x349c   :  { %6441 = vmatpush3.bf16.msra.mxu0 %v7603_v40 }
0x349d   :  { %6442 = vmatprep.subr.bf16.mxu0 %v6807_v2 }
0x34a0   :  { %6444 = vmatpush3.bf16.msra.mxu0 %v7771_v11  ;;  %v4190_v11 = vrot.slane %v7805_v28, 3 }
0x34a1   :  { %5956 = vmatprep.subr.mxu0 %v6809_v5 }
0x34a4   :  { %5957 = vmatpush3.msra.mxu0 %v7778_v13 }
0x34a5   :  { %6457 = vmatprep.subr.bf16.mxu0 %v6807_v2 }
0x356a   :  { %v4180_v53 = vpop.f32.mrb[36].mxu0 }
0x356b   :  { %v4181_v31 = vadd.f32 %v4180_v53, %v7785_v14  ;;  %v5943_v6 = vpop.f32.mrb[37].mxu0 }
0x356d   :  { %4184 = vst.msk [vmem:[#allocation2 + $0x2] sm:$0x1] %vm3401_vm3, %v4181_v31  ;;  %4186 = vrot.lane.b32.xlu1 %v4181_v31, %s6811_s6 }
0x35df   :  { %v4187_v45 = vpop.permute.xlu1 %4186 }
0x35e0   :  { %v4189_v40 = vsel %vm472_vm1, %v7905_v41, %v4187_v45 }
0x35e1   :  { %5959 = vmatmul.mubr.msk.f32.vlgmr.msra.gmra.mrb[38].mxu0 %vm3411_vm4, %v4189_v40 }
0x35e2   :  { %6459 = vmatpush3.bf16.msra.mxu0 %v7683_v47  ;;  %5996 = vmatprep.mubr.msk.f32.mxu0 %vm6808_vm0, %v6809_v5 }
0x35e3   :  { %6460 = vmatprep.subr.bf16.mxu0 %v6807_v2 }
0x35e6   :  { %6462 = vmatpush3.bf16.msra.mxu0 %v7690_v27 }
0x35e7   :  { %6463 = vmatprep.subr.bf16.mxu0 %v6807_v2 }
0x35ea   :  { %6465 = vmatpush3.bf16.msra.mxu0 %v7697_v18 }
0x35eb   :  { %6466 = vmatprep.subr.bf16.mxu0 %v6807_v2 }
0x35ee   :  { %6468 = vmatpush3.bf16.msra.mxu0 %v7705_v43 }
0x36b4   :  { %v4261_v13 = vpop.f32.mrb[38].mxu0 }
0x36b5   :  { %v4262_v8 = vadd.f32 %v4261_v13, %v4190_v11  ;;  %v5960_v47 = vpop.f32.mrb[39].mxu0 }
0x36b7   :  { %6748 = vtanh.f32 %v4262_v8  ;;  %v4675_v38 = vmul.f32 -1.442695, %v4262_v8 }
0x36b9   :  { %6750 = vpow2.f32 %v4675_v38 }
0x36c1   :  { %v6749_v10 = vpop.eup %6748 }
0x36c2   :  { %4274 = vrot.lane.b32.xlu0 %v6749_v10, %s6810_s0 }
0x36c3   :  { %v6751_v27 = vpop.eup %6750 }
0x36c4   :  { %v4268_v20 = vadd.f32 1.0, %v6751_v27 }
0x36c6   :  { %6752 = vrcp.f32 %v4268_v20 }
0x36d0   :  { %v6753_v21 = vpop.eup %6752 }
0x36d1   :  { %v4272_v43 = vmul.f32 %v6753_v21, %v7898_v58 }
0x3734   :  { %v4275_v18 = vpop.permute.xlu0 %4274 }
0x3735   :  { %v4277_v4 = vmul.f32 %v6753_v21, %v4275_v18 }
0x3737   :  { %4279 = vrot.lane.b32.xlu1 %v4277_v4, %s6811_s6 }
0x37a9   :  { %v4280_v28 = vpop.permute.xlu1 %4279 }
0x37aa   :  { %v4282_v41 = vadd.f32 %v4280_v28, %v4272_v43 }
0x37ac   :  { %6754 = vtanh.f32 %v4282_v41 }
0x37b6   :  { %v6755_v12 = vpop.eup %6754 }
0x37b7   :  { %4285 = vrot.lane.b32.xlu0 %v6755_v12, %s6810_s0 }
0x37bb   :  { %4293 = vrot.lane.b32.xlu0 %v7926_v54, %s6810_s0 }
0x3829   :  { %v4286_v25 = vpop.permute.xlu0 %4285 }
0x382a   :  { %v4288_v9 = vmul.f32 %v6753_v21, %v4286_v25 }
0x382c   :  { %4290 = vrot.lane.b32.xlu1 %v4288_v9, %s6811_s6 }
0x382d   :  { %v4294_v17 = vpop.permute.xlu0 %4293 }
0x389e   :  { %v4291_v19 = vpop.permute.xlu1 %4290 }
0x389f   :  { %v4296_v22 = vsel %vm472_vm1, %v4291_v19, %v4294_v17 }
0x38a0   :  { %5978 = vmatmul.mubr.msk.f32.vlgmr.msra.gmra.mrb[38].mxu1 %vm576_vm2, %v4296_v22 }
0x38a1   :  { %6471 = vmatpush3.bf16.msra.mxu1 %v7745_v1  ;;  %6007 = vmatprep.mubr.msk.f32.mxu1 %vm6808_vm0, %v6809_v5 }
0x38a2   :  { %6472 = vmatprep.subr.bf16.mxu1 %v6807_v2 }
0x38a5   :  { %6474 = vmatpush3.bf16.msra.mxu1 %v7751_v52 }
0x3973   :  { %v4366_v58 = vpop.f32.mrb[38].mxu1 }
0x3974   :  { %v4367_v24 = vadd.f32 %v4366_v58, %v7671_v30  ;;  %v5979_v15 = vpop.f32.mrb[39].mxu1 }
0x3976   :  { %6756 = vtanh.f32 %v4367_v24  ;;  %v4677_v3 = vmul.f32 -1.442695, %v4367_v24 }
0x3978   :  { %6758 = vpow2.f32 %v4677_v3 }
0x3980   :  { %v6757_v37 = vpop.eup %6756 }
0x3981   :  { %4379 = vrot.lane.b32.xlu1 %v6757_v37, %s6810_s0 }
0x3982   :  { %v6759_v26 = vpop.eup %6758 }
0x3983   :  { %v4373_v29 = vadd.f32 1.0, %v6759_v26 }
0x3985   :  { %6760 = vrcp.f32 %v4373_v29 }
0x398f   :  { %v6761_v1 = vpop.eup %6760 }
0x3990   :  { %v4377_v2 = vmul.f32 %v6761_v1, %v7920_v23 }
0x39f3   :  { %v4380_v50 = vpop.permute.xlu1 %4379 }
0x39f4   :  { %v4382_v5 = vmul.f32 %v6761_v1, %v4380_v50 }
0x39f6   :  { %4384 = vrot.lane.b32.xlu0 %v4382_v5, %s6811_s6 }
0x3a68   :  { %v4385_v52 = vpop.permute.xlu0 %4384 }
0x3a69   :  { %v4387_v33 = vadd.f32 %v4385_v52, %v4377_v2 }
0x3a6b   :  { %6762 = vtanh.f32 %v4387_v33 }
0x3a75   :  { %v6763_v30 = vpop.eup %6762 }
0x3a76   :  { %4390 = vrot.lane.b32.xlu1 %v6763_v30, %s6810_s0 }
0x3a7a   :  { %4398 = vrot.lane.b32.xlu1 %v7950_v46, %s6810_s0 }
0x3ae8   :  { %v4391_v48 = vpop.permute.xlu1 %4390 }
0x3ae9   :  { %v4393_v54 = vmul.f32 %v6761_v1, %v4391_v48 }
0x3aeb   :  { %4395 = vrot.lane.b32.xlu0 %v4393_v54, %s6811_s6 }
0x3aec   :  { %v4399_v63 = vpop.permute.xlu1 %4398 }
0x3b5d   :  { %v4396_v34 = vpop.permute.xlu0 %4395 }
0x3b5e   :  { %v4401_v16 = vsel %vm472_vm1, %v4396_v34, %v4399_v63 }
0x3b5f   :  { %5997 = vmatmul.mubr.msk.f32.vlgmr.msra.gmra.mrb[40].mxu0 %vm576_vm2, %v4401_v16 }
0x3c32   :  { %v4471_v23 = vpop.f32.mrb[40].mxu0 }
0x3c33   :  { %v4472_v57 = vadd.f32 %v4471_v23, %v7727_v51  ;;  %v5998_v56 = vpop.f32.mrb[41].mxu0 }
0x3c35   :  { %6764 = vtanh.f32 %v4472_v57  ;;  %v4679_v42 = vmul.f32 -1.442695, %v4472_v57 }
0x3c37   :  { %6766 = vpow2.f32 %v4679_v42 }
0x3c3f   :  { %v6765_v55 = vpop.eup %6764 }
0x3c40   :  { %4484 = vrot.lane.b32.xlu0 %v6765_v55, %s6810_s0 }
0x3c41   :  { %v6767_v44 = vpop.eup %6766 }
0x3c42   :  { %v4478_v60 = vadd.f32 1.0, %v6767_v44 }
0x3c44   :  { %6768 = vrcp.f32 %v4478_v60 }
0x3c4e   :  { %v6769_v7 = vpop.eup %6768 }
0x3c4f   :  { %v4482_v49 = vmul.f32 %v6769_v7, %v7946_v62 }
0x3cb2   :  { %v4485_v32 = vpop.permute.xlu0 %4484 }
0x3cb3   :  { %v4487_v59 = vmul.f32 %v6769_v7, %v4485_v32 }
0x3cb5   :  { %4489 = vrot.lane.b32.xlu1 %v4487_v59, %s6811_s6 }
0x3d27   :  { %v4490_v35 = vpop.permute.xlu1 %4489 }
0x3d28   :  { %v4492_v61 = vadd.f32 %v4490_v35, %v4482_v49 }
0x3d2a   :  { %6770 = vtanh.f32 %v4492_v61 }
0x3d34   :  { %v6771_v51 = vpop.eup %6770 }
0x3d35   :  { %4495 = vrot.lane.b32.xlu0 %v6771_v51, %s6810_s0 }
0x3da7   :  { %v4496_v39 = vpop.permute.xlu0 %4495 }
0x3da8   :  { %v4498_v0 = vmul.f32 %v6769_v7, %v4496_v39 }
0x3daa   :  { %4500 = vrot.lane.b32.xlu1 %v4498_v0, %s6811_s6 }
0x3e1c   :  { %v4501_v46 = vpop.permute.xlu1 %4500 }
0x3e1d   :  { %6008 = vmatmul.mubr.msk.f32.vlgmr.msra.gmra.mrb[40].mxu1 %vm472_vm1, %v4501_v46 }
0x3ef0   :  { %v4570_v36 = vpop.f32.mrb[40].mxu1 }
0x3ef1   :  { %v4571_v53 = vadd.f32 %v4570_v36, %v7785_v14  ;;  %v6009_v31 = vpop.f32.mrb[41].mxu1 }
0x3ef3   :  { %4574 = vst.msk [vmem:[#allocation2 + $0x3] sm:$0x1] %vm3401_vm3, %v4571_v53 }
0x3ef4   :  { %6794 = shalt.err (!%p6791_p4)
}
0x3ef5   :  { %s6795_s26 = scalar_lea.hbm %s8042_s16, 64 }
0x3ef6   :  { %p6796_p5 = scmp.ne.s32.totalorder %s8042_s16, %s6795_s26  ;;  %p6799_p6 = scmp.lt.u32.totalorder %s6795_s26, %s8042_s16 }
0x3ef8   :  { %p6801_p7 = pnand %p6799_p6, %p6796_p5 }
0x3efa   :  { %6804 = shalt.err (!%p6801_p7)
}
0x3efb   :  { %4584 = dma.vmem_to_hbm [thread:$0]  %s4582_s15, 64, %s8042_s16, [#allocation3]  }
0x3efc   :  { %6805 = dma.done.wait [#allocation3], 64  }
0x3efd   :  { %6806 = vsyncadd [#allocation3], 4294967232 }
0x3efe   :  { %4588 = vsyncpa [#allocation3], 1 }

</bundles_post_ra>
